<compile_context>
chip_gen: v7x
topology: tpu7x:2x2x1
jax: 0.10.0
libtpu: 0.0.40
codegen_flags: <defaults>
</compile_context>

<pallas_src>
import jax
import jax.numpy as jnp
from jax.experimental import pallas as pl
from jax.experimental.pallas import tpu as pltpu


TB = 8  # images processed per grid step (batch tile)


# --------------------------------------------------------------------------
# Constant-folding helpers (run ONCE, outside the jitted forward)
# --------------------------------------------------------------------------
def _row_gather_cat(tb, ho_n, hin, k, stride, pad, dtype=jnp.bfloat16):
    """Tap-stacked, block-diagonal-over-batch 0/1 row-gather matrix.

    Shape (k*tb*Ho, tb*Hin); block for tap ki and image t selects input row
    t*Hin + stride*ho + ki - pad (all-zero row when that index is out of
    range, i.e. zero padding).  0/1 entries are exact in bf16.
    """
    ho = jnp.arange(ho_n)[:, None]
    h = jnp.arange(hin)[None, :]
    eye_b = jnp.eye(tb, dtype=jnp.float32)
    mats = []
    for ki in range(k):
        r = (h == (stride * ho + ki - pad)).astype(jnp.float32)     # (Ho, Hin)
        mats.append(jnp.kron(eye_b, r))                             # block-diag
    return jnp.concatenate(mats, axis=0).astype(dtype)              # (k*tb*Ho, tb*Hin)


def _conv_col_weights(w_oihw, win, stride, pad, dtype=jnp.bfloat16):
    """Toeplitz-expanded conv weights.

    Returns B of shape (k, Win*Cin, Wo*Cout) with
      B[ki][w*Cin + ci, wo*Cout + co] = W[co, ci, ki, w - stride*wo + pad]
    (zero when the kernel-column index is out of range -> zero padding).
    """
    cout, cin, k, _ = w_oihw.shape
    wo_n = (win + 2 * pad - k) // stride + 1
    w_t = jnp.transpose(w_oihw, (2, 3, 1, 0))            # (kh, kw, Cin, Cout)
    wi = jnp.arange(win)[:, None]
    wo = jnp.arange(wo_n)[None, :]
    kj = wi - stride * wo + pad                          # (Win, Wo)
    valid = (kj >= 0) & (kj < k)
    kj_c = jnp.clip(kj, 0, k - 1)
    b = w_t[:, kj_c, :, :]                               # (k, Win, Wo, Cin, Cout)
    b = jnp.where(valid[None, :, :, None, None], b, 0.0)
    b = jnp.transpose(b, (0, 1, 3, 2, 4)).reshape(k, win * cin, wo_n * cout)
    return b.astype(dtype), wo_n


def _affine_rows(bias, gamma, beta, mean, var, wo_n, eps=1e-5):
    """(3, Wo*Cout) f32: [conv bias; BN scale; BN shift], tiled over out cols."""
    scale = gamma / jnp.sqrt(var + eps)
    shift = beta - mean * scale
    return jnp.stack([jnp.tile(bias, wo_n),
                      jnp.tile(scale, wo_n),
                      jnp.tile(shift, wo_n)]).astype(jnp.float32)


def _pool_col_select(win, c, k, stride, pad, dtype=jnp.bfloat16):
    """(k, Win*C, Wo*C) 0/1 column-gather matrices (zero pad -> zero column)."""
    wo_n = (win + 2 * pad - k) // stride + 1
    wi = jnp.arange(win)[:, None]
    wo = jnp.arange(wo_n)[None, :]
    eye_c = jnp.eye(c, dtype=jnp.float32)
    mats = []
    for kj in range(k):
        sel = (wi == (stride * wo + kj - pad)).astype(jnp.float32)   # (Win, Wo)
        mats.append(jnp.einsum("wo,cd->wcod", sel, eye_c).reshape(win * c, wo_n * c))
    return jnp.stack(mats).astype(dtype)


def prepare_params(params, eps=1e-5):
    """Fold weights, BN stats, strides and zero padding into kernel constants."""
    prep = {}

    # conv1: 32x32x2 -> 16x16x8, k=5 s=2 p=2
    p = params["conv1"]
    prep["r1"] = _row_gather_cat(TB, 16, 32, 5, 2, 2)                # (640, 256)
    prep["b1"], wo1 = _conv_col_weights(p["w"], 32, 2, 2)            # (5, 64, 128)
    prep["a1"] = _affine_rows(p["b"], p["gamma"], p["beta"], p["mean"], p["var"], wo1, eps)

    # pad1 (ZeroPad2d(2)) + pool1 (MaxPool 5x5 stride 2): 16x16x8 -> 8x8x8
    prep["sp"] = _pool_col_select(16, 8, 5, 2, 2)                    # (5, 128, 64)
    prep["rp"] = _row_gather_cat(TB, 8, 16, 5, 2, 2)                 # (320, 128)

    # conv2: 8x8x8 -> 4x4x32, k=3 s=2 p=1
    p = params["conv2"]
    prep["r2"] = _row_gather_cat(TB, 4, 8, 3, 2, 1)                  # (96, 64)
    prep["b2"], wo2 = _conv_col_weights(p["w"], 8, 2, 1)             # (3, 64, 128)
    prep["a2"] = _affine_rows(p["b"], p["gamma"], p["beta"], p["mean"], p["var"], wo2, eps)

    # pad2 (ZeroPad2d(2)) + conv3 (k=3 s=2 p=1): folded as one conv with p=3
    p = params["conv3"]
    prep["r3"] = _row_gather_cat(TB, 4, 4, 3, 2, 3)                  # (96, 32)
    prep["b3"], wo3 = _conv_col_weights(p["w"], 4, 2, 3)             # (3, 128, 256)
    prep["a3"] = _affine_rows(p["b"], p["gamma"], p["beta"], p["mean"], p["var"], wo3, eps)

    # conv4: 4x4x64 -> 2x2x128, k=3 s=2 p=1.  BN4 is folded into the head, so
    # conv4 only needs its bias row (epilogue = bias + ReLU).
    p = params["conv4"]
    prep["r4"] = _row_gather_cat(TB, 2, 4, 3, 2, 1)                  # (48, 32)
    prep["b4"], wo4 = _conv_col_weights(p["w"], 4, 2, 1)             # (3, 256, 256)
    prep["a4"] = jnp.tile(p["b"], wo4).reshape(1, -1).astype(jnp.float32)   # (1, 256)

    # Head: BN4 (scale/shift), AdaptiveAvgPool2d(1) (1/4) and the spatial W-sum
    # are folded into wh/bh (exact in f32 -- no zero padding in between).
    scale4 = p["gamma"] / jnp.sqrt(p["var"] + eps)
    shift4 = p["beta"] - p["mean"] * scale4
    wh_core = (params["lin_w"] * scale4[None, :]).T / 4.0            # (128, 10)
    wh = jnp.tile(wh_core, (wo4, 1))                                 # (256, 10)
    prep["wh"] = jnp.pad(wh, ((0, 0), (0, 128 - 10))).astype(jnp.bfloat16)
    bh = params["lin_w"] @ shift4 + params["lin_b"]                  # (10,)
    prep["bh"] = jnp.pad(bh, (0, 128 - 10)).reshape(1, 128).astype(jnp.float32)

    # Per-image row-sum matrix for the head (sums the 2 rows of each image).
    prep["srow"] = jnp.kron(jnp.eye(TB, dtype=jnp.float32),
                            jnp.ones((1, 2), jnp.float32)).astype(jnp.bfloat16)  # (8, 16)
    return prep


# --------------------------------------------------------------------------
# The fused Pallas kernel: TB batch elements end-to-end, all in VMEM
# --------------------------------------------------------------------------
def _audio_net_kernel(x_ref,
                      r1_ref, b1_ref, a1_ref,
                      sp_ref, rp_ref,
                      r2_ref, b2_ref, a2_ref,
                      r3_ref, b3_ref, a3_ref,
                      r4_ref, b4_ref, a4_ref,
                      srow_ref, wh_ref, bh_ref,
                      o_ref):

    def conv_block(f_bf16, r_ref, b_ref, a_ref, apply_bn=True):
        """strided conv (+zero pad) -> bias -> ReLU -> [BN], batch-stacked rows."""
        k = b_ref.shape[0]
        m = r_ref.shape[0] // k                      # TB * Ho
        # Fused exact 0/1 row gather for all k taps: ONE bf16 matmul.
        g = jnp.dot(r_ref[...], f_bf16,
                    preferred_element_type=jnp.float32).astype(jnp.bfloat16)
        # k Toeplitz conv matmuls, bf16 operands, f32 accumulation.
        acc = jnp.dot(g[0:m, :], b_ref[0], preferred_element_type=jnp.float32)
        for ki in range(1, k):
            acc = acc + jnp.dot(g[ki * m:(ki + 1) * m, :], b_ref[ki],
                                preferred_element_type=jnp.float32)
        bias = a_ref[pl.ds(0, 1), :]
        y = jnp.maximum(acc + bias, 0.0)             # conv bias + ReLU
        if apply_bn:                                 # BatchNorm (eval mode, folded)
            scale = a_ref[pl.ds(1, 1), :]
            shift = a_ref[pl.ds(2, 1), :]
            y = y * scale + shift
        return y

    f = x_ref[...].astype(jnp.bfloat16)              # (TB*32, 64) = (rows, W*Cin)

    f = conv_block(f, r1_ref, b1_ref, a1_ref).astype(jnp.bfloat16)   # (TB*16, 128)

    # pad1 (ZeroPad2d(2)) + pool1 (MaxPool 5x5, stride 2) via exact bf16 0/1
    # gathers; max with the all-zero rows/cols reproduces the zero padding.
    # TODO(synk): the column selection could move off the MXU entirely via
    # pltpu.roll lane shifts + masks; kept as bf16 matmuls for robustness.
    cmax = None
    for kj in range(sp_ref.shape[0]):
        c = jnp.dot(f, sp_ref[kj], preferred_element_type=jnp.float32)   # (TB*16, 64)
        cmax = c if cmax is None else jnp.maximum(cmax, c)
    gp = jnp.dot(rp_ref[...], cmax.astype(jnp.bfloat16),
                 preferred_element_type=jnp.float32)                     # (5*TB*8, 64)
    mrows = gp.shape[0] // sp_ref.shape[0]
    pmax = gp[0:mrows, :]
    for ki in range(1, sp_ref.shape[0]):
        pmax = jnp.maximum(pmax, gp[ki * mrows:(ki + 1) * mrows, :])
    f = pmax.astype(jnp.bfloat16)                                        # (TB*8, 64)

    f = conv_block(f, r2_ref, b2_ref, a2_ref).astype(jnp.bfloat16)       # (TB*4, 128)
    f = conv_block(f, r3_ref, b3_ref, a3_ref).astype(jnp.bfloat16)       # (TB*4, 256)
    f = conv_block(f, r4_ref, b4_ref, a4_ref,
                   apply_bn=False).astype(jnp.bfloat16)                  # (TB*2, 256)

    # Head: per-image H-sum, then Linear with BN4 / (1/4) / W-sum folded in.
    rowsum = jnp.dot(srow_ref[...], f, preferred_element_type=jnp.float32)   # (TB, 256)
    logits = jnp.dot(rowsum.astype(jnp.bfloat16), wh_ref[...],
                     preferred_element_type=jnp.float32) + bh_ref[...]
    o_ref[...] = logits                              # (TB, 128) lane-dense; cols 10.. are 0


# --------------------------------------------------------------------------
# Wrapper: one pallas_call for the whole forward pass
# --------------------------------------------------------------------------
_CONST_ORDER = ("r1", "b1", "a1", "sp", "rp",
                "r2", "b2", "a2", "r3", "b3", "a3",
                "r4", "b4", "a4", "srow", "wh", "bh")


@jax.jit
def audio_classifier_forward(x_nchw, prep):
    assert x_nchw.shape[1:] == (2, 32, 32), x_nchw.shape
    B = x_nchw.shape[0]
    Bp = ((B + TB - 1) // TB) * TB
    if Bp != B:                                   # pad batch to a multiple of TB
        x_nchw = jnp.pad(x_nchw, ((0, Bp - B), (0, 0), (0, 0), (0, 0)))

    # NCHW -> NHWC -> batch-stacked 2-D layout (B*H, W*C); cheap glue on input.
    x2d = jnp.transpose(x_nchw, (0, 2, 3, 1)).reshape(Bp * 32, 64)

    consts = [prep[n] for n in _CONST_ORDER]

    in_specs = [pl.BlockSpec((TB * 32, 64), lambda i: (i, 0))]
    in_specs += [pl.BlockSpec(a.shape, lambda i, n=a.ndim: (0,) * n) for a in consts]

    out = pl.pallas_call(
        _audio_net_kernel,
        out_shape=jax.ShapeDtypeStruct((Bp, 128), jnp.float32),
        grid=(Bp // TB,),
        in_specs=in_specs,
        out_specs=pl.BlockSpec((TB, 128), lambda i: (i, 0)),
        compiler_params=pltpu.CompilerParams(dimension_semantics=("parallel",)),
    )(x2d, *consts)

    return out[:B, :10]


# --------------------------------------------------------------------------
# Parameters (deterministic, synthetic) and a plain-XLA reference for checking
# --------------------------------------------------------------------------
def init_params(key):
    def conv_p(key, cout, cin, k):
        k1, k2, k3, k4, k5, k6 = jax.random.split(key, 6)
        return dict(
            w=jax.random.normal(k1, (cout, cin, k, k), jnp.float32) * 0.1,
            b=jax.random.normal(k2, (cout,), jnp.float32) * 0.05,
            gamma=1.0 + 0.1 * jax.random.normal(k3, (cout,), jnp.float32),
            beta=0.05 * jax.random.normal(k4, (cout,), jnp.float32),
            mean=0.05 * jax.random.normal(k5, (cout,), jnp.float32),
            var=jnp.abs(jax.random.normal(k6, (cout,), jnp.float32)) * 0.1 + 1.0,
        )

    ks = jax.random.split(key, 6)
    return dict(
        conv1=conv_p(ks[0], 8, 2, 5),
        conv2=conv_p(ks[1], 32, 8, 3),
        conv3=conv_p(ks[2], 64, 32, 3),
        conv4=conv_p(ks[3], 128, 64, 3),
        lin_w=jax.random.normal(ks[4], (10, 128), jnp.float32) * 0.1,
        lin_b=jax.random.normal(ks[5], (10,), jnp.float32) * 0.05,
    )


@jax.jit
def reference_forward(x_nchw, params, eps=1e-5):
    """Pure-XLA reference (eval-mode BN), used only for the in-script self-check."""
    hi = jax.lax.Precision.HIGHEST
    x = jnp.transpose(x_nchw, (0, 2, 3, 1))  # NHWC

    def conv(x, w, b, stride, pad):
        dn = jax.lax.conv_dimension_numbers(x.shape, w.shape, ("NHWC", "OIHW", "NHWC"))
        y = jax.lax.conv_general_dilated(x, w, (stride, stride),
                                         [(pad, pad), (pad, pad)],
                                         dimension_numbers=dn, precision=hi)
        return y + b[None, None, None, :]

    def bn(x, p):
        scale = p["gamma"] / jnp.sqrt(p["var"] + eps)
        return x * scale + (p["beta"] - p["mean"] * scale)

    p = params["conv1"]; x = bn(jax.nn.relu(conv(x, p["w"], p["b"], 2, 2)), p)
    x = jnp.pad(x, ((0, 0), (2, 2), (2, 2), (0, 0)))
    x = jax.lax.reduce_window(x, -jnp.inf, jax.lax.max,
                              (1, 5, 5, 1), (1, 2, 2, 1), "VALID")
    p = params["conv2"]; x = bn(jax.nn.relu(conv(x, p["w"], p["b"], 2, 1)), p)
    x = jnp.pad(x, ((0, 0), (2, 2), (2, 2), (0, 0)))
    p = params["conv3"]; x = bn(jax.nn.relu(conv(x, p["w"], p["b"], 2, 1)), p)
    p = params["conv4"]; x = bn(jax.nn.relu(conv(x, p["w"], p["b"], 2, 1)), p)
    x = jnp.mean(x, axis=(1, 2))
    return jnp.dot(x, params["lin_w"].T, precision=hi) + params["lin_b"]


if __name__ == "__main__":
    key = jax.random.PRNGKey(0)
    k_in, k_par = jax.random.split(key)
    # NCHW input consistent with the module: 2 input channels, 32x32 spectrogram.
    B = 16                                        # 2 grid steps at TB=8
    x = jax.random.normal(k_in, (B, 2, 32, 32), jnp.float32)
    params = init_params(k_par)
    prep = prepare_params(params)                 # one-time constant folding

    out = jax.block_until_ready(audio_classifier_forward(x, prep))
    assert out.shape == (B, 10), out.shape
    assert bool(jnp.all(jnp.isfinite(out)))

    ref = jax.block_until_ready(reference_forward(x, params))
    err = float(jnp.max(jnp.abs(out - ref)))
    tol = 8e-2 * max(1.0, float(jnp.max(jnp.abs(ref))))
    assert err < tol, (err, tol)

    # Also exercise the ragged-batch (padding) path.
    out_small = jax.block_until_ready(audio_classifier_forward(x[:3], prep))
    err2 = float(jnp.max(jnp.abs(out_small - ref[:3])))
    assert out_small.shape == (3, 10) and err2 < tol, (out_small.shape, err2, tol)

    print("KERNEL_OK")
</pallas_src>

<mosaic_0001>
module attributes {stable_mosaic.version = 11 : i64} {
  func.func @_audio_net_kernel(%arg0: i32, %arg1: memref<256x64xf32, #tpu.memory_space<vmem>>, %arg2: memref<640x256xbf16, #tpu.memory_space<vmem>>, %arg3: memref<5x64x128xbf16, #tpu.memory_space<vmem>>, %arg4: memref<3x128xf32, #tpu.memory_space<vmem>>, %arg5: memref<5x128x64xbf16, #tpu.memory_space<vmem>>, %arg6: memref<320x128xbf16, #tpu.memory_space<vmem>>, %arg7: memref<96x64xbf16, #tpu.memory_space<vmem>>, %arg8: memref<3x64x128xbf16, #tpu.memory_space<vmem>>, %arg9: memref<3x128xf32, #tpu.memory_space<vmem>>, %arg10: memref<96x32xbf16, #tpu.memory_space<vmem>>, %arg11: memref<3x128x256xbf16, #tpu.memory_space<vmem>>, %arg12: memref<3x256xf32, #tpu.memory_space<vmem>>, %arg13: memref<48x32xbf16, #tpu.memory_space<vmem>>, %arg14: memref<3x256x256xbf16, #tpu.memory_space<vmem>>, %arg15: memref<1x256xf32, #tpu.memory_space<vmem>>, %arg16: memref<8x16xbf16, #tpu.memory_space<vmem>>, %arg17: memref<256x128xbf16, #tpu.memory_space<vmem>>, %arg18: memref<1x128xf32, #tpu.memory_space<vmem>>, %arg19: memref<8x128xf32, #tpu.memory_space<vmem>>) attributes {dimension_semantics = [#tpu.dimension_semantics<parallel>], iteration_bounds = array<i64: 2>, scalar_prefetch = 0 : i64, scratch_operands = 0 : i64, tpu.core_type = #tpu.core_type<tc>, window_params = [{transform_indices = @transform_0, window_bounds = array<i64: 256, 64>}, {pipeline_mode = #tpu.pipeline_mode<synchronous>, transform_indices = @transform_1, window_bounds = array<i64: 640, 256>}, {pipeline_mode = #tpu.pipeline_mode<synchronous>, transform_indices = @transform_2, window_bounds = array<i64: 5, 64, 128>}, {pipeline_mode = #tpu.pipeline_mode<synchronous>, transform_indices = @transform_3, window_bounds = array<i64: 3, 128>}, {pipeline_mode = #tpu.pipeline_mode<synchronous>, transform_indices = @transform_4, window_bounds = array<i64: 5, 128, 64>}, {pipeline_mode = #tpu.pipeline_mode<synchronous>, transform_indices = @transform_5, window_bounds = array<i64: 320, 128>}, {pipeline_mode = #tpu.pipeline_mode<synchronous>, transform_indices = @transform_6, window_bounds = array<i64: 96, 64>}, {pipeline_mode = #tpu.pipeline_mode<synchronous>, transform_indices = @transform_7, window_bounds = array<i64: 3, 64, 128>}, {pipeline_mode = #tpu.pipeline_mode<synchronous>, transform_indices = @transform_8, window_bounds = array<i64: 3, 128>}, {pipeline_mode = #tpu.pipeline_mode<synchronous>, transform_indices = @transform_9, window_bounds = array<i64: 96, 32>}, {pipeline_mode = #tpu.pipeline_mode<synchronous>, transform_indices = @transform_10, window_bounds = array<i64: 3, 128, 256>}, {pipeline_mode = #tpu.pipeline_mode<synchronous>, transform_indices = @transform_11, window_bounds = array<i64: 3, 256>}, {pipeline_mode = #tpu.pipeline_mode<synchronous>, transform_indices = @transform_12, window_bounds = array<i64: 48, 32>}, {pipeline_mode = #tpu.pipeline_mode<synchronous>, transform_indices = @transform_13, window_bounds = array<i64: 3, 256, 256>}, {pipeline_mode = #tpu.pipeline_mode<synchronous>, transform_indices = @transform_14, window_bounds = array<i64: 1, 256>}, {pipeline_mode = #tpu.pipeline_mode<synchronous>, transform_indices = @transform_15, window_bounds = array<i64: 8, 16>}, {pipeline_mode = #tpu.pipeline_mode<synchronous>, transform_indices = @transform_16, window_bounds = array<i64: 256, 128>}, {pipeline_mode = #tpu.pipeline_mode<synchronous>, transform_indices = @transform_17, window_bounds = array<i64: 1, 128>}, {transform_indices = @transform_18, window_bounds = array<i64: 8, 128>}]} {
    %c0 = arith.constant 0 : index
    %c0_0 = arith.constant 0 : index
    %0 = vector.load %arg1[%c0, %c0_0] : memref<256x64xf32, #tpu.memory_space<vmem>>, vector<256x64xf32>
    %1 = arith.truncf %0 : vector<256x64xf32> to vector<256x64xbf16>
    %c0_1 = arith.constant 0 : index
    %c0_2 = arith.constant 0 : index
    %2 = vector.load %arg2[%c0_1, %c0_2] : memref<640x256xbf16, #tpu.memory_space<vmem>>, vector<640x256xbf16>
    %cst = arith.constant dense<0.000000e+00> : vector<640x64xf32>
    %3 = tpu.matmul %2, %1, %cst {dimension_numbers = #tpu.dot_dimension_numbers<[1], [0], [0], [1], [0, 0, 1, 1], [], []>} : vector<640x256xbf16>, vector<256x64xbf16>, vector<640x64xf32> -> vector<640x64xf32>
    %4 = arith.truncf %3 : vector<640x64xf32> to vector<640x64xbf16>
    %5 = vector.extract_strided_slice %4 {offsets = [0, 0], sizes = [128, 64], strides = [1, 1]} : vector<640x64xbf16> to vector<128x64xbf16>
    %c0_3 = arith.constant 0 : index
    %c0_4 = arith.constant 0 : index
    %c0_5 = arith.constant 0 : index
    %6 = vector.load %arg3[%c0_3, %c0_4, %c0_5] : memref<5x64x128xbf16, #tpu.memory_space<vmem>>, vector<1x64x128xbf16>
    %7 = vector.shape_cast %6 : vector<1x64x128xbf16> to vector<64x128xbf16>
    %cst_6 = arith.constant dense<0.000000e+00> : vector<128x128xf32>
    %8 = tpu.matmul %5, %7, %cst_6 {dimension_numbers = #tpu.dot_dimension_numbers<[1], [0], [0], [1], [0, 0, 1, 1], [], []>} : vector<128x64xbf16>, vector<64x128xbf16>, vector<128x128xf32> -> vector<128x128xf32>
    %9 = vector.extract_strided_slice %4 {offsets = [128, 0], sizes = [128, 64], strides = [1, 1]} : vector<640x64xbf16> to vector<128x64xbf16>
    %c1 = arith.constant 1 : index
    %c0_7 = arith.constant 0 : index
    %c0_8 = arith.constant 0 : index
    %10 = vector.load %arg3[%c1, %c0_7, %c0_8] : memref<5x64x128xbf16, #tpu.memory_space<vmem>>, vector<1x64x128xbf16>
    %11 = vector.shape_cast %10 : vector<1x64x128xbf16> to vector<64x128xbf16>
    %cst_9 = arith.constant dense<0.000000e+00> : vector<128x128xf32>
    %12 = tpu.matmul %9, %11, %cst_9 {dimension_numbers = #tpu.dot_dimension_numbers<[1], [0], [0], [1], [0, 0, 1, 1], [], []>} : vector<128x64xbf16>, vector<64x128xbf16>, vector<128x128xf32> -> vector<128x128xf32>
    %13 = arith.addf %8, %12 : vector<128x128xf32>
    %14 = vector.extract_strided_slice %4 {offsets = [256, 0], sizes = [128, 64], strides = [1, 1]} : vector<640x64xbf16> to vector<128x64xbf16>
    %c2 = arith.constant 2 : index
    %c0_10 = arith.constant 0 : index
    %c0_11 = arith.constant 0 : index
    %15 = vector.load %arg3[%c2, %c0_10, %c0_11] : memref<5x64x128xbf16, #tpu.memory_space<vmem>>, vector<1x64x128xbf16>
    %16 = vector.shape_cast %15 : vector<1x64x128xbf16> to vector<64x128xbf16>
    %cst_12 = arith.constant dense<0.000000e+00> : vector<128x128xf32>
    %17 = tpu.matmul %14, %16, %cst_12 {dimension_numbers = #tpu.dot_dimension_numbers<[1], [0], [0], [1], [0, 0, 1, 1], [], []>} : vector<128x64xbf16>, vector<64x128xbf16>, vector<128x128xf32> -> vector<128x128xf32>
    %18 = arith.addf %13, %17 : vector<128x128xf32>
    %19 = vector.extract_strided_slice %4 {offsets = [384, 0], sizes = [128, 64], strides = [1, 1]} : vector<640x64xbf16> to vector<128x64xbf16>
    %c3 = arith.constant 3 : index
    %c0_13 = arith.constant 0 : index
    %c0_14 = arith.constant 0 : index
    %20 = vector.load %arg3[%c3, %c0_13, %c0_14] : memref<5x64x128xbf16, #tpu.memory_space<vmem>>, vector<1x64x128xbf16>
    %21 = vector.shape_cast %20 : vector<1x64x128xbf16> to vector<64x128xbf16>
    %cst_15 = arith.constant dense<0.000000e+00> : vector<128x128xf32>
    %22 = tpu.matmul %19, %21, %cst_15 {dimension_numbers = #tpu.dot_dimension_numbers<[1], [0], [0], [1], [0, 0, 1, 1], [], []>} : vector<128x64xbf16>, vector<64x128xbf16>, vector<128x128xf32> -> vector<128x128xf32>
    %23 = arith.addf %18, %22 : vector<128x128xf32>
    %24 = vector.extract_strided_slice %4 {offsets = [512, 0], sizes = [128, 64], strides = [1, 1]} : vector<640x64xbf16> to vector<128x64xbf16>
    %c4 = arith.constant 4 : index
    %c0_16 = arith.constant 0 : index
    %c0_17 = arith.constant 0 : index
    %25 = vector.load %arg3[%c4, %c0_16, %c0_17] : memref<5x64x128xbf16, #tpu.memory_space<vmem>>, vector<1x64x128xbf16>
    %26 = vector.shape_cast %25 : vector<1x64x128xbf16> to vector<64x128xbf16>
    %cst_18 = arith.constant dense<0.000000e+00> : vector<128x128xf32>
    %27 = tpu.matmul %24, %26, %cst_18 {dimension_numbers = #tpu.dot_dimension_numbers<[1], [0], [0], [1], [0, 0, 1, 1], [], []>} : vector<128x64xbf16>, vector<64x128xbf16>, vector<128x128xf32> -> vector<128x128xf32>
    %28 = arith.addf %23, %27 : vector<128x128xf32>
    %c0_19 = arith.constant 0 : index
    %c0_20 = arith.constant 0 : index
    %29 = vector.load %arg4[%c0_19, %c0_20] : memref<3x128xf32, #tpu.memory_space<vmem>>, vector<1x128xf32>
    %30 = vector.broadcast %29 : vector<1x128xf32> to vector<128x128xf32>
    %31 = arith.addf %28, %30 : vector<128x128xf32>
    %cst_21 = arith.constant 0.000000e+00 : f32
    %32 = vector.broadcast %cst_21 : f32 to vector<128x128xf32>
    %33 = arith.maximumf %31, %32 : vector<128x128xf32>
    %c1_22 = arith.constant 1 : index
    %c0_23 = arith.constant 0 : index
    %34 = vector.load %arg4[%c1_22, %c0_23] : memref<3x128xf32, #tpu.memory_space<vmem>>, vector<1x128xf32>
    %c2_24 = arith.constant 2 : index
    %c0_25 = arith.constant 0 : index
    %35 = vector.load %arg4[%c2_24, %c0_25] : memref<3x128xf32, #tpu.memory_space<vmem>>, vector<1x128xf32>
    %36 = vector.broadcast %34 : vector<1x128xf32> to vector<128x128xf32>
    %37 = arith.mulf %33, %36 : vector<128x128xf32>
    %38 = vector.broadcast %35 : vector<1x128xf32> to vector<128x128xf32>
    %39 = arith.addf %37, %38 : vector<128x128xf32>
    %40 = arith.truncf %39 : vector<128x128xf32> to vector<128x128xbf16>
    %c0_26 = arith.constant 0 : index
    %c0_27 = arith.constant 0 : index
    %c0_28 = arith.constant 0 : index
    %41 = vector.load %arg5[%c0_26, %c0_27, %c0_28] : memref<5x128x64xbf16, #tpu.memory_space<vmem>>, vector<1x128x64xbf16>
    %42 = vector.shape_cast %41 : vector<1x128x64xbf16> to vector<128x64xbf16>
    %cst_29 = arith.constant dense<0.000000e+00> : vector<128x64xf32>
    %43 = tpu.matmul %40, %42, %cst_29 {dimension_numbers = #tpu.dot_dimension_numbers<[1], [0], [0], [1], [0, 0, 1, 1], [], []>} : vector<128x128xbf16>, vector<128x64xbf16>, vector<128x64xf32> -> vector<128x64xf32>
    %c1_30 = arith.constant 1 : index
    %c0_31 = arith.constant 0 : index
    %c0_32 = arith.constant 0 : index
    %44 = vector.load %arg5[%c1_30, %c0_31, %c0_32] : memref<5x128x64xbf16, #tpu.memory_space<vmem>>, vector<1x128x64xbf16>
    %45 = vector.shape_cast %44 : vector<1x128x64xbf16> to vector<128x64xbf16>
    %cst_33 = arith.constant dense<0.000000e+00> : vector<128x64xf32>
    %46 = tpu.matmul %40, %45, %cst_33 {dimension_numbers = #tpu.dot_dimension_numbers<[1], [0], [0], [1], [0, 0, 1, 1], [], []>} : vector<128x128xbf16>, vector<128x64xbf16>, vector<128x64xf32> -> vector<128x64xf32>
    %47 = arith.maximumf %43, %46 : vector<128x64xf32>
    %c2_34 = arith.constant 2 : index
    %c0_35 = arith.constant 0 : index
    %c0_36 = arith.constant 0 : index
    %48 = vector.load %arg5[%c2_34, %c0_35, %c0_36] : memref<5x128x64xbf16, #tpu.memory_space<vmem>>, vector<1x128x64xbf16>
    %49 = vector.shape_cast %48 : vector<1x128x64xbf16> to vector<128x64xbf16>
    %cst_37 = arith.constant dense<0.000000e+00> : vector<128x64xf32>
    %50 = tpu.matmul %40, %49, %cst_37 {dimension_numbers = #tpu.dot_dimension_numbers<[1], [0], [0], [1], [0, 0, 1, 1], [], []>} : vector<128x128xbf16>, vector<128x64xbf16>, vector<128x64xf32> -> vector<128x64xf32>
    %51 = arith.maximumf %47, %50 : vector<128x64xf32>
    %c3_38 = arith.constant 3 : index
    %c0_39 = arith.constant 0 : index
    %c0_40 = arith.constant 0 : index
    %52 = vector.load %arg5[%c3_38, %c0_39, %c0_40] : memref<5x128x64xbf16, #tpu.memory_space<vmem>>, vector<1x128x64xbf16>
    %53 = vector.shape_cast %52 : vector<1x128x64xbf16> to vector<128x64xbf16>
    %cst_41 = arith.constant dense<0.000000e+00> : vector<128x64xf32>
    %54 = tpu.matmul %40, %53, %cst_41 {dimension_numbers = #tpu.dot_dimension_numbers<[1], [0], [0], [1], [0, 0, 1, 1], [], []>} : vector<128x128xbf16>, vector<128x64xbf16>, vector<128x64xf32> -> vector<128x64xf32>
    %55 = arith.maximumf %51, %54 : vector<128x64xf32>
    %c4_42 = arith.constant 4 : index
    %c0_43 = arith.constant 0 : index
    %c0_44 = arith.constant 0 : index
    %56 = vector.load %arg5[%c4_42, %c0_43, %c0_44] : memref<5x128x64xbf16, #tpu.memory_space<vmem>>, vector<1x128x64xbf16>
    %57 = vector.shape_cast %56 : vector<1x128x64xbf16> to vector<128x64xbf16>
    %cst_45 = arith.constant dense<0.000000e+00> : vector<128x64xf32>
    %58 = tpu.matmul %40, %57, %cst_45 {dimension_numbers = #tpu.dot_dimension_numbers<[1], [0], [0], [1], [0, 0, 1, 1], [], []>} : vector<128x128xbf16>, vector<128x64xbf16>, vector<128x64xf32> -> vector<128x64xf32>
    %59 = arith.maximumf %55, %58 : vector<128x64xf32>
    %c0_46 = arith.constant 0 : index
    %c0_47 = arith.constant 0 : index
    %60 = vector.load %arg6[%c0_46, %c0_47] : memref<320x128xbf16, #tpu.memory_space<vmem>>, vector<320x128xbf16>
    %61 = arith.truncf %59 : vector<128x64xf32> to vector<128x64xbf16>
    %cst_48 = arith.constant dense<0.000000e+00> : vector<320x64xf32>
    %62 = tpu.matmul %60, %61, %cst_48 {dimension_numbers = #tpu.dot_dimension_numbers<[1], [0], [0], [1], [0, 0, 1, 1], [], []>} : vector<320x128xbf16>, vector<128x64xbf16>, vector<320x64xf32> -> vector<320x64xf32>
    %63 = vector.extract_strided_slice %62 {offsets = [0, 0], sizes = [64, 64], strides = [1, 1]} : vector<320x64xf32> to vector<64x64xf32>
    %64 = vector.extract_strided_slice %62 {offsets = [64, 0], sizes = [64, 64], strides = [1, 1]} : vector<320x64xf32> to vector<64x64xf32>
    %65 = arith.maximumf %63, %64 : vector<64x64xf32>
    %66 = vector.extract_strided_slice %62 {offsets = [128, 0], sizes = [64, 64], strides = [1, 1]} : vector<320x64xf32> to vector<64x64xf32>
    %67 = arith.maximumf %65, %66 : vector<64x64xf32>
    %68 = vector.extract_strided_slice %62 {offsets = [192, 0], sizes = [64, 64], strides = [1, 1]} : vector<320x64xf32> to vector<64x64xf32>
    %69 = arith.maximumf %67, %68 : vector<64x64xf32>
    %70 = vector.extract_strided_slice %62 {offsets = [256, 0], sizes = [64, 64], strides = [1, 1]} : vector<320x64xf32> to vector<64x64xf32>
    %71 = arith.maximumf %69, %70 : vector<64x64xf32>
    %72 = arith.truncf %71 : vector<64x64xf32> to vector<64x64xbf16>
    %c0_49 = arith.constant 0 : index
    %c0_50 = arith.constant 0 : index
    %73 = vector.load %arg7[%c0_49, %c0_50] : memref<96x64xbf16, #tpu.memory_space<vmem>>, vector<96x64xbf16>
    %cst_51 = arith.constant dense<0.000000e+00> : vector<96x64xf32>
    %74 = tpu.matmul %73, %72, %cst_51 {dimension_numbers = #tpu.dot_dimension_numbers<[1], [0], [0], [1], [0, 0, 1, 1], [], []>} : vector<96x64xbf16>, vector<64x64xbf16>, vector<96x64xf32> -> vector<96x64xf32>
    %75 = arith.truncf %74 : vector<96x64xf32> to vector<96x64xbf16>
    %76 = vector.extract_strided_slice %75 {offsets = [0, 0], sizes = [32, 64], strides = [1, 1]} : vector<96x64xbf16> to vector<32x64xbf16>
    %c0_52 = arith.constant 0 : index
    %c0_53 = arith.constant 0 : index
    %c0_54 = arith.constant 0 : index
    %77 = vector.load %arg8[%c0_52, %c0_53, %c0_54] : memref<3x64x128xbf16, #tpu.memory_space<vmem>>, vector<1x64x128xbf16>
    %78 = vector.shape_cast %77 : vector<1x64x128xbf16> to vector<64x128xbf16>
    %cst_55 = arith.constant dense<0.000000e+00> : vector<32x128xf32>
    %79 = tpu.matmul %76, %78, %cst_55 {dimension_numbers = #tpu.dot_dimension_numbers<[1], [0], [0], [1], [0, 0, 1, 1], [], []>} : vector<32x64xbf16>, vector<64x128xbf16>, vector<32x128xf32> -> vector<32x128xf32>
    %80 = vector.extract_strided_slice %75 {offsets = [32, 0], sizes = [32, 64], strides = [1, 1]} : vector<96x64xbf16> to vector<32x64xbf16>
    %c1_56 = arith.constant 1 : index
    %c0_57 = arith.constant 0 : index
    %c0_58 = arith.constant 0 : index
    %81 = vector.load %arg8[%c1_56, %c0_57, %c0_58] : memref<3x64x128xbf16, #tpu.memory_space<vmem>>, vector<1x64x128xbf16>
    %82 = vector.shape_cast %81 : vector<1x64x128xbf16> to vector<64x128xbf16>
    %cst_59 = arith.constant dense<0.000000e+00> : vector<32x128xf32>
    %83 = tpu.matmul %80, %82, %cst_59 {dimension_numbers = #tpu.dot_dimension_numbers<[1], [0], [0], [1], [0, 0, 1, 1], [], []>} : vector<32x64xbf16>, vector<64x128xbf16>, vector<32x128xf32> -> vector<32x128xf32>
    %84 = arith.addf %79, %83 : vector<32x128xf32>
    %85 = vector.extract_strided_slice %75 {offsets = [64, 0], sizes = [32, 64], strides = [1, 1]} : vector<96x64xbf16> to vector<32x64xbf16>
    %c2_60 = arith.constant 2 : index
    %c0_61 = arith.constant 0 : index
    %c0_62 = arith.constant 0 : index
    %86 = vector.load %arg8[%c2_60, %c0_61, %c0_62] : memref<3x64x128xbf16, #tpu.memory_space<vmem>>, vector<1x64x128xbf16>
    %87 = vector.shape_cast %86 : vector<1x64x128xbf16> to vector<64x128xbf16>
    %cst_63 = arith.constant dense<0.000000e+00> : vector<32x128xf32>
    %88 = tpu.matmul %85, %87, %cst_63 {dimension_numbers = #tpu.dot_dimension_numbers<[1], [0], [0], [1], [0, 0, 1, 1], [], []>} : vector<32x64xbf16>, vector<64x128xbf16>, vector<32x128xf32> -> vector<32x128xf32>
    %89 = arith.addf %84, %88 : vector<32x128xf32>
    %c0_64 = arith.constant 0 : index
    %c0_65 = arith.constant 0 : index
    %90 = vector.load %arg9[%c0_64, %c0_65] : memref<3x128xf32, #tpu.memory_space<vmem>>, vector<1x128xf32>
    %91 = vector.broadcast %90 : vector<1x128xf32> to vector<32x128xf32>
    %92 = arith.addf %89, %91 : vector<32x128xf32>
    %cst_66 = arith.constant 0.000000e+00 : f32
    %93 = vector.broadcast %cst_66 : f32 to vector<32x128xf32>
    %94 = arith.maximumf %92, %93 : vector<32x128xf32>
    %c1_67 = arith.constant 1 : index
    %c0_68 = arith.constant 0 : index
    %95 = vector.load %arg9[%c1_67, %c0_68] : memref<3x128xf32, #tpu.memory_space<vmem>>, vector<1x128xf32>
    %c2_69 = arith.constant 2 : index
    %c0_70 = arith.constant 0 : index
    %96 = vector.load %arg9[%c2_69, %c0_70] : memref<3x128xf32, #tpu.memory_space<vmem>>, vector<1x128xf32>
    %97 = vector.broadcast %95 : vector<1x128xf32> to vector<32x128xf32>
    %98 = arith.mulf %94, %97 : vector<32x128xf32>
    %99 = vector.broadcast %96 : vector<1x128xf32> to vector<32x128xf32>
    %100 = arith.addf %98, %99 : vector<32x128xf32>
    %101 = arith.truncf %100 : vector<32x128xf32> to vector<32x128xbf16>
    %c0_71 = arith.constant 0 : index
    %c0_72 = arith.constant 0 : index
    %102 = vector.load %arg10[%c0_71, %c0_72] : memref<96x32xbf16, #tpu.memory_space<vmem>>, vector<96x32xbf16>
    %cst_73 = arith.constant dense<0.000000e+00> : vector<96x128xf32>
    %103 = tpu.matmul %102, %101, %cst_73 {dimension_numbers = #tpu.dot_dimension_numbers<[1], [0], [0], [1], [0, 0, 1, 1], [], []>} : vector<96x32xbf16>, vector<32x128xbf16>, vector<96x128xf32> -> vector<96x128xf32>
    %104 = arith.truncf %103 : vector<96x128xf32> to vector<96x128xbf16>
    %105 = vector.extract_strided_slice %104 {offsets = [0, 0], sizes = [32, 128], strides = [1, 1]} : vector<96x128xbf16> to vector<32x128xbf16>
    %c0_74 = arith.constant 0 : index
    %c0_75 = arith.constant 0 : index
    %c0_76 = arith.constant 0 : index
    %106 = vector.load %arg11[%c0_74, %c0_75, %c0_76] : memref<3x128x256xbf16, #tpu.memory_space<vmem>>, vector<1x128x256xbf16>
    %107 = vector.shape_cast %106 : vector<1x128x256xbf16> to vector<128x256xbf16>
    %cst_77 = arith.constant dense<0.000000e+00> : vector<32x256xf32>
    %108 = tpu.matmul %105, %107, %cst_77 {dimension_numbers = #tpu.dot_dimension_numbers<[1], [0], [0], [1], [0, 0, 1, 1], [], []>} : vector<32x128xbf16>, vector<128x256xbf16>, vector<32x256xf32> -> vector<32x256xf32>
    %109 = vector.extract_strided_slice %104 {offsets = [32, 0], sizes = [32, 128], strides = [1, 1]} : vector<96x128xbf16> to vector<32x128xbf16>
    %c1_78 = arith.constant 1 : index
    %c0_79 = arith.constant 0 : index
    %c0_80 = arith.constant 0 : index
    %110 = vector.load %arg11[%c1_78, %c0_79, %c0_80] : memref<3x128x256xbf16, #tpu.memory_space<vmem>>, vector<1x128x256xbf16>
    %111 = vector.shape_cast %110 : vector<1x128x256xbf16> to vector<128x256xbf16>
    %cst_81 = arith.constant dense<0.000000e+00> : vector<32x256xf32>
    %112 = tpu.matmul %109, %111, %cst_81 {dimension_numbers = #tpu.dot_dimension_numbers<[1], [0], [0], [1], [0, 0, 1, 1], [], []>} : vector<32x128xbf16>, vector<128x256xbf16>, vector<32x256xf32> -> vector<32x256xf32>
    %113 = arith.addf %108, %112 : vector<32x256xf32>
    %114 = vector.extract_strided_slice %104 {offsets = [64, 0], sizes = [32, 128], strides = [1, 1]} : vector<96x128xbf16> to vector<32x128xbf16>
    %c2_82 = arith.constant 2 : index
    %c0_83 = arith.constant 0 : index
    %c0_84 = arith.constant 0 : index
    %115 = vector.load %arg11[%c2_82, %c0_83, %c0_84] : memref<3x128x256xbf16, #tpu.memory_space<vmem>>, vector<1x128x256xbf16>
    %116 = vector.shape_cast %115 : vector<1x128x256xbf16> to vector<128x256xbf16>
    %cst_85 = arith.constant dense<0.000000e+00> : vector<32x256xf32>
    %117 = tpu.matmul %114, %116, %cst_85 {dimension_numbers = #tpu.dot_dimension_numbers<[1], [0], [0], [1], [0, 0, 1, 1], [], []>} : vector<32x128xbf16>, vector<128x256xbf16>, vector<32x256xf32> -> vector<32x256xf32>
    %118 = arith.addf %113, %117 : vector<32x256xf32>
    %c0_86 = arith.constant 0 : index
    %c0_87 = arith.constant 0 : index
    %119 = vector.load %arg12[%c0_86, %c0_87] : memref<3x256xf32, #tpu.memory_space<vmem>>, vector<1x256xf32>
    %120 = vector.broadcast %119 : vector<1x256xf32> to vector<32x256xf32>
    %121 = arith.addf %118, %120 : vector<32x256xf32>
    %cst_88 = arith.constant 0.000000e+00 : f32
    %122 = vector.broadcast %cst_88 : f32 to vector<32x256xf32>
    %123 = arith.maximumf %121, %122 : vector<32x256xf32>
    %c1_89 = arith.constant 1 : index
    %c0_90 = arith.constant 0 : index
    %124 = vector.load %arg12[%c1_89, %c0_90] : memref<3x256xf32, #tpu.memory_space<vmem>>, vector<1x256xf32>
    %c2_91 = arith.constant 2 : index
    %c0_92 = arith.constant 0 : index
    %125 = vector.load %arg12[%c2_91, %c0_92] : memref<3x256xf32, #tpu.memory_space<vmem>>, vector<1x256xf32>
    %126 = vector.broadcast %124 : vector<1x256xf32> to vector<32x256xf32>
    %127 = arith.mulf %123, %126 : vector<32x256xf32>
    %128 = vector.broadcast %125 : vector<1x256xf32> to vector<32x256xf32>
    %129 = arith.addf %127, %128 : vector<32x256xf32>
    %130 = arith.truncf %129 : vector<32x256xf32> to vector<32x256xbf16>
    %c0_93 = arith.constant 0 : index
    %c0_94 = arith.constant 0 : index
    %131 = vector.load %arg13[%c0_93, %c0_94] : memref<48x32xbf16, #tpu.memory_space<vmem>>, vector<48x32xbf16>
    %cst_95 = arith.constant dense<0.000000e+00> : vector<48x256xf32>
    %132 = tpu.matmul %131, %130, %cst_95 {dimension_numbers = #tpu.dot_dimension_numbers<[1], [0], [0], [1], [0, 0, 1, 1], [], []>} : vector<48x32xbf16>, vector<32x256xbf16>, vector<48x256xf32> -> vector<48x256xf32>
    %133 = arith.truncf %132 : vector<48x256xf32> to vector<48x256xbf16>
    %134 = vector.extract_strided_slice %133 {offsets = [0, 0], sizes = [16, 256], strides = [1, 1]} : vector<48x256xbf16> to vector<16x256xbf16>
    %c0_96 = arith.constant 0 : index
    %c0_97 = arith.constant 0 : index
    %c0_98 = arith.constant 0 : index
    %135 = vector.load %arg14[%c0_96, %c0_97, %c0_98] : memref<3x256x256xbf16, #tpu.memory_space<vmem>>, vector<1x256x256xbf16>
    %136 = vector.shape_cast %135 : vector<1x256x256xbf16> to vector<256x256xbf16>
    %cst_99 = arith.constant dense<0.000000e+00> : vector<16x256xf32>
    %137 = tpu.matmul %134, %136, %cst_99 {dimension_numbers = #tpu.dot_dimension_numbers<[1], [0], [0], [1], [0, 0, 1, 1], [], []>} : vector<16x256xbf16>, vector<256x256xbf16>, vector<16x256xf32> -> vector<16x256xf32>
    %138 = vector.extract_strided_slice %133 {offsets = [16, 0], sizes = [16, 256], strides = [1, 1]} : vector<48x256xbf16> to vector<16x256xbf16>
    %c1_100 = arith.constant 1 : index
    %c0_101 = arith.constant 0 : index
    %c0_102 = arith.constant 0 : index
    %139 = vector.load %arg14[%c1_100, %c0_101, %c0_102] : memref<3x256x256xbf16, #tpu.memory_space<vmem>>, vector<1x256x256xbf16>
    %140 = vector.shape_cast %139 : vector<1x256x256xbf16> to vector<256x256xbf16>
    %cst_103 = arith.constant dense<0.000000e+00> : vector<16x256xf32>
    %141 = tpu.matmul %138, %140, %cst_103 {dimension_numbers = #tpu.dot_dimension_numbers<[1], [0], [0], [1], [0, 0, 1, 1], [], []>} : vector<16x256xbf16>, vector<256x256xbf16>, vector<16x256xf32> -> vector<16x256xf32>
    %142 = arith.addf %137, %141 : vector<16x256xf32>
    %143 = vector.extract_strided_slice %133 {offsets = [32, 0], sizes = [16, 256], strides = [1, 1]} : vector<48x256xbf16> to vector<16x256xbf16>
    %c2_104 = arith.constant 2 : index
    %c0_105 = arith.constant 0 : index
    %c0_106 = arith.constant 0 : index
    %144 = vector.load %arg14[%c2_104, %c0_105, %c0_106] : memref<3x256x256xbf16, #tpu.memory_space<vmem>>, vector<1x256x256xbf16>
    %145 = vector.shape_cast %144 : vector<1x256x256xbf16> to vector<256x256xbf16>
    %cst_107 = arith.constant dense<0.000000e+00> : vector<16x256xf32>
    %146 = tpu.matmul %143, %145, %cst_107 {dimension_numbers = #tpu.dot_dimension_numbers<[1], [0], [0], [1], [0, 0, 1, 1], [], []>} : vector<16x256xbf16>, vector<256x256xbf16>, vector<16x256xf32> -> vector<16x256xf32>
    %147 = arith.addf %142, %146 : vector<16x256xf32>
    %c0_108 = arith.constant 0 : index
    %c0_109 = arith.constant 0 : index
    %148 = vector.load %arg15[%c0_108, %c0_109] : memref<1x256xf32, #tpu.memory_space<vmem>>, vector<1x256xf32>
    %149 = vector.broadcast %148 : vector<1x256xf32> to vector<16x256xf32>
    %150 = arith.addf %147, %149 : vector<16x256xf32>
    %cst_110 = arith.constant 0.000000e+00 : f32
    %151 = vector.broadcast %cst_110 : f32 to vector<16x256xf32>
    %152 = arith.maximumf %150, %151 : vector<16x256xf32>
    %153 = arith.truncf %152 : vector<16x256xf32> to vector<16x256xbf16>
    %c0_111 = arith.constant 0 : index
    %c0_112 = arith.constant 0 : index
    %154 = vector.load %arg16[%c0_111, %c0_112] : memref<8x16xbf16, #tpu.memory_space<vmem>>, vector<8x16xbf16>
    %cst_113 = arith.constant dense<0.000000e+00> : vector<8x256xf32>
    %155 = tpu.matmul %154, %153, %cst_113 {dimension_numbers = #tpu.dot_dimension_numbers<[1], [0], [0], [1], [0, 0, 1, 1], [], []>} : vector<8x16xbf16>, vector<16x256xbf16>, vector<8x256xf32> -> vector<8x256xf32>
    %156 = arith.truncf %155 : vector<8x256xf32> to vector<8x256xbf16>
    %c0_114 = arith.constant 0 : index
    %c0_115 = arith.constant 0 : index
    %157 = vector.load %arg17[%c0_114, %c0_115] : memref<256x128xbf16, #tpu.memory_space<vmem>>, vector<256x128xbf16>
    %cst_116 = arith.constant dense<0.000000e+00> : vector<8x128xf32>
    %158 = tpu.matmul %156, %157, %cst_116 {dimension_numbers = #tpu.dot_dimension_numbers<[1], [0], [0], [1], [0, 0, 1, 1], [], []>} : vector<8x256xbf16>, vector<256x128xbf16>, vector<8x128xf32> -> vector<8x128xf32>
    %c0_117 = arith.constant 0 : index
    %c0_118 = arith.constant 0 : index
    %159 = vector.load %arg18[%c0_117, %c0_118] : memref<1x128xf32, #tpu.memory_space<vmem>>, vector<1x128xf32>
    %160 = vector.broadcast %159 : vector<1x128xf32> to vector<8x128xf32>
    %161 = arith.addf %158, %160 : vector<8x128xf32>
    %c0_119 = arith.constant 0 : index
    %c0_120 = arith.constant 0 : index
    %162 = vector.load %arg19[%c0_119, %c0_120] : memref<8x128xf32, #tpu.memory_space<vmem>>, vector<8x128xf32>
    tpu.vector_store %arg19[%c0_119, %c0_120], %161 {strides = array<i32>} : memref<8x128xf32, #tpu.memory_space<vmem>>, vector<8x128xf32>,
    return
  }
  func.func @transform_0(%arg0: i32) -> (i32, i32) {
    %c0_i32 = arith.constant 0 : i32
    %c0_i32_0 = arith.constant 0 : i32
    return %arg0, %c0_i32 : i32, i32
  }
  func.func @transform_1(%arg0: i32) -> (i32, i32) {
    %c0_i32 = arith.constant 0 : i32
    %c0_i32_0 = arith.constant 0 : i32
    %c0_i32_1 = arith.constant 0 : i32
    return %c0_i32, %c0_i32_0 : i32, i32
  }
  func.func @transform_2(%arg0: i32) -> (i32, i32, i32) {
    %c0_i32 = arith.constant 0 : i32
    %c0_i32_0 = arith.constant 0 : i32
    %c0_i32_1 = arith.constant 0 : i32
    %c0_i32_2 = arith.constant 0 : i32
    return %c0_i32, %c0_i32_0, %c0_i32_1 : i32, i32, i32
  }
  func.func @transform_3(%arg0: i32) -> (i32, i32) {
    %c0_i32 = arith.constant 0 : i32
    %c0_i32_0 = arith.constant 0 : i32
    %c0_i32_1 = arith.constant 0 : i32
    return %c0_i32, %c0_i32_0 : i32, i32
  }
  func.func @transform_4(%arg0: i32) -> (i32, i32, i32) {
    %c0_i32 = arith.constant 0 : i32
    %c0_i32_0 = arith.constant 0 : i32
    %c0_i32_1 = arith.constant 0 : i32
    %c0_i32_2 = arith.constant 0 : i32
    return %c0_i32, %c0_i32_0, %c0_i32_1 : i32, i32, i32
  }
  func.func @transform_5(%arg0: i32) -> (i32, i32) {
    %c0_i32 = arith.constant 0 : i32
    %c0_i32_0 = arith.constant 0 : i32
    %c0_i32_1 = arith.constant 0 : i32
    return %c0_i32, %c0_i32_0 : i32, i32
  }
  func.func @transform_6(%arg0: i32) -> (i32, i32) {
    %c0_i32 = arith.constant 0 : i32
    %c0_i32_0 = arith.constant 0 : i32
    %c0_i32_1 = arith.constant 0 : i32
    return %c0_i32, %c0_i32_0 : i32, i32
  }
  func.func @transform_7(%arg0: i32) -> (i32, i32, i32) {
    %c0_i32 = arith.constant 0 : i32
    %c0_i32_0 = arith.constant 0 : i32
    %c0_i32_1 = arith.constant 0 : i32
    %c0_i32_2 = arith.constant 0 : i32
    return %c0_i32, %c0_i32_0, %c0_i32_1 : i32, i32, i32
  }
  func.func @transform_8(%arg0: i32) -> (i32, i32) {
    %c0_i32 = arith.constant 0 : i32
    %c0_i32_0 = arith.constant 0 : i32
    %c0_i32_1 = arith.constant 0 : i32
    return %c0_i32, %c0_i32_0 : i32, i32
  }
  func.func @transform_9(%arg0: i32) -> (i32, i32) {
    %c0_i32 = arith.constant 0 : i32
    %c0_i32_0 = arith.constant 0 : i32
    %c0_i32_1 = arith.constant 0 : i32
    return %c0_i32, %c0_i32_0 : i32, i32
  }
  func.func @transform_10(%arg0: i32) -> (i32, i32, i32) {
    %c0_i32 = arith.constant 0 : i32
    %c0_i32_0 = arith.constant 0 : i32
    %c0_i32_1 = arith.constant 0 : i32
    %c0_i32_2 = arith.constant 0 : i32
    return %c0_i32, %c0_i32_0, %c0_i32_1 : i32, i32, i32
  }
  func.func @transform_11(%arg0: i32) -> (i32, i32) {
    %c0_i32 = arith.constant 0 : i32
    %c0_i32_0 = arith.constant 0 : i32
    %c0_i32_1 = arith.constant 0 : i32
    return %c0_i32, %c0_i32_0 : i32, i32
  }
  func.func @transform_12(%arg0: i32) -> (i32, i32) {
    %c0_i32 = arith.constant 0 : i32
    %c0_i32_0 = arith.constant 0 : i32
    %c0_i32_1 = arith.constant 0 : i32
    return %c0_i32, %c0_i32_0 : i32, i32
  }
  func.func @transform_13(%arg0: i32) -> (i32, i32, i32) {
    %c0_i32 = arith.constant 0 : i32
    %c0_i32_0 = arith.constant 0 : i32
    %c0_i32_1 = arith.constant 0 : i32
    %c0_i32_2 = arith.constant 0 : i32
    return %c0_i32, %c0_i32_0, %c0_i32_1 : i32, i32, i32
  }
  func.func @transform_14(%arg0: i32) -> (i32, i32) {
    %c0_i32 = arith.constant 0 : i32
    %c0_i32_0 = arith.constant 0 : i32
    %c0_i32_1 = arith.constant 0 : i32
    return %c0_i32, %c0_i32_0 : i32, i32
  }
  func.func @transform_15(%arg0: i32) -> (i32, i32) {
    %c0_i32 = arith.constant 0 : i32
    %c0_i32_0 = arith.constant 0 : i32
    %c0_i32_1 = arith.constant 0 : i32
    return %c0_i32, %c0_i32_0 : i32, i32
  }
  func.func @transform_16(%arg0: i32) -> (i32, i32) {
    %c0_i32 = arith.constant 0 : i32
    %c0_i32_0 = arith.constant 0 : i32
    %c0_i32_1 = arith.constant 0 : i32
    return %c0_i32, %c0_i32_0 : i32, i32
  }
  func.func @transform_17(%arg0: i32) -> (i32, i32) {
    %c0_i32 = arith.constant 0 : i32
    %c0_i32_0 = arith.constant 0 : i32
    %c0_i32_1 = arith.constant 0 : i32
    return %c0_i32, %c0_i32_0 : i32, i32
  }
  func.func @transform_18(%arg0: i32) -> (i32, i32) {
    %c0_i32 = arith.constant 0 : i32
    %c0_i32_0 = arith.constant 0 : i32
    return %arg0, %c0_i32 : i32, i32
  }
}

</mosaic_0001>

<bundles_post_ra>
// kernel: audio_classifier_forward.1
= control target key start
LH: loop header
LB: loop body
LE: loop exit
PB: predicated region body
PF: predicated region fallthrough
CT: control target
= control target key end

     0   :  { %s9555_s0 = inlined_call_operand.vmem [shape: f32[512,64], index: 0, kind: input, shape index: {}]   ;;  %s9556_s1 = inlined_call_operand.vmem [shape: bf16[640,256], index: 1, kind: input, shape index: {}]   ;;  %s9557_s2 = inlined_call_operand.vmem [shape: bf16[5,64,128], index: 2, kind: input, shape index: {}]   ;;  %s9558_s3 = inlined_call_operand.vmem [shape: f32[3,128], index: 3, kind: input, shape index: {}]   ;;  %s9559_s4 = inlined_call_operand.vmem [shape: bf16[5,128,64], index: 4, kind: input, shape index: {}]   ;;  %s9560_s5 = inlined_call_operand.vmem [shape: bf16[320,128], index: 5, kind: input, shape index: {}]   ;;  %s9561_s6 = inlined_call_operand.vmem [shape: bf16[96,64], index: 6, kind: input, shape index: {}]   ;;  %s9562_s7 = inlined_call_operand.vmem [shape: bf16[3,64,128], index: 7, kind: input, shape index: {}]   ;;  %s9563_s8 = inlined_call_operand.vmem [shape: f32[3,128], index: 8, kind: input, shape index: {}]   ;;  %s9564_s9 = inlined_call_operand.vmem [shape: bf16[96,32], index: 9, kind: input, shape index: {}]   ;;  %s9565_s10 = inlined_call_operand.vmem [shape: bf16[3,128,256], index: 10, kind: input, shape index: {}]   ;;  %s9566_s11 = inlined_call_operand.vmem [shape: f32[3,256], index: 11, kind: input, shape index: {}]   ;;  %s9567_s12 = inlined_call_operand.vmem [shape: bf16[48,32], index: 12, kind: input, shape index: {}]   ;;  %s9568_s13 = inlined_call_operand.vmem [shape: bf16[3,256,256], index: 13, kind: input, shape index: {}]   ;;  %s9569_s14 = inlined_call_operand.vmem [shape: f32[1,256], index: 14, kind: input, shape index: {}]   ;;  %s9570_s15 = inlined_call_operand.vmem [shape: bf16[8,16], index: 15, kind: input, shape index: {}]   ;;  %s9571_s16 = inlined_call_operand.vmem [shape: bf16[256,128], index: 16, kind: input, shape index: {}]   ;;  %s9572_s17 = inlined_call_operand.vmem [shape: f32[1,128], index: 17, kind: input, shape index: {}]   ;;  %s9573_s18 = inlined_call_operand.hbm [shape: f32[16,128], index: 18, kind: output, shape index: {}]  }
   0x1   :  { %9583 = sst [smem:[#allocation11_spill]] %s9555_s0 }
   0x2   :  { %9584 = sst [smem:[#allocation12_spill]] %s9556_s1 }
   0x3   :  { %9585 = sst [smem:[#allocation13_spill]] %s9557_s2 }
   0x4   :  { %9586 = sst [smem:[#allocation14_spill]] %s9558_s3 }
   0x5   :  { %9587 = sst [smem:[#allocation15_spill]] %s9559_s4 }
   0x6   :  { %9588 = sst [smem:[#allocation16_spill]] %s9573_s18 }
   0x7   :  { %23 = vsyncpa [#allocation3], 0 }
   0x8   :  { %25 = vsyncpa [#allocation3 + $0x1], 0  ;;  %s7955_s27 = smov 0   ;;  %s7957_s28 = smov 0  }
   0x9   :  { %s7959_s29 = smov 0   ;;  %s7961_s30 = smov 0  }
   0xa LB: > { %9589 = sst [smem:[#allocation5_spill]] %s7844_s27  ;;  %s7976_s0 = sadd.s32 4294967295, %s7856_s30   ;;  %s7856_s30 = sphi %s7961_s30, %s9608_s30   ;;  %s7852_s29 = sphi %s7959_s29, %s9610_s29   ;;  %s7848_s28 = sphi %s7957_s28, %s9612_s28   ;;  %s7844_s27 = sphi %s7955_s27, %s9611_s27  }
   0xb   : > { %9590 = sst [smem:[#allocation6_spill]] %s7852_s29  ;;  %s5928_s19 = sadd.s32 4294967294, %s7856_s30  }
   0xc   : > { %9591 = sst [smem:[#allocation7_spill]] %s7856_s30  ;;  %s7980_s1 = sadd.s32 1, %s7856_s30  }
   0xd   : > { %9592 = sst [smem:[#allocation8_spill]] %s7980_s1  ;;  %s421_s20 = sadd.s32 1, %s7852_s29 }
   0xe   : > { %s418_s21 = ssub.s32 %s7856_s30, %s7980_s1  ;;  %p431_p0 = scmp.ne.s32.totalorder %s7852_s29, %s7848_s28 }
   0xf   : > { %p419_p1 = scmp.eq.s32.totalorder %s418_s21, 0  ;;  %p432_p2 = scmp.eq.s32.totalorder %s7976_s0, 1 }
  0x10   : > { %p437_p3 = scmp.ne.s32.totalorder %s7848_s28, %s7844_s27  ;;  %p438_p4 = scmp.eq.s32.totalorder %s5928_s19, 1 }
  0x11   : > { %s7991_s22 = scalar_select %p419_p1, %s7852_s29, %s421_s20  }
  0x12   : > { %p7993_p5 = por %p432_p2, %p431_p0  ;;  %p7997_p6 = por %p438_p4, %p437_p3 }
  0x13   : > { %9593 = sst [smem:[#allocation9_spill]] %s7991_s22  ;;  %p5931_p7 = scmp.ge.s32.totalorder %s7856_s30, 1 }
  0x14   : > { %s9595_s23 = scalar_select %p7997_p6, 1, 0 }
  0x15   : > { %p516_p8 = scmp.lt.s32.totalorder %s7856_s30, 3 }
  0x16   : > { %9596 = sst [smem:[#allocation10_spill]] %s9595_s23 }
  0x17   : > { %p517_p9 = pnand %p5931_p7, %p516_p8 }
  0x18   : > { %s5933_s24 = sshll.u32 (!%p517_p9), %s7976_s0, 5  ;;  %v7858_v0 = vmov (!%p517_p9), 0   ;;  %s9597_s19 = sld [smem:[#allocation12_spill]] (!%p517_p9)  ;;  %vm1539_vm0 = vcmask (!%p517_p9), 523264   ;;  %vm4162_vm1 = vcmask (!%p517_p9), 261120   ;;  %vm5632_vm2 = vcmask (!%p517_p9), 130048  }
  0x19   : > { %520 = sbr.rel (%p517_p9) target bundleno = 3530 (0xdca), region = 92  ;;  %1105 = vmatprep.subr.bf16.mxu0 (!%p517_p9), %v7858_v0  ;;  %p571_p10 = scmp.lt.s32.totalorder (!%p517_p9), %s5933_s24, 63 }
  0x1a   : > { %s9598_s29 = sld [smem:[#allocation11_spill]] (!%p517_p9)  ;;  %s9599_s30 = sld [smem:[#allocation13_spill]] (!%p517_p9) }
  0x1b   : > { %s9601_s4 = sld [smem:[#allocation15_spill]] (!%p517_p9)  ;;  %s9602_s3 = sld [smem:[#allocation14_spill]] (!%p517_p9) }
  0x1c   : > { %s6562_s22 = sshll.u32 (!%p517_p9), %s7976_s0, 7  ;;  %s7859_s0 = smov (!%p517_p9), [#allocation2]  }
  0x1e   : > { %v7337_v1 = vld [vmem:[%s9597_s19 + $0x4] ss:$8 sps:$4 sm:$0xff] (!%p517_p9)   ;;  %v7335_v50 = vld [vmem:[%s9597_s19] ss:$8 sps:$4 sm:$0xff] (!%p517_p9)   ;;  %v7338_v51 = vld [vmem:[%s9597_s19 + $0x14] ss:$8 sps:$4 sm:$0xff] (!%p517_p9)  }
  0x1f   : > { %1137 = vmatprep.mubr.bf16.mxu0 (!%p517_p9), %v7337_v1  ;;  %v7340_v52 = vld [vmem:[%s9597_s19 + $0x10] ss:$8 sps:$4 sm:$0xff] (!%p517_p9)   ;;  %v7341_v53 = vld [vmem:[%s9597_s19 + $0x24] ss:$8 sps:$4 sm:$0xff] (!%p517_p9)   ;;  %v7343_v54 = vld [vmem:[%s9597_s19 + $0x20] ss:$8 sps:$4 sm:$0xff] (!%p517_p9)  }
  0x20   : > { %s9614_s24 = smov (!%p571_p10, %s5933_s24), 63  ;;  %v7344_v55 = vld [vmem:[%s9597_s19 + $0x34] ss:$8 sps:$4 sm:$0xff]   ;;  %v7346_v56 = vld [vmem:[%s9597_s19 + $0x30] ss:$8 sps:$4 sm:$0xff]   ;;  %s9600_s18 = smov %s9599_s30 }
  0x21   : > { %s5934_s20 = sshll.u32 %s9614_s24, 3  ;;  %v7347_v57 = vld [vmem:[%s9597_s19 + $0x44] ss:$8 sps:$4 sm:$0xff]   ;;  %v7349_v58 = vld [vmem:[%s9597_s19 + $0x40] ss:$8 sps:$4 sm:$0xff]  }
  0x22   : > { %s8011_s1 = scalar_lea.vmem %s9598_s29, %s5934_s20  ;;  %v7350_v59 = vld [vmem:[%s9597_s19 + $0x54] ss:$8 sps:$4 sm:$0xff]   ;;  %v7352_v60 = vld [vmem:[%s9597_s19 + $0x50] ss:$8 sps:$4 sm:$0xff]   ;;  %v7353_v61 = vld [vmem:[%s9597_s19 + $0x64] ss:$8 sps:$4 sm:$0xff]  }
  0x23   : > { %v577_v2 = vld [vmem:[%s8011_s1] sm:$0xff]  ;;  %v578_v3 = vld [vmem:[%s8011_s1 + $0x8] sm:$0xff]  ;;  %v579_v4 = vld [vmem:[%s8011_s1 + $0x10] sm:$0xff]  ;;  %s567_s20 = sand.u32 1, %s7848_s28  }
  0x24   : > { %v609_v5 = vpack.c.bf16 %v578_v3, %v577_v2  ;;  %v580_v6 = vld [vmem:[%s8011_s1 + $0x18] sm:$0xff]  ;;  %v581_v8 = vld [vmem:[%s8011_s1 + $0x20] sm:$0xff]  ;;  %v582_v9 = vld [vmem:[%s8011_s1 + $0x28] sm:$0xff]  ;;  %s5932_s21 = sshll.u32 %s567_s20, 3  ;;  %s5856_s23 = scalar_lea.sflag [#allocation3], %s567_s20 }
  0x25   : > { %v610_v7 = vpack.c.bf16 %v580_v6, %v579_v4  ;;  %v611_v10 = vpack.c.bf16 %v582_v9, %v581_v8  ;;  %v583_v11 = vld [vmem:[%s8011_s1 + $0x30] sm:$0xff]  ;;  %v584_v12 = vld [vmem:[%s8011_s1 + $0x38] sm:$0xff]  ;;  %v585_v14 = vld [vmem:[%s8011_s1 + $0x40] sm:$0xff]  ;;  %s569_s24 = scalar_lea.vmem [#allocation2], %s5932_s21  ;;  %s7798_s21 = sshll.u32 %s7859_s0, 4  ;;  %s7799_s21 = int_to_ptr.vmem [resolvable:$false] %s7798_s21 }
  0x26   : > { %1106 = vmatpush1.bf16.msra.mxu0 %v609_v5  ;;  %v612_v13 = vpack.c.bf16 %v584_v12, %v583_v11  ;;  %v586_v15 = vld [vmem:[%s8011_s1 + $0x48] sm:$0xff]  ;;  %v587_v17 = vld [vmem:[%s8011_s1 + $0x50] sm:$0xff]  ;;  %v588_v18 = vld [vmem:[%s8011_s1 + $0x58] sm:$0xff]  ;;  %s5869_s27 = sshll.u32 %s569_s24, 4  ;;  %s9515_s27 = int_to_ptr.vmem [resolvable:$true] %s5869_s27 }
  0x27   : > { %1107 = vmatprep.subr.bf16.mxu0 %v7858_v0  ;;  %v613_v16 = vpack.c.bf16 %v586_v15, %v585_v14  ;;  %v614_v19 = vpack.c.bf16 %v588_v18, %v587_v17  ;;  %v589_v20 = vld [vmem:[%s8011_s1 + $0x60] sm:$0xff]  ;;  %v590_v21 = vld [vmem:[%s8011_s1 + $0x68] sm:$0xff]  ;;  %v591_v22 = vld [vmem:[%s8011_s1 + $0x70] sm:$0xff]  ;;  %s7794_s29 = scalar_lea.vmem %s9515_s27, 128  ;;  %p7801_p0 = scmp.lt.s32.totalorder %s9515_s27, %s7799_s21 }
  0x28   : > { %v592_v23 = vld [vmem:[%s8011_s1 + $0x78] sm:$0xff]  ;;  %v615_v24 = vpack.c.bf16 %v590_v21, %v589_v20  ;;  %v593_v25 = vld [vmem:[%s8011_s1 + $0x80] sm:$0xff]  ;;  %v594_v27 = vld [vmem:[%s8011_s1 + $0x88] sm:$0xff]  ;;  %p7795_p11 = scmp.ne.s32.totalorder %s9515_s27, %s7794_s29 }
  0x29   : > { %v616_v26 = vpack.c.bf16 %v592_v23, %v591_v22  ;;  %v595_v28 = vld [vmem:[%s8011_s1 + $0x90] sm:$0xff]  ;;  %v596_v29 = vld [vmem:[%s8011_s1 + $0x98] sm:$0xff]  ;;  %v617_v30 = vpack.c.bf16 %v594_v27, %v593_v25  ;;  %v597_v31 = vld [vmem:[%s8011_s1 + $0xa0] sm:$0xff] }
  0x2a   : > { %1108 = vmatpush1.bf16.msra.mxu0 %v610_v7  ;;  %v618_v32 = vpack.c.bf16 %v596_v29, %v595_v28  ;;  %v598_v33 = vld [vmem:[%s8011_s1 + $0xa8] sm:$0xff]  ;;  %v599_v34 = vld [vmem:[%s8011_s1 + $0xb0] sm:$0xff]  ;;  %v600_v35 = vld [vmem:[%s8011_s1 + $0xb8] sm:$0xff]  ;;  %p7796_p12 = pnand %p7795_p11, %p7993_p5 }
  0x2b   : > { %1109 = vmatprep.subr.bf16.mxu0 %v7858_v0  ;;  %v619_v36 = vpack.c.bf16 %v598_v33, %v597_v31  ;;  %v601_v37 = vld [vmem:[%s8011_s1 + $0xc0] sm:$0xff]  ;;  %v620_v38 = vpack.c.bf16 %v600_v35, %v599_v34  ;;  %v602_v39 = vld [vmem:[%s8011_s1 + $0xc8] sm:$0xff]  ;;  %v603_v40 = vld [vmem:[%s8011_s1 + $0xd0] sm:$0xff] }
  0x2c   : > { %v604_v41 = vld [vmem:[%s8011_s1 + $0xd8] sm:$0xff]  ;;  %v621_v42 = vpack.c.bf16 %v602_v39, %v601_v37  ;;  %v605_v43 = vld [vmem:[%s8011_s1 + $0xe0] sm:$0xff]  ;;  %v606_v45 = vld [vmem:[%s8011_s1 + $0xe8] sm:$0xff]  ;;  %p7797_p13 = pneg %p7796_p12 }
  0x2d   : > { %v622_v44 = vpack.c.bf16 %v604_v41, %v603_v40  ;;  %v607_v46 = vld [vmem:[%s8011_s1 + $0xf0] sm:$0xff]  ;;  %v608_v47 = vld [vmem:[%s8011_s1 + $0xf8] sm:$0xff]  ;;  %v623_v48 = vpack.c.bf16 %v606_v45, %v605_v43  ;;  %v7355_v62 = vld [vmem:[%s9597_s19 + $0x60] ss:$8 sps:$4 sm:$0xff]  }
  0x2e   : > { %1110 = vmatpush1.bf16.msra.mxu0 %v611_v10  ;;  %v624_v49 = vpack.c.bf16 %v608_v47, %v607_v46  ;;  %v7356_v63 = vld [vmem:[%s9597_s19 + $0x74] ss:$8 sps:$4 sm:$0xff]   ;;  %v7358_v1 = vld [vmem:[%s9597_s19 + $0x70] ss:$8 sps:$4 sm:$0xff]   ;;  %v7359_v2 = vld [vmem:[%s9597_s19 + $0x84] ss:$8 sps:$4 sm:$0xff]  }
  0x2f   : > { %1111 = vmatprep.subr.bf16.mxu0 %v7858_v0  ;;  %v7361_v3 = vld [vmem:[%s9597_s19 + $0x80] ss:$8 sps:$4 sm:$0xff]   ;;  %v7362_v4 = vld [vmem:[%s9597_s19 + $0x94] ss:$8 sps:$4 sm:$0xff]   ;;  %v7364_v5 = vld [vmem:[%s9597_s19 + $0x90] ss:$8 sps:$4 sm:$0xff]  }
  0x30   : > { %v7365_v6 = vld [vmem:[%s9597_s19 + $0xa4] ss:$8 sps:$4 sm:$0xff]   ;;  %v7367_v7 = vld [vmem:[%s9597_s19 + $0xa0] ss:$8 sps:$4 sm:$0xff]   ;;  %v7368_v8 = vld [vmem:[%s9597_s19 + $0xb4] ss:$8 sps:$4 sm:$0xff]  }
  0x31   : > { %v7370_v9 = vld [vmem:[%s9597_s19 + $0xb0] ss:$8 sps:$4 sm:$0xff]   ;;  %v7371_v10 = vld [vmem:[%s9597_s19 + $0xc4] ss:$8 sps:$4 sm:$0xff]   ;;  %v7373_v11 = vld [vmem:[%s9597_s19 + $0xc0] ss:$8 sps:$4 sm:$0xff]  }
  0x32   : > { %1112 = vmatpush1.bf16.msra.mxu0 %v612_v13  ;;  %v7374_v12 = vld [vmem:[%s9597_s19 + $0xd4] ss:$8 sps:$4 sm:$0xff]   ;;  %v7376_v13 = vld [vmem:[%s9597_s19 + $0xd0] ss:$8 sps:$4 sm:$0xff]   ;;  %v7377_v14 = vld [vmem:[%s9597_s19 + $0xe4] ss:$8 sps:$4 sm:$0xff]  }
  0x33   : > { %1113 = vmatprep.subr.bf16.mxu0 %v7858_v0  ;;  %v7379_v15 = vld [vmem:[%s9597_s19 + $0xe0] ss:$8 sps:$4 sm:$0xff]   ;;  %v7382_v17 = vld [vmem:[%s9597_s19 + $0xf0] ss:$8 sps:$4 sm:$0xff]   ;;  %v7383_v18 = vld [vmem:[%s9597_s19 + $0x104] ss:$8 sps:$4 sm:$0xff]  }
  0x34   : > { %v7386_v20 = vld [vmem:[%s9597_s19 + $0x114] ss:$8 sps:$4 sm:$0xff]   ;;  %v7388_v21 = vld [vmem:[%s9597_s19 + $0x110] ss:$8 sps:$4 sm:$0xff]   ;;  %v7389_v22 = vld [vmem:[%s9597_s19 + $0x124] ss:$8 sps:$4 sm:$0xff]  }
  0x35   : > { %v7391_v23 = vld [vmem:[%s9597_s19 + $0x120] ss:$8 sps:$4 sm:$0xff]   ;;  %v7394_v27 = vld [vmem:[%s9597_s19 + $0x130] ss:$8 sps:$4 sm:$0xff]   ;;  %v7395_v28 = vld [vmem:[%s9597_s19 + $0x144] ss:$8 sps:$4 sm:$0xff]  }
  0x36   : > { %1114 = vmatpush1.bf16.msra.mxu0 %v613_v16  ;;  %v7380_v16 = vld [vmem:[%s9597_s19 + $0xf4] ss:$8 sps:$4 sm:$0xff]   ;;  %v7440_v25 = vld [vmem:[%s9599_s30 + $0x20] sm:$0xff]   ;;  %v7400_v33 = vld [vmem:[%s9597_s19 + $0x150] ss:$8 sps:$4 sm:$0xff]   ;;  %s9603_s30 = sld [smem:[#allocation16_spill]] }
  0x37   : > { %1115 = vmatprep.subr.bf16.mxu0 %v7858_v0  ;;  %6791 = vmatprep.subr.bf16.mxu1 %v7440_v25  ;;  %v7445_v29 = vld [vmem:[%s9600_s18 + $0x30] sm:$0xff]   ;;  %v7397_v31 = vld [vmem:[%s9597_s19 + $0x140] ss:$8 sps:$4 sm:$0xff]   ;;  %v7401_v34 = vld [vmem:[%s9597_s19 + $0x164] ss:$8 sps:$4 sm:$0xff]  }
  0x38   : > { %6792 = vmatpush3.bf16.msra.mxu1 %v7440_v25  ;;  %v7403_v35 = vld [vmem:[%s9597_s19 + $0x160] ss:$8 sps:$4 sm:$0xff]   ;;  %v7406_v37 = vld [vmem:[%s9597_s19 + $0x170] ss:$8 sps:$4 sm:$0xff]   ;;  %v7410_v40 = vld [vmem:[%s9597_s19 + $0x194] ss:$8 sps:$4 sm:$0xff]  }
  0x39   : > { %v7409_v39 = vld [vmem:[%s9597_s19 + $0x180] ss:$8 sps:$4 sm:$0xff]   ;;  %v7412_v41 = vld [vmem:[%s9597_s19 + $0x190] ss:$8 sps:$4 sm:$0xff]   ;;  %v7416_v45 = vld [vmem:[%s9597_s19 + $0x1b4] ss:$8 sps:$4 sm:$0xff]  }
  0x3a   : > { %1116 = vmatpush1.bf16.msra.mxu0 %v614_v19  ;;  %v7385_v19 = vld [vmem:[%s9597_s19 + $0x100] ss:$8 sps:$4 sm:$0xff]  }
  0x3b   : > { %1117 = vmatprep.subr.bf16.mxu0 %v7858_v0  ;;  %v8231_v43 = vld [vmem:[%s9600_s18] sm:$0xff]  }
  0x3c   : > { %s9604_s26 = smov %s9603_s30 }
  0x3e   : > { %1118 = vmatpush1.bf16.msra.mxu0 %v615_v24  ;;  %v7392_v24 = vld [vmem:[%s9597_s19 + $0x134] ss:$8 sps:$4 sm:$0xff]  }
  0x3f   : > { %1119 = vmatprep.subr.bf16.mxu0 %v7858_v0 }
  0x42   : > { %1120 = vmatpush1.bf16.msra.mxu0 %v616_v26  ;;  %v7441_v26 = vld [vmem:[%s9600_s18 + $0x28] sm:$0xff]  }
  0x43   : > { %1121 = vmatprep.subr.bf16.mxu0 %v7858_v0  ;;  %6793 = vmatprep.subr.bf16.mxu1 %v7441_v26 }
  0x44   : > { %6794 = vmatpush3.bf16.msra.mxu1 %v7441_v26 }
  0x45   : > { %6795 = vmatprep.subr.bf16.mxu1 %v7445_v29 }
  0x46   : > { %1122 = vmatpush1.bf16.msra.mxu0 %v617_v30  ;;  %v7446_v30 = vld [vmem:[%s9600_s18 + $0x38] sm:$0xff]  }
  0x47   : > { %1123 = vmatprep.subr.bf16.mxu0 %v7858_v0 }
  0x48   : > { %6796 = vmatpush3.bf16.msra.mxu1 %v7445_v29  ;;  %v7437_v29 = vld [vmem:[%s9597_s19 + $0x224] ss:$8 sps:$4 sm:$0xff]  }
  0x49   : > { %6797 = vmatprep.subr.bf16.mxu1 %v7446_v30 }
  0x4a   : > { %1124 = vmatpush1.bf16.msra.mxu0 %v618_v32  ;;  %v7398_v32 = vld [vmem:[%s9597_s19 + $0x154] ss:$8 sps:$4 sm:$0xff]  }
  0x4b   : > { %1125 = vmatprep.subr.bf16.mxu0 %v7858_v0 }
  0x4c   : > { %6798 = vmatpush3.bf16.msra.mxu1 %v7446_v30 }
  0x4d   : > { %6815 = vmatprep.subr.bf16.mxu1 %v8231_v43 }
  0x4e   : > { %1126 = vmatpush1.bf16.msra.mxu0 %v619_v36  ;;  %v7404_v36 = vld [vmem:[%s9597_s19 + $0x174] ss:$8 sps:$4 sm:$0xff]  }
  0x4f   : > { %1127 = vmatprep.subr.bf16.mxu0 %v7858_v0 }
  0x52   : > { %1128 = vmatpush1.bf16.msra.mxu0 %v620_v38  ;;  %v7407_v38 = vld [vmem:[%s9597_s19 + $0x184] ss:$8 sps:$4 sm:$0xff]  }
  0x53   : > { %1129 = vmatprep.subr.bf16.mxu0 %v7858_v0 }
  0x56   : > { %1130 = vmatpush1.bf16.msra.mxu0 %v621_v42  ;;  %v7413_v42 = vld [vmem:[%s9597_s19 + $0x1a4] ss:$8 sps:$4 sm:$0xff]  }
  0x57   : > { %1131 = vmatprep.subr.bf16.mxu0 %v7858_v0 }
  0x5a   : > { %1132 = vmatpush1.bf16.msra.mxu0 %v622_v44  ;;  %v7415_v44 = vld [vmem:[%s9597_s19 + $0x1a0] ss:$8 sps:$4 sm:$0xff]  }
  0x5b   : > { %1133 = vmatprep.subr.bf16.mxu0 %v7858_v0 }
  0x5e   : > { %1134 = vmatpush1.bf16.msra.mxu0 %v623_v48  ;;  %v7418_v48 = vld [vmem:[%s9597_s19 + $0x1b0] ss:$8 sps:$4 sm:$0xff]  }
  0x5f   : > { %1135 = vmatprep.subr.bf16.mxu0 %v7858_v0 }
  0x62   : > { %1136 = vmatpush1.bf16.msra.mxu0 %v624_v49 }
  0x65   : > { %1138 = vmatmul.mubr.bf16.vlgmr.msra.gmra.mrb[0].mxu0 %v7335_v50  ;;  %v7419_v50 = vld [vmem:[%s9597_s19 + $0x1c4] ss:$8 sps:$4 sm:$0xff]  }
  0x66   : > { %1145 = vmatprep.mubr.bf16.mxu0 %v7338_v51 }
  0x6d   : > { %1146 = vmatmul.mubr.bf16.gmra.mrb[4].mxu0 %v7340_v52 }
  0x6e   : > { %1153 = vmatprep.mubr.bf16.mxu0 %v7341_v53 }
  0x75   : > { %1154 = vmatmul.mubr.bf16.gmra.mrb[8].mxu0 %v7343_v54 }
  0x76   : > { %1161 = vmatprep.mubr.bf16.mxu0 %v7344_v55  ;;  %v7421_v55 = vld [vmem:[%s9597_s19 + $0x1c0] ss:$8 sps:$4 sm:$0xff]  }
  0x7d   : > { %1162 = vmatmul.mubr.bf16.gmra.mrb[12].mxu0 %v7346_v56 }
  0x7e   : > { %1169 = vmatprep.mubr.bf16.mxu0 %v7347_v57  ;;  %v7422_v57 = vld [vmem:[%s9597_s19 + $0x1d4] ss:$8 sps:$4 sm:$0xff]  }
  0x85   : > { %1170 = vmatmul.mubr.bf16.gmra.mrb[16].mxu0 %v7349_v58 }
  0x86   : > { %1177 = vmatprep.mubr.bf16.mxu0 %v7350_v59 }
  0x8d   : > { %1178 = vmatmul.mubr.bf16.gmra.mrb[20].mxu0 %v7352_v60 }
  0x8e   : > { %1185 = vmatprep.mubr.bf16.mxu0 %v7353_v61 }
  0x95   : > { %1186 = vmatmul.mubr.bf16.gmra.mrb[24].mxu0 %v7355_v62  ;;  %v7424_v62 = vld [vmem:[%s9597_s19 + $0x1d0] ss:$8 sps:$4 sm:$0xff]  }
  0x96   : > { %1193 = vmatprep.mubr.bf16.mxu0 %v7356_v63 }
  0x9d   : > { %1194 = vmatmul.mubr.bf16.gmra.mrb[28].mxu0 %v7358_v1  ;;  %v7425_v1 = vld [vmem:[%s9597_s19 + $0x1e4] ss:$8 sps:$4 sm:$0xff]  }
  0x9e   : > { %1201 = vmatprep.mubr.bf16.mxu0 %v7359_v2 }
  0xa5   : > { %1202 = vmatmul.mubr.bf16.gmra.mrb[32].mxu0 %v7361_v3 }
  0xa6   : > { %1209 = vmatprep.mubr.bf16.mxu0 %v7362_v4 }
  0xad   : > { %1210 = vmatmul.mubr.bf16.gmra.mrb[36].mxu0 %v7364_v5 }
  0xae   : > { %1217 = vmatprep.mubr.bf16.mxu0 %v7365_v6  ;;  %v7427_v6 = vld [vmem:[%s9597_s19 + $0x1e0] ss:$8 sps:$4 sm:$0xff]  }
  0xb5   : > { %1218 = vmatmul.mubr.bf16.gmra.mrb[40].mxu0 %v7367_v7 }
  0xb6   : > { %1225 = vmatprep.mubr.bf16.mxu0 %v7368_v8  ;;  %v7428_v8 = vld [vmem:[%s9597_s19 + $0x1f4] ss:$8 sps:$4 sm:$0xff]  }
  0xbd   : > { %1226 = vmatmul.mubr.bf16.gmra.mrb[44].mxu0 %v7370_v9 }
  0xbe   : > { %1233 = vmatprep.mubr.bf16.mxu0 %v7371_v10 }
  0xc5   : > { %1234 = vmatmul.mubr.bf16.gmra.mrb[48].mxu0 %v7373_v11 }
  0xc6   : > { %1241 = vmatprep.mubr.bf16.mxu0 %v7374_v12 }
  0xcd   : > { %1242 = vmatmul.mubr.bf16.gmra.mrb[52].mxu0 %v7376_v13  ;;  %v7430_v13 = vld [vmem:[%s9597_s19 + $0x1f0] ss:$8 sps:$4 sm:$0xff]  }
  0xce   : > { %1249 = vmatprep.mubr.bf16.mxu0 %v7377_v14 }
  0xd5   : > { %1250 = vmatmul.mubr.bf16.gmra.mrb[56].mxu0 %v7379_v15  ;;  %v7431_v15 = vld [vmem:[%s9597_s19 + $0x204] ss:$8 sps:$4 sm:$0xff]  }
  0xd6   : > { %1257 = vmatprep.mubr.bf16.mxu0 %v7380_v16 }
  0xdd   : > { %1258 = vmatmul.mubr.bf16.gmra.mrb[60].mxu0 %v7382_v17 }
  0xde   : > { %1265 = vmatprep.mubr.bf16.mxu0 %v7383_v18 }
  0xe5   : > { %1266 = vmatmul.mubr.bf16.gmra.mrb[64].mxu0 %v7385_v19 }
  0xe6   : > { %1273 = vmatprep.mubr.bf16.mxu0 %v7386_v20  ;;  %v7433_v20 = vld [vmem:[%s9597_s19 + $0x200] ss:$8 sps:$4 sm:$0xff]  }
  0xed   : > { %1274 = vmatmul.mubr.bf16.gmra.mrb[68].mxu0 %v7388_v21 }
  0xee   : > { %1281 = vmatprep.mubr.bf16.mxu0 %v7389_v22  ;;  %v7434_v22 = vld [vmem:[%s9597_s19 + $0x214] ss:$8 sps:$4 sm:$0xff]  }
  0xf5   : > { %1282 = vmatmul.mubr.bf16.gmra.mrb[72].mxu0 %v7391_v23 }
  0xf6   : > { %1289 = vmatprep.mubr.bf16.mxu0 %v7392_v24 }
  0xfd   : > { %1290 = vmatmul.mubr.bf16.gmra.mrb[76].mxu0 %v7394_v27  ;;  %v7436_v27 = vld [vmem:[%s9597_s19 + $0x210] ss:$8 sps:$4 sm:$0xff]  }
  0xfe   : > { %1297 = vmatprep.mubr.bf16.mxu0 %v7395_v28 }
 0x105   : > { %1298 = vmatmul.mubr.bf16.gmra.mrb[80].mxu0 %v7397_v31 }
 0x106   : > { %1305 = vmatprep.mubr.bf16.mxu0 %v7398_v32 }
 0x10d   : > { %1306 = vmatmul.mubr.bf16.gmra.mrb[84].mxu0 %v7400_v33 }
 0x10e   : > { %1313 = vmatprep.mubr.bf16.mxu0 %v7401_v34  ;;  %v7439_v34 = vld [vmem:[%s9597_s19 + $0x220] ss:$8 sps:$4 sm:$0xff]  }
 0x115   : > { %1314 = vmatmul.mubr.bf16.gmra.mrb[88].mxu0 %v7403_v35 }
 0x116   : > { %1321 = vmatprep.mubr.bf16.mxu0 %v7404_v36  ;;  %v7442_v36 = vld [vmem:[%s9597_s19 + $0x234] ss:$8 sps:$4 sm:$0xff]  }
 0x11d   : > { %1322 = vmatmul.mubr.bf16.gmra.mrb[92].mxu0 %v7406_v37 }
 0x11e   : > { %1329 = vmatprep.mubr.bf16.mxu0 %v7407_v38 }
 0x125   : > { %1330 = vmatmul.mubr.bf16.gmra.mrb[96].mxu0 %v7409_v39 }
 0x126   : > { %1337 = vmatprep.mubr.bf16.mxu0 %v7410_v40 }
 0x12d   : > { %1338 = vmatmul.mubr.bf16.gmra.mrb[100].mxu0 %v7412_v41  ;;  %v7444_v41 = vld [vmem:[%s9597_s19 + $0x230] ss:$8 sps:$4 sm:$0xff]  }
 0x12e   : > { %1345 = vmatprep.mubr.bf16.mxu0 %v7413_v42 }
 0x135   : > { %1346 = vmatmul.mubr.bf16.gmra.mrb[104].mxu0 %v7415_v44  ;;  %v7447_v44 = vld [vmem:[%s9597_s19 + $0x244] ss:$8 sps:$4 sm:$0xff]  }
 0x136   : > { %1353 = vmatprep.mubr.bf16.mxu0 %v7416_v45 }
 0x138   : > { %v8240_v46 = vpop.f32.mrb[0].mxu0 }
 0x139   : > { %v1141_v47 = vpop.f32.mrb[1].mxu0 }
 0x13a   : > { %v8245_v49 = vpop.f32.mrb[2].mxu0 }
 0x13b   : > { %v1458_v51 = vpack.c.bf16 %v8245_v49, %v8240_v46  ;;  %v1144_v52 = vpop.f32.mrb[3].mxu0  ;;  %v7465_v46 = vld [vmem:[%s9600_s18 + $0x50] sm:$0xff]  }
 0x13c   : > { %v7449_v52 = vld [vmem:[%s9597_s19 + $0x240] ss:$8 sps:$4 sm:$0xff]  }
 0x13d   : > { %1354 = vmatmul.mubr.bf16.gmra.mrb[108].mxu0 %v7418_v48 }
 0x13e   : > { %1361 = vmatprep.mubr.bf16.mxu0 %v7419_v50 }
 0x140   : > { %v8252_v53 = vpop.f32.mrb[4].mxu0 }
 0x141   : > { %v1149_v54 = vpop.f32.mrb[5].mxu0 }
 0x142   : > { %v8257_v56 = vpop.f32.mrb[6].mxu0 }
 0x143   : > { %v1459_v58 = vpack.c.bf16 %v8257_v56, %v8252_v53  ;;  %v1152_v59 = vpop.f32.mrb[7].mxu0  ;;  %v7466_v53 = vld [vmem:[%s9600_s18 + $0x58] sm:$0xff]   ;;  %v7467_v56 = vld [vmem:[%s9600_s18 + $0x60] sm:$0xff]  }
 0x145   : > { %1362 = vmatmul.mubr.bf16.gmra.mrb[112].mxu0 %v7421_v55  ;;  %v7450_v55 = vld [vmem:[%s9597_s19 + $0x254] ss:$8 sps:$4 sm:$0xff]  }
 0x146   : > { %1369 = vmatprep.mubr.bf16.mxu0 %v7422_v57 }
 0x148   : > { %v8264_v60 = vpop.f32.mrb[8].mxu0 }
 0x149   : > { %v1157_v61 = vpop.f32.mrb[9].mxu0 }
 0x14a   : > { %v8269_v63 = vpop.f32.mrb[10].mxu0  ;;  %v7460_v61 = vld [vmem:[%s9600_s18 + $0x8] sm:$0xff]  }
 0x14b   : > { %v1460_v2 = vpack.c.bf16 %v8269_v63, %v8264_v60  ;;  %v1160_v3 = vpop.f32.mrb[11].mxu0 }
 0x14d   : > { %1370 = vmatmul.mubr.bf16.gmra.mrb[116].mxu0 %v7424_v62  ;;  %v7461_v62 = vld [vmem:[%s9600_s18 + $0x10] sm:$0xff]  }
 0x14e   : > { %1377 = vmatprep.mubr.bf16.mxu0 %v7425_v1 }
 0x150   : > { %v8276_v4 = vpop.f32.mrb[12].mxu0 }
 0x151   : > { %v1165_v5 = vpop.f32.mrb[13].mxu0 }
 0x152   : > { %v8281_v7 = vpop.f32.mrb[14].mxu0  ;;  %v7452_v5 = vld [vmem:[%s9597_s19 + $0x250] ss:$8 sps:$4 sm:$0xff]  }
 0x153   : > { %v1461_v9 = vpack.c.bf16 %v8281_v7, %v8276_v4  ;;  %v1168_v10 = vpop.f32.mrb[15].mxu0 }
 0x155   : > { %1378 = vmatmul.mubr.bf16.gmra.mrb[120].mxu0 %v7427_v6 }
 0x156   : > { %1385 = vmatprep.mubr.bf16.mxu0 %v7428_v8  ;;  %v7453_v8 = vld [vmem:[%s9597_s19 + $0x264] ss:$8 sps:$4 sm:$0xff]  }
 0x158   : > { %v8288_v11 = vpop.f32.mrb[16].mxu0 }
 0x159   : > { %v1173_v12 = vpop.f32.mrb[17].mxu0 }
 0x15a   : > { %v8293_v14 = vpop.f32.mrb[18].mxu0 }
 0x15b   : > { %v1462_v16 = vpack.c.bf16 %v8293_v14, %v8288_v11  ;;  %v1176_v17 = vpop.f32.mrb[19].mxu0 }
 0x15d   : > { %1386 = vmatmul.mubr.bf16.gmra.mrb[124].mxu0 %v7430_v13  ;;  %v7463_v13 = vld [vmem:[%s9600_s18 + $0x40] sm:$0xff]  }
 0x15e   : > { %1393 = vmatprep.mubr.bf16.mxu0 %v7431_v15 }
 0x160   : > { %v8300_v18 = vpop.f32.mrb[20].mxu0 }
 0x161   : > { %v1181_v19 = vpop.f32.mrb[21].mxu0 }
 0x162   : > { %v8305_v21 = vpop.f32.mrb[22].mxu0  ;;  %v7455_v19 = vld [vmem:[%s9597_s19 + $0x260] ss:$8 sps:$4 sm:$0xff]  }
 0x163   : > { %v1463_v23 = vpack.c.bf16 %v8305_v21, %v8300_v18  ;;  %v1184_v24 = vpop.f32.mrb[23].mxu0 }
 0x165   : > { %1394 = vmatmul.mubr.bf16.gmra.mrb[128].mxu0 %v7433_v20 }
 0x166   : > { %1401 = vmatprep.mubr.bf16.mxu0 %v7434_v22  ;;  %v7456_v22 = vld [vmem:[%s9597_s19 + $0x274] ss:$8 sps:$4 sm:$0xff]  }
 0x168   : > { %v8312_v25 = vpop.f32.mrb[24].mxu0 }
 0x169   : > { %v1189_v26 = vpop.f32.mrb[25].mxu0 }
 0x16a   : > { %v8317_v28 = vpop.f32.mrb[26].mxu0 }
 0x16b   : > { %v1464_v30 = vpack.c.bf16 %v8317_v28, %v8312_v25  ;;  %v1192_v31 = vpop.f32.mrb[27].mxu0  ;;  %v7468_v25 = vld [vmem:[%s9600_s18 + $0x68] sm:$0xff]   ;;  %v7469_v28 = vld [vmem:[%s9600_s18 + $0x70] sm:$0xff]  }
 0x16c   : > { %v7458_v31 = vld [vmem:[%s9597_s19 + $0x270] ss:$8 sps:$4 sm:$0xff]  }
 0x16d   : > { %1402 = vmatmul.mubr.bf16.gmra.mrb[132].mxu0 %v7436_v27 }
 0x16e   : > { %1409 = vmatprep.mubr.bf16.mxu0 %v7437_v29 }
 0x170   : > { %v8324_v32 = vpop.f32.mrb[28].mxu0 }
 0x171   : > { %v1197_v33 = vpop.f32.mrb[29].mxu0 }
 0x172   : > { %v8329_v35 = vpop.f32.mrb[30].mxu0 }
 0x173   : > { %v1465_v37 = vpack.c.bf16 %v8329_v35, %v8324_v32  ;;  %v1200_v38 = vpop.f32.mrb[31].mxu0 }
 0x175   : > { %1410 = vmatmul.mubr.bf16.gmra.mrb[136].mxu0 %v7439_v34 }
 0x176   : > { %1417 = vmatprep.mubr.bf16.mxu0 %v7442_v36 }
 0x178   : > { %v1203_v39 = vpop.f32.mrb[32].mxu0 }
 0x179   : > { %v1205_v40 = vpop.f32.mrb[33].mxu0 }
 0x17a   : > { %v1206_v42 = vpop.f32.mrb[34].mxu0 }
 0x17b   : > { %v1466_v45 = vpack.c.bf16 %v1206_v42, %v1203_v39  ;;  %v1208_v47 = vpop.f32.mrb[35].mxu0 }
 0x17d   : > { %1418 = vmatmul.mubr.bf16.gmra.mrb[140].mxu0 %v7444_v41  ;;  %6799 = vmatprep.mubr.msk.bf16.mxu1 %vm1539_vm0, %v1466_v45 }
 0x17e   : > { %1425 = vmatprep.mubr.bf16.mxu0 %v7447_v44 }
 0x180   : > { %v1211_v48 = vpop.f32.mrb[36].mxu0 }
 0x181   : > { %v1213_v50 = vpop.f32.mrb[37].mxu0 }
 0x182   : > { %v1214_v54 = vpop.f32.mrb[38].mxu0 }
 0x183   : > { %v1467_v57 = vpack.c.bf16 %v1214_v54, %v1211_v48  ;;  %v1216_v59 = vpop.f32.mrb[39].mxu0 }
 0x185   : > { %1426 = vmatmul.mubr.bf16.gmra.mrb[144].mxu0 %v7449_v52  ;;  %6800 = vmatmul.mubr.msk.bf16.vlgmr.msra.gmra.mrb[0].mxu1 %vm1539_vm0, %v1467_v57 }
 0x186   : > { %1433 = vmatprep.mubr.bf16.mxu0 %v7450_v55  ;;  %6816 = vmatpush3.bf16.msra.mxu1 %v8231_v43  ;;  %v7462_v43 = vld [vmem:[%s9600_s18 + $0x18] sm:$0xff]  }
 0x187   : > { %6817 = vmatprep.subr.bf16.mxu1 %v7460_v61 }
 0x188   : > { %v1219_v1 = vpop.f32.mrb[40].mxu0 }
 0x189   : > { %v1221_v3 = vpop.f32.mrb[41].mxu0 }
 0x18a   : > { %v1222_v6 = vpop.f32.mrb[42].mxu0  ;;  %6818 = vmatpush3.bf16.msra.mxu1 %v7460_v61 }
 0x18b   : > { %v1468_v10 = vpack.c.bf16 %v1222_v6, %v1219_v1  ;;  %v1224_v12 = vpop.f32.mrb[43].mxu0  ;;  %6819 = vmatprep.subr.bf16.mxu1 %v7461_v62  ;;  %v7464_v6 = vld [vmem:[%s9600_s18 + $0x48] sm:$0xff]  }
 0x18d   : > { %1434 = vmatmul.mubr.bf16.gmra.mrb[148].mxu0 %v7452_v5  ;;  %6803 = vmatprep.mubr.msk.bf16.mxu1 %vm1539_vm0, %v1468_v10 }
 0x18e   : > { %1441 = vmatprep.mubr.bf16.mxu0 %v7453_v8  ;;  %6820 = vmatpush3.bf16.msra.mxu1 %v7461_v62 }
 0x18f   : > { %6821 = vmatprep.subr.bf16.mxu1 %v7462_v43 }
 0x190   : > { %v1227_v15 = vpop.f32.mrb[44].mxu0 }
 0x191   : > { %v1229_v17 = vpop.f32.mrb[45].mxu0 }
 0x192   : > { %v1230_v20 = vpop.f32.mrb[46].mxu0  ;;  %6822 = vmatpush3.bf16.msra.mxu1 %v7462_v43  ;;  %v7470_v17 = vld [vmem:[%s9600_s18 + $0x78] sm:$0xff]  }
 0x193   : > { %v1469_v24 = vpack.c.bf16 %v1230_v20, %v1227_v15  ;;  %v1232_v26 = vpop.f32.mrb[47].mxu0  ;;  %6839 = vmatprep.subr.bf16.mxu1 %v7463_v13 }
 0x195   : > { %1442 = vmatmul.mubr.bf16.gmra.mrb[152].mxu0 %v7455_v19  ;;  %6804 = vmatmul.mubr.msk.bf16.gmra.mrb[4].mxu1 %vm1539_vm0, %v1469_v24  ;;  %v7471_v19 = vld [vmem:[%s9600_s18 + $0x80] sm:$0xff]  }
 0x196   : > { %1449 = vmatprep.mubr.bf16.mxu0 %v7456_v22 }
 0x198   : > { %v1235_v27 = vpop.f32.mrb[48].mxu0 }
 0x199   : > { %v1237_v29 = vpop.f32.mrb[49].mxu0 }
 0x19a   : > { %v1238_v33 = vpop.f32.mrb[50].mxu0 }
 0x19b   : > { %v1470_v34 = vpack.c.bf16 %v1238_v33, %v1235_v27  ;;  %v1240_v36 = vpop.f32.mrb[51].mxu0 }
 0x19d   : > { %1450 = vmatmul.mubr.bf16.gmra.mrb[156].mxu0 %v7458_v31  ;;  %6807 = vmatprep.mubr.msk.bf16.mxu1 %vm1539_vm0, %v1470_v34 }
 0x1a0   : > { %v1243_v38 = vpop.f32.mrb[52].mxu0 }
 0x1a1   : > { %v1245_v39 = vpop.f32.mrb[53].mxu0 }
 0x1a2   : > { %v1246_v40 = vpop.f32.mrb[54].mxu0 }
 0x1a3   : > { %v1471_v41 = vpack.c.bf16 %v1246_v40, %v1243_v38  ;;  %v1248_v42 = vpop.f32.mrb[55].mxu0 }
 0x1a5   : > { %6808 = vmatmul.mubr.msk.bf16.gmra.mrb[8].mxu1 %vm1539_vm0, %v1471_v41 }
 0x1a8   : > { %v1251_v44 = vpop.f32.mrb[56].mxu0 }
 0x1a9   : > { %v1253_v45 = vpop.f32.mrb[57].mxu0 }
 0x1aa   : > { %v1254_v47 = vpop.f32.mrb[58].mxu0 }
 0x1ab   : > { %v1472_v48 = vpack.c.bf16 %v1254_v47, %v1251_v44  ;;  %v1256_v50 = vpop.f32.mrb[59].mxu0 }
 0x1ad   : > { %6811 = vmatprep.mubr.msk.bf16.mxu1 %vm1539_vm0, %v1472_v48 }
 0x1b0   : > { %v1259_v52 = vpop.f32.mrb[60].mxu0 }
 0x1b1   : > { %v1261_v54 = vpop.f32.mrb[61].mxu0 }
 0x1b2   : > { %v1262_v55 = vpop.f32.mrb[62].mxu0  ;;  %v7473_v54 = vld [vmem:[%s9600_s18 + $0x90] sm:$0xff]  }
 0x1b3   : > { %v1473_v57 = vpack.c.bf16 %v1262_v55, %v1259_v52  ;;  %v1264_v59 = vpop.f32.mrb[63].mxu0  ;;  %v7472_v52 = vld [vmem:[%s9600_s18 + $0x88] sm:$0xff]  }
 0x1b5   : > { %6812 = vmatmul.mubr.msk.bf16.gmra.mrb[12].mxu1 %vm1539_vm0, %v1473_v57 }
 0x1b6   : > { %6823 = vmatprep.mubr.msk.bf16.mxu1 %vm1539_vm0, %v1458_v51 }
 0x1b8   : > { %v1267_v61 = vpop.f32.mrb[64].mxu0 }
 0x1b9   : > { %v1269_v62 = vpop.f32.mrb[65].mxu0 }
 0x1ba   : > { %v1270_v1 = vpop.f32.mrb[66].mxu0 }
 0x1bb   : > { %v1474_v3 = vpack.c.bf16 %v1270_v1, %v1267_v61  ;;  %v1272_v5 = vpop.f32.mrb[67].mxu0  ;;  %v7474_v1 = vld [vmem:[%s9600_s18 + $0x98] sm:$0xff]  }
 0x1bd   : > { %6824 = vmatmul.mubr.msk.bf16.vlgmr.msra.gmra.mrb[0].mxu1 %vm1539_vm0, %v1459_v58 }
 0x1be   : > { %6827 = vmatprep.mubr.msk.bf16.mxu1 %vm1539_vm0, %v1460_v2  ;;  %6840 = vmatpush3.bf16.msra.mxu1 %v7463_v13 }
 0x1bf   : > { %6841 = vmatprep.subr.bf16.mxu1 %v7464_v6 }
 0x1c0   : > { %v1275_v49 = vpop.f32.mrb[68].mxu0 }
 0x1c1   : > { %v1277_v51 = vpop.f32.mrb[69].mxu0 }
 0x1c2   : > { %v1278_v8 = vpop.f32.mrb[70].mxu0  ;;  %6842 = vmatpush3.bf16.msra.mxu1 %v7464_v6 }
 0x1c3   : > { %v1475_v10 = vpack.c.bf16 %v1278_v8, %v1275_v49  ;;  %v1280_v12 = vpop.f32.mrb[71].mxu0  ;;  %6843 = vmatprep.subr.bf16.mxu1 %v7465_v46 }
 0x1c5   : > { %6828 = vmatmul.mubr.msk.bf16.gmra.mrb[4].mxu1 %vm1539_vm0, %v1461_v9 }
 0x1c6   : > { %6831 = vmatprep.mubr.msk.bf16.mxu1 %vm1539_vm0, %v1462_v16  ;;  %6844 = vmatpush3.bf16.msra.mxu1 %v7465_v46 }
 0x1c7   : > { %6845 = vmatprep.subr.bf16.mxu1 %v7466_v53 }
 0x1c8   : > { %v1283_v58 = vpop.f32.mrb[72].mxu0 }
 0x1c9   : > { %v1285_v60 = vpop.f32.mrb[73].mxu0 }
 0x1ca   : > { %v1286_v63 = vpop.f32.mrb[74].mxu0  ;;  %6846 = vmatpush3.bf16.msra.mxu1 %v7466_v53 }
 0x1cb   : > { %v1476_v2 = vpack.c.bf16 %v1286_v63, %v1283_v58  ;;  %v1288_v43 = vpop.f32.mrb[75].mxu0  ;;  %6863 = vmatprep.subr.bf16.mxu1 %v7467_v56 }
 0x1cd   : > { %6832 = vmatmul.mubr.msk.bf16.gmra.mrb[8].mxu1 %vm1539_vm0, %v1463_v23 }
 0x1ce   : > { %6835 = vmatprep.mubr.msk.bf16.mxu1 %vm1539_vm0, %v1464_v30 }
 0x1d0   : > { %v1291_v4 = vpop.f32.mrb[76].mxu0 }
 0x1d1   : > { %v1293_v7 = vpop.f32.mrb[77].mxu0 }
 0x1d2   : > { %v1294_v9 = vpop.f32.mrb[78].mxu0 }
 0x1d3   : > { %v1477_v11 = vpack.c.bf16 %v1294_v9, %v1291_v4  ;;  %v1296_v14 = vpop.f32.mrb[79].mxu0 }
 0x1d5   : > { %6836 = vmatmul.mubr.msk.bf16.gmra.mrb[12].mxu1 %vm1539_vm0, %v1465_v37 }
 0x1d6   : > { %6847 = vmatprep.mubr.msk.bf16.mxu1 %vm1539_vm0, %v1474_v3  ;;  %v7475_v3 = vld [vmem:[%s9601_s4] sm:$0xff]  }
 0x1d8   : > { %v1299_v16 = vpop.f32.mrb[80].mxu0 }
 0x1d9   : > { %v1301_v18 = vpop.f32.mrb[81].mxu0 }
 0x1da   : > { %v1302_v21 = vpop.f32.mrb[82].mxu0 }
 0x1db   : > { %v1478_v23 = vpack.c.bf16 %v1302_v21, %v1299_v16  ;;  %v1304_v13 = vpop.f32.mrb[83].mxu0 }
 0x1dd   : > { %6848 = vmatmul.mubr.msk.bf16.vlgmr.msra.gmra.mrb[0].mxu1 %vm1539_vm0, %v1475_v10 }
 0x1de   : > { %6851 = vmatprep.mubr.msk.bf16.mxu1 %vm1539_vm0, %v1476_v2  ;;  %6864 = vmatpush3.bf16.msra.mxu1 %v7467_v56 }
 0x1df   : > { %6865 = vmatprep.subr.bf16.mxu1 %v7468_v25 }
 0x1e0   : > { %v1307_v30 = vpop.f32.mrb[84].mxu0 }
 0x1e1   : > { %v1309_v32 = vpop.f32.mrb[85].mxu0 }
 0x1e2   : > { %v1310_v35 = vpop.f32.mrb[86].mxu0  ;;  %6866 = vmatpush3.bf16.msra.mxu1 %v7468_v25 }
 0x1e3   : > { %v1479_v37 = vpack.c.bf16 %v1310_v35, %v1307_v30  ;;  %v1312_v15 = vpop.f32.mrb[87].mxu0  ;;  %6867 = vmatprep.subr.bf16.mxu1 %v7469_v28 }
 0x1e5   : > { %6852 = vmatmul.mubr.msk.bf16.gmra.mrb[4].mxu1 %vm1539_vm0, %v1477_v11 }
 0x1e6   : > { %6855 = vmatprep.mubr.msk.bf16.mxu1 %vm1539_vm0, %v1478_v23  ;;  %6868 = vmatpush3.bf16.msra.mxu1 %v7469_v28 }
 0x1e7   : > { %6869 = vmatprep.subr.bf16.mxu1 %v7470_v17 }
 0x1e8   : > { %v1315_v20 = vpop.f32.mrb[88].mxu0 }
 0x1e9   : > { %v1317_v22 = vpop.f32.mrb[89].mxu0 }
 0x1ea   : > { %v1318_v24 = vpop.f32.mrb[90].mxu0  ;;  %6870 = vmatpush3.bf16.msra.mxu1 %v7470_v17  ;;  %v7476_v22 = vld [vmem:[%s9601_s4 + $0x8] sm:$0xff]  }
 0x1eb   : > { %v1480_v26 = vpack.c.bf16 %v1318_v24, %v1315_v20  ;;  %v1320_v27 = vpop.f32.mrb[91].mxu0  ;;  %6887 = vmatprep.subr.bf16.mxu1 %v7471_v19  ;;  %v7477_v24 = vld [vmem:[%s9601_s4 + $0x10] sm:$0xff]  }
 0x1ed   : > { %6856 = vmatmul.mubr.msk.bf16.gmra.mrb[8].mxu1 %vm1539_vm0, %v1479_v37 }
 0x1ee   : > { %6859 = vmatprep.mubr.msk.bf16.mxu1 %vm1539_vm0, %v1480_v26 }
 0x1f0   : > { %v1323_v29 = vpop.f32.mrb[92].mxu0 }
 0x1f1   : > { %v1325_v31 = vpop.f32.mrb[93].mxu0 }
 0x1f2   : > { %v1326_v33 = vpop.f32.mrb[94].mxu0 }
 0x1f3   : > { %v1481_v34 = vpack.c.bf16 %v1326_v33, %v1323_v29  ;;  %v1328_v36 = vpop.f32.mrb[95].mxu0 }
 0x1f4   : > { %v7479_v36 = vld [vmem:[%s9601_s4 + $0x20] sm:$0xff]  }
 0x1f5   : > { %6860 = vmatmul.mubr.msk.bf16.gmra.mrb[12].mxu1 %vm1539_vm0, %v1481_v34  ;;  %v7478_v34 = vld [vmem:[%s9601_s4 + $0x18] sm:$0xff]  }
 0x1f8   : > { %v1331_v38 = vpop.f32.mrb[96].mxu0 }
 0x1f9   : > { %v1333_v39 = vpop.f32.mrb[97].mxu0 }
 0x1fa   : > { %v1334_v40 = vpop.f32.mrb[98].mxu0 }
 0x1fb   : > { %v1482_v41 = vpack.c.bf16 %v1334_v40, %v1331_v38  ;;  %v1336_v42 = vpop.f32.mrb[99].mxu0 }
 0x1fd   : > { %6871 = vmatprep.mubr.msk.bf16.mxu1 %vm1539_vm0, %v1482_v41 }
 0x200   : > { %v1339_v44 = vpop.f32.mrb[100].mxu0 }
 0x201   : > { %v1341_v45 = vpop.f32.mrb[101].mxu0 }
 0x202   : > { %v1342_v47 = vpop.f32.mrb[102].mxu0 }
 0x203   : > { %v1483_v48 = vpack.c.bf16 %v1342_v47, %v1339_v44  ;;  %v1344_v50 = vpop.f32.mrb[103].mxu0 }
 0x205   : > { %6872 = vmatmul.mubr.msk.bf16.vlgmr.msra.gmra.mrb[0].mxu1 %vm1539_vm0, %v1483_v48 }
 0x206   : > { %6888 = vmatpush3.bf16.msra.mxu1 %v7471_v19 }
 0x207   : > { %6889 = vmatprep.subr.bf16.mxu1 %v7472_v52 }
 0x208   : > { %v1347_v55 = vpop.f32.mrb[104].mxu0 }
 0x209   : > { %v1349_v57 = vpop.f32.mrb[105].mxu0 }
 0x20a   : > { %v1350_v59 = vpop.f32.mrb[106].mxu0  ;;  %6890 = vmatpush3.bf16.msra.mxu1 %v7472_v52 }
 0x20b   : > { %v1484_v61 = vpack.c.bf16 %v1350_v59, %v1347_v55  ;;  %v1352_v62 = vpop.f32.mrb[107].mxu0  ;;  %6891 = vmatprep.subr.bf16.mxu1 %v7473_v54 }
 0x20d   : > { %6875 = vmatprep.mubr.msk.bf16.mxu1 %vm1539_vm0, %v1484_v61 }
 0x20e   : > { %6892 = vmatpush3.bf16.msra.mxu1 %v7473_v54 }
 0x20f   : > { %6893 = vmatprep.subr.bf16.mxu1 %v7474_v1 }
 0x210   : > { %v1355_v5 = vpop.f32.mrb[108].mxu0 }
 0x211   : > { %v1357_v6 = vpop.f32.mrb[109].mxu0 }
 0x212   : > { %v1358_v46 = vpop.f32.mrb[110].mxu0  ;;  %6894 = vmatpush3.bf16.msra.mxu1 %v7474_v1 }
 0x213   : > { %v1485_v49 = vpack.c.bf16 %v1358_v46, %v1355_v5  ;;  %v1360_v51 = vpop.f32.mrb[111].mxu0  ;;  %6911 = vmatprep.subr.bf16.mxu1 %v7475_v3 }
 0x215   : > { %6876 = vmatmul.mubr.msk.bf16.gmra.mrb[4].mxu1 %vm1539_vm0, %v1485_v49 }
 0x218   : > { %v1363_v8 = vpop.f32.mrb[112].mxu0 }
 0x219   : > { %v1365_v10 = vpop.f32.mrb[113].mxu0 }
 0x21a   : > { %v1366_v12 = vpop.f32.mrb[114].mxu0  ;;  %v7480_v10 = vld [vmem:[%s9601_s4 + $0x28] sm:$0xff]  }
 0x21b   : > { %v1486_v53 = vpack.c.bf16 %v1366_v12, %v1363_v8  ;;  %v1368_v56 = vpop.f32.mrb[115].mxu0  ;;  %v7481_v12 = vld [vmem:[%s9601_s4 + $0x30] sm:$0xff]  }
 0x21c   : > { %v7483_v56 = vld [vmem:[%s9601_s4 + $0x40] sm:$0xff]  }
 0x21d   : > { %6879 = vmatprep.mubr.msk.bf16.mxu1 %vm1539_vm0, %v1486_v53  ;;  %v7482_v53 = vld [vmem:[%s9601_s4 + $0x38] sm:$0xff]  }
 0x220   : > { %v1371_v58 = vpop.f32.mrb[116].mxu0 }
 0x221   : > { %v1373_v60 = vpop.f32.mrb[117].mxu0 }
 0x222   : > { %v1374_v63 = vpop.f32.mrb[118].mxu0 }
 0x223   : > { %v1487_v2 = vpack.c.bf16 %v1374_v63, %v1371_v58  ;;  %v1376_v43 = vpop.f32.mrb[119].mxu0  ;;  %v8503_v58 = vld [vmem:[%s9602_s3] ss:$0 sm:$0xff] }
 0x224   : > { %v8509_v43 = vld [vmem:[%s9602_s3 + $0x1] ss:$0 sm:$0xff] }
 0x225   : > { %6880 = vmatmul.mubr.msk.bf16.gmra.mrb[8].mxu1 %vm1539_vm0, %v1487_v2 }
 0x228   : > { %v1379_v4 = vpop.f32.mrb[120].mxu0 }
 0x229   : > { %v1381_v7 = vpop.f32.mrb[121].mxu0 }
 0x22a   : > { %v1382_v9 = vpop.f32.mrb[122].mxu0 }
 0x22b   : > { %v1488_v11 = vpack.c.bf16 %v1382_v9, %v1379_v4  ;;  %v1384_v14 = vpop.f32.mrb[123].mxu0 }
 0x22d   : > { %6883 = vmatprep.mubr.msk.bf16.mxu1 %vm1539_vm0, %v1488_v11 }
 0x230   : > { %v1387_v16 = vpop.f32.mrb[124].mxu0 }
 0x231   : > { %v1389_v18 = vpop.f32.mrb[125].mxu0 }
 0x232   : > { %v1390_v21 = vpop.f32.mrb[126].mxu0 }
 0x233   : > { %v1489_v23 = vpack.c.bf16 %v1390_v21, %v1387_v16  ;;  %v1392_v13 = vpop.f32.mrb[127].mxu0 }
 0x234   : > { %v8518_v13 = vld [vmem:[%s9602_s3 + $0x2] ss:$0 sm:$0xff]  ;;  %s9513_s3 = scalar_lea.hbm %s9603_s30, %s6562_s22 }
 0x235   : > { %6884 = vmatmul.mubr.msk.bf16.gmra.mrb[12].mxu1 %vm1539_vm0, %v1489_v23 }
 0x238   : > { %v1395_v25 = vpop.f32.mrb[128].mxu0 }
 0x239   : > { %v1397_v28 = vpop.f32.mrb[129].mxu0 }
 0x23a   : > { %v1398_v30 = vpop.f32.mrb[130].mxu0 }
 0x23b   : > { %v1490_v32 = vpack.c.bf16 %v1398_v30, %v1395_v25  ;;  %v1400_v35 = vpop.f32.mrb[131].mxu0 }
 0x23d   : > { %6895 = vmatprep.mubr.msk.bf16.mxu1 %vm1539_vm0, %v1490_v32 }
 0x240   : > { %v1403_v37 = vpop.f32.mrb[132].mxu0 }
 0x241   : > { %v1405_v15 = vpop.f32.mrb[133].mxu0 }
 0x242   : > { %v1406_v17 = vpop.f32.mrb[134].mxu0 }
 0x243   : > { %v1491_v19 = vpack.c.bf16 %v1406_v17, %v1403_v37  ;;  %v1408_v20 = vpop.f32.mrb[135].mxu0 }
 0x245   : > { %6896 = vmatmul.mubr.msk.bf16.vlgmr.msra.gmra.mrb[0].mxu1 %vm1539_vm0, %v1491_v19 }
 0x246   : > { %6912 = vmatpush3.bf16.msra.mxu1 %v7475_v3 }
 0x247   : > { %6913 = vmatprep.subr.bf16.mxu1 %v7476_v22 }
 0x248   : > { %v1411_v26 = vpop.f32.mrb[136].mxu0 }
 0x249   : > { %v1413_v27 = vpop.f32.mrb[137].mxu0 }
 0x24a   : > { %v1414_v29 = vpop.f32.mrb[138].mxu0  ;;  %6914 = vmatpush3.bf16.msra.mxu1 %v7476_v22  ;;  %v7484_v22 = vld [vmem:[%s9601_s4 + $0x48] sm:$0xff]  }
 0x24b   : > { %v1492_v31 = vpack.c.bf16 %v1414_v29, %v1411_v26  ;;  %v1416_v33 = vpop.f32.mrb[139].mxu0  ;;  %6915 = vmatprep.subr.bf16.mxu1 %v7477_v24  ;;  %v7485_v29 = vld [vmem:[%s9601_s4 + $0x50] sm:$0xff]  }
 0x24d   : > { %6899 = vmatprep.mubr.msk.bf16.mxu1 %vm1539_vm0, %v1492_v31 }
 0x24e   : > { %6916 = vmatpush3.bf16.msra.mxu1 %v7477_v24 }
 0x24f   : > { %6917 = vmatprep.subr.bf16.mxu1 %v7478_v34 }
 0x250   : > { %v1419_v38 = vpop.f32.mrb[140].mxu0 }
 0x251   : > { %v1421_v39 = vpop.f32.mrb[141].mxu0 }
 0x252   : > { %v1422_v40 = vpop.f32.mrb[142].mxu0  ;;  %6918 = vmatpush3.bf16.msra.mxu1 %v7478_v34 }
 0x253   : > { %v1493_v41 = vpack.c.bf16 %v1422_v40, %v1419_v38  ;;  %v1424_v42 = vpop.f32.mrb[143].mxu0  ;;  %6919 = vmatprep.subr.bf16.mxu1 %v7479_v36 }
 0x255   : > { %6900 = vmatmul.mubr.msk.bf16.gmra.mrb[4].mxu1 %vm1539_vm0, %v1493_v41 }
 0x256   : > { %6920 = vmatpush3.bf16.msra.mxu1 %v7479_v36 }
 0x257   : > { %6921 = vmatprep.subr.bf16.mxu1 %v7480_v10 }
 0x258   : > { %v1427_v44 = vpop.f32.mrb[144].mxu0 }
 0x259   : > { %v1429_v45 = vpop.f32.mrb[145].mxu0 }
 0x25a   : > { %v1430_v47 = vpop.f32.mrb[146].mxu0  ;;  %6922 = vmatpush3.bf16.msra.mxu1 %v7480_v10 }
 0x25b   : > { %v1494_v48 = vpack.c.bf16 %v1430_v47, %v1427_v44  ;;  %v1432_v50 = vpop.f32.mrb[147].mxu0  ;;  %6923 = vmatprep.subr.bf16.mxu1 %v7481_v12  ;;  %v7486_v44 = vld [vmem:[%s9601_s4 + $0x58] sm:$0xff]  }
 0x25d   : > { %6903 = vmatprep.mubr.msk.bf16.mxu1 %vm1539_vm0, %v1494_v48 }
 0x25e   : > { %6924 = vmatpush3.bf16.msra.mxu1 %v7481_v12 }
 0x25f   : > { %6925 = vmatprep.subr.bf16.mxu1 %v7482_v53 }
 0x260   : > { %v1435_v52 = vpop.f32.mrb[148].mxu0 }
 0x261   : > { %v1437_v54 = vpop.f32.mrb[149].mxu0 }
 0x262   : > { %v1438_v55 = vpop.f32.mrb[150].mxu0  ;;  %6926 = vmatpush3.bf16.msra.mxu1 %v7482_v53 }
 0x263   : > { %v1495_v57 = vpack.c.bf16 %v1438_v55, %v1435_v52  ;;  %v1440_v59 = vpop.f32.mrb[151].mxu0  ;;  %6943 = vmatprep.subr.bf16.mxu1 %v7483_v56  ;;  %v7487_v55 = vld [vmem:[%s9601_s4 + $0x60] sm:$0xff]  }
 0x265   : > { %6904 = vmatmul.mubr.msk.bf16.gmra.mrb[8].mxu1 %vm1539_vm0, %v1495_v57 }
 0x268   : > { %v1443_v61 = vpop.f32.mrb[152].mxu0 }
 0x269   : > { %v1445_v62 = vpop.f32.mrb[153].mxu0 }
 0x26a   : > { %v1446_v1 = vpop.f32.mrb[154].mxu0 }
 0x26b   : > { %v1496_v3 = vpack.c.bf16 %v1446_v1, %v1443_v61  ;;  %v1448_v5 = vpop.f32.mrb[155].mxu0  ;;  %v7488_v1 = vld [vmem:[%s9601_s4 + $0x68] sm:$0xff]  }
 0x26d   : > { %6907 = vmatprep.mubr.msk.bf16.mxu1 %vm1539_vm0, %v1496_v3 }
 0x270   : > { %v1451_v6 = vpop.f32.mrb[156].mxu0 }
 0x271   : > { %v1453_v46 = vpop.f32.mrb[157].mxu0 }
 0x272   : > { %v1454_v49 = vpop.f32.mrb[158].mxu0  ;;  %v7489_v46 = vld [vmem:[%s9601_s4 + $0x70] sm:$0xff]  }
 0x273   : > { %v1497_v51 = vpack.c.bf16 %v1454_v49, %v1451_v6  ;;  %v1456_v8 = vpop.f32.mrb[159].mxu0 }
 0x275   : > { %6908 = vmatmul.mubr.msk.bf16.gmra.mrb[12].mxu1 %vm1539_vm0, %v1497_v51 }
 0x318   : > { %v6897_v60 = vpop.f32.mrb[0].mxu1 }
 0x319   : > { %v2323_v63 = vadd.f32 %v6897_v60, %v8503_v58  ;;  %v2237_v2 = vpop.f32.mrb[1].mxu1 }
 0x31a   : > { %v2321_v4 = vadd.f32 %v8503_v58, %v2237_v2  ;;  %v6898_v7 = vpop.f32.mrb[2].mxu1  ;;  %v7490_v2 = vld [vmem:[%s9601_s4 + $0x78] sm:$0xff]  }
 0x31b   : > { %v2339_v9 = vmax.f32 %v2323_v63, 0.0  ;;  %v2324_v11 = vadd.f32 %v6898_v7, %v8503_v58  ;;  %v2240_v14 = vpop.f32.mrb[3].mxu1 }
 0x31c   : > { %v2337_v16 = vmax.f32 %v2321_v4, 0.0  ;;  %v2322_v18 = vadd.f32 %v8503_v58, %v2240_v14 }
 0x31d   : > { %v2361_v21 = vmul.f32 %v8509_v43, %v2339_v9  ;;  %v2340_v23 = vmax.f32 %v2324_v11, 0.0 }
 0x31e   : > { %v2359_v25 = vmul.f32 %v8509_v43, %v2337_v16  ;;  %v2338_v28 = vmax.f32 %v2322_v18, 0.0  ;;  %v7491_v18 = vld [vmem:[%s9601_s4 + $0x80] sm:$0xff]  }
 0x31f   : > { %v2362_v30 = vmul.f32 %v8509_v43, %v2340_v23  ;;  %v2381_v35 = vadd.f32 %v8518_v13, %v2361_v21 }
 0x320   : > { %v2360_v32 = vmul.f32 %v8509_v43, %v2338_v28  ;;  %v2379_v15 = vadd.f32 %v8518_v13, %v2359_v25 }
 0x321   : > { %v2382_v37 = vadd.f32 %v8518_v13, %v2362_v30 }
 0x322   : > { %v2380_v17 = vadd.f32 %v8518_v13, %v2360_v32 }
 0x323   : > { %v8527_v19 = vpack.c.bf16 %v2382_v37, %v2381_v35 }
 0x324   : > { %v8529_v20 = vpack.c.bf16 %v2380_v17, %v2379_v15 }
 0x326   : > { %6927 = vmatprep.mubr.bf16.mxu1 %v8529_v20 }
 0x327   : > { %6928 = vmatmul.mubr.bf16.vlgmr.msra.gmra.mrb[16].mxu1 %v8527_v19 }
 0x328   : > { %v6901_v24 = vpop.f32.mrb[4].mxu1  ;;  %6944 = vmatpush3.bf16.msra.mxu1 %v7483_v56 }
 0x329   : > { %v2327_v26 = vadd.f32 %v6901_v24, %v8503_v58  ;;  %v2253_v27 = vpop.f32.mrb[5].mxu1  ;;  %6945 = vmatprep.subr.bf16.mxu1 %v7484_v22 }
 0x32a   : > { %v2325_v31 = vadd.f32 %v8503_v58, %v2253_v27  ;;  %v6902_v33 = vpop.f32.mrb[6].mxu1 }
 0x32b   : > { %v2343_v34 = vmax.f32 %v2327_v26, 0.0  ;;  %v2328_v36 = vadd.f32 %v6902_v33, %v8503_v58  ;;  %v2256_v38 = vpop.f32.mrb[7].mxu1 }
 0x32c   : > { %v2341_v39 = vmax.f32 %v2325_v31, 0.0  ;;  %v2326_v40 = vadd.f32 %v8503_v58, %v2256_v38  ;;  %6946 = vmatpush3.bf16.msra.mxu1 %v7484_v22 }
 0x32d   : > { %v2365_v41 = vmul.f32 %v8509_v43, %v2343_v34  ;;  %v2344_v42 = vmax.f32 %v2328_v36, 0.0  ;;  %6947 = vmatprep.subr.bf16.mxu1 %v7485_v29 }
 0x32e   : > { %v2363_v45 = vmul.f32 %v8509_v43, %v2341_v39  ;;  %v2342_v47 = vmax.f32 %v2326_v40, 0.0 }
 0x32f   : > { %v2366_v48 = vmul.f32 %v8509_v43, %v2344_v42  ;;  %v2385_v52 = vadd.f32 %v8518_v13, %v2365_v41 }
 0x330   : > { %v2364_v50 = vmul.f32 %v8509_v43, %v2342_v47  ;;  %6948 = vmatpush3.bf16.msra.mxu1 %v7485_v29  ;;  %v2383_v57 = vadd.f32 %v8518_v13, %v2363_v45  ;;  %v7494_v45 = vld [vmem:[%s9601_s4 + $0x98] sm:$0xff]   ;;  %v7495_v47 = vld [vmem:[%s9601_s4 + $0xa0] sm:$0xff]  }
 0x331   : > { %v2386_v54 = vadd.f32 %v8518_v13, %v2366_v48  ;;  %6949 = vmatprep.subr.bf16.mxu1 %v7486_v44  ;;  %v7496_v48 = vld [vmem:[%s9601_s4 + $0xa8] sm:$0xff]  }
 0x332   : > { %v2384_v59 = vadd.f32 %v8518_v13, %v2364_v50  ;;  %v7497_v50 = vld [vmem:[%s9601_s4 + $0xb0] sm:$0xff]  }
 0x333   : > { %v8557_v61 = vpack.c.bf16 %v2386_v54, %v2385_v52  ;;  %v7498_v52 = vld [vmem:[%s9601_s4 + $0xb8] sm:$0xff]   ;;  %v7499_v54 = vld [vmem:[%s9601_s4 + $0xc0] sm:$0xff]  }
 0x334   : > { %v8559_v62 = vpack.c.bf16 %v2384_v59, %v2383_v57  ;;  %6950 = vmatpush3.bf16.msra.mxu1 %v7486_v44  ;;  %v7501_v57 = vld [vmem:[%s9601_s4 + $0xd0] sm:$0xff]   ;;  %v7502_v59 = vld [vmem:[%s9601_s4 + $0xd8] sm:$0xff]  }
 0x335   : > { %6951 = vmatprep.subr.bf16.mxu1 %v7487_v55 }
 0x336   : > { %6931 = vmatprep.mubr.bf16.mxu1 %v8559_v62 }
 0x337   : > { %6932 = vmatmul.mubr.bf16.gmra.mrb[20].mxu1 %v8557_v61 }
 0x338   : > { %v6905_v3 = vpop.f32.mrb[8].mxu1  ;;  %6952 = vmatpush3.bf16.msra.mxu1 %v7487_v55  ;;  %v7500_v55 = vld [vmem:[%s9601_s4 + $0xc8] sm:$0xff]  }
 0x339   : > { %v2331_v5 = vadd.f32 %v6905_v3, %v8503_v58  ;;  %v2269_v6 = vpop.f32.mrb[9].mxu1  ;;  %6953 = vmatprep.subr.bf16.mxu1 %v7488_v1  ;;  %v7504_v3 = vld [vmem:[%s9601_s4 + $0xe8] sm:$0xff]  }
 0x33a   : > { %v2329_v49 = vadd.f32 %v8503_v58, %v2269_v6  ;;  %v6906_v51 = vpop.f32.mrb[10].mxu1  ;;  %v7506_v6 = vld [vmem:[%s9601_s4 + $0xf8] sm:$0xff]  }
 0x33b   : > { %v2347_v8 = vmax.f32 %v2331_v5, 0.0  ;;  %v2332_v10 = vadd.f32 %v6906_v51, %v8503_v58  ;;  %v2272_v12 = vpop.f32.mrb[11].mxu1  ;;  %v7505_v5 = vld [vmem:[%s9601_s4 + $0xf0] sm:$0xff]  }
 0x33c   : > { %v2345_v53 = vmax.f32 %v2329_v49, 0.0  ;;  %v2330_v56 = vadd.f32 %v8503_v58, %v2272_v12  ;;  %6954 = vmatpush3.bf16.msra.mxu1 %v7488_v1  ;;  %v7503_v1 = vld [vmem:[%s9601_s4 + $0xe0] sm:$0xff]   ;;  %v7508_v49 = vld [vmem:[%s9601_s4 + $0x108] sm:$0xff]   ;;  %v7509_v51 = vld [vmem:[%s9601_s4 + $0x110] sm:$0xff]  }
 0x33d   : > { %v2369_v60 = vmul.f32 %v8509_v43, %v2347_v8  ;;  %v2348_v63 = vmax.f32 %v2332_v10, 0.0  ;;  %6955 = vmatprep.subr.bf16.mxu1 %v7489_v46  ;;  %v7510_v8 = vld [vmem:[%s9601_s4 + $0x118] sm:$0xff]   ;;  %v7511_v10 = vld [vmem:[%s9601_s4 + $0x120] sm:$0xff]   ;;  %v7512_v12 = vld [vmem:[%s9601_s4 + $0x128] sm:$0xff]  }
 0x33e   : > { %v2367_v4 = vmul.f32 %v8509_v43, %v2345_v53  ;;  %v2346_v7 = vmax.f32 %v2330_v56, 0.0  ;;  %v7513_v53 = vld [vmem:[%s9601_s4 + $0x130] sm:$0xff]   ;;  %v7514_v56 = vld [vmem:[%s9601_s4 + $0x138] sm:$0xff]  }
 0x33f   : > { %v2370_v9 = vmul.f32 %v8509_v43, %v2348_v63  ;;  %v2389_v14 = vadd.f32 %v8518_v13, %v2369_v60 }
 0x340   : > { %v2368_v11 = vmul.f32 %v8509_v43, %v2346_v7  ;;  %6956 = vmatpush3.bf16.msra.mxu1 %v7489_v46  ;;  %v2387_v21 = vadd.f32 %v8518_v13, %v2367_v4  ;;  %v7507_v46 = vld [vmem:[%s9601_s4 + $0x100] sm:$0xff]  }
 0x341   : > { %v2390_v16 = vadd.f32 %v8518_v13, %v2370_v9  ;;  %6957 = vmatprep.subr.bf16.mxu1 %v7490_v2 }
 0x342   : > { %v2388_v23 = vadd.f32 %v8518_v13, %v2368_v11 }
 0x343   : > { %v8587_v25 = vpack.c.bf16 %v2390_v16, %v2389_v14 }
 0x344   : > { %v8589_v28 = vpack.c.bf16 %v2388_v23, %v2387_v21  ;;  %6958 = vmatpush3.bf16.msra.mxu1 %v7490_v2 }
 0x345   : > { %6975 = vmatprep.subr.bf16.mxu1 %v7491_v18 }
 0x346   : > { %6935 = vmatprep.mubr.bf16.mxu1 %v8589_v28 }
 0x347   : > { %6936 = vmatmul.mubr.bf16.gmra.mrb[24].mxu1 %v8587_v25 }
 0x348   : > { %v6909_v30 = vpop.f32.mrb[12].mxu1 }
 0x349   : > { %v2335_v32 = vadd.f32 %v6909_v30, %v8503_v58  ;;  %v2285_v35 = vpop.f32.mrb[13].mxu1 }
 0x34a   : > { %v2333_v37 = vadd.f32 %v8503_v58, %v2285_v35  ;;  %v6910_v15 = vpop.f32.mrb[14].mxu1 }
 0x34b   : > { %v2351_v17 = vmax.f32 %v2335_v32, 0.0  ;;  %v2336_v22 = vadd.f32 %v6910_v15, %v8503_v58  ;;  %v2288_v24 = vpop.f32.mrb[15].mxu1 }
 0x34c   : > { %v2349_v26 = vmax.f32 %v2333_v37, 0.0  ;;  %v2334_v27 = vadd.f32 %v8503_v58, %v2288_v24 }
 0x34d   : > { %v2373_v29 = vmul.f32 %v8509_v43, %v2351_v17  ;;  %v2352_v31 = vmax.f32 %v2336_v22, 0.0  ;;  %v7515_v22 = vld [vmem:[%s9560_s5] sm:$0xff]  }
 0x34e   : > { %v2371_v33 = vmul.f32 %v8509_v43, %v2349_v26  ;;  %v2350_v34 = vmax.f32 %v2334_v27, 0.0 }
 0x34f   : > { %v2374_v36 = vmul.f32 %v8509_v43, %v2352_v31  ;;  %v2393_v39 = vadd.f32 %v8518_v13, %v2373_v29 }
 0x350   : > { %v2372_v38 = vmul.f32 %v8509_v43, %v2350_v34  ;;  %v2391_v41 = vadd.f32 %v8518_v13, %v2371_v33  ;;  %v7492_v43 = vld [vmem:[%s9601_s4 + $0x88] sm:$0xff]  }
 0x351   : > { %v2394_v40 = vadd.f32 %v8518_v13, %v2374_v36 }
 0x352   : > { %v2392_v42 = vadd.f32 %v8518_v13, %v2372_v38  ;;  %v7493_v13 = vld [vmem:[%s9601_s4 + $0x90] sm:$0xff]   ;;  %s7800_s4 = scalar_lea.vmem %s7799_s21, 256 }
 0x353   : > { %v8605_v44 = vpack.c.bf16 %v2394_v40, %v2393_v39  ;;  %p7802_p1 = scmp.lt.s32.totalorder %s7800_s4, %s7794_s29 }
 0x354   : > { %v8607_v58 = vpack.c.bf16 %v2392_v42, %v2391_v41 }
 0x355   : > { %p7803_p2 = por %p7802_p1, %p7801_p0 }
 0x356   : > { %6939 = vmatprep.mubr.bf16.mxu1 %v8607_v58 }
 0x357   : > { %6940 = vmatmul.mubr.bf16.gmra.mrb[28].mxu1 %v8605_v44  ;;  %p7804_p3 = pnand %p7803_p2, %p7797_p13 }
 0x358   : > { %6959 = vmatprep.mubr.bf16.mxu1 %v8529_v20 }
 0x35f   : > { %6960 = vmatmul.mubr.bf16.vlgmr.msra.gmra.mrb[32].mxu1 %v8527_v19 }
 0x360   : > { %6963 = vmatprep.mubr.bf16.mxu1 %v8559_v62  ;;  %6976 = vmatpush3.bf16.msra.mxu1 %v7491_v18 }
 0x361   : > { %6977 = vmatprep.subr.bf16.mxu1 %v7492_v43 }
 0x364   : > { %6978 = vmatpush3.bf16.msra.mxu1 %v7492_v43 }
 0x365   : > { %6979 = vmatprep.subr.bf16.mxu1 %v7493_v13 }
 0x367   : > { %6964 = vmatmul.mubr.bf16.gmra.mrb[36].mxu1 %v8557_v61 }
 0x368   : > { %6967 = vmatprep.mubr.bf16.mxu1 %v8589_v28  ;;  %6980 = vmatpush3.bf16.msra.mxu1 %v7493_v13 }
 0x369   : > { %6981 = vmatprep.subr.bf16.mxu1 %v7494_v45 }
 0x36c   : > { %6982 = vmatpush3.bf16.msra.mxu1 %v7494_v45 }
 0x36d   : > { %6983 = vmatprep.subr.bf16.mxu1 %v7495_v47 }
 0x36f   : > { %6968 = vmatmul.mubr.bf16.gmra.mrb[40].mxu1 %v8587_v25 }
 0x370   : > { %6971 = vmatprep.mubr.bf16.mxu1 %v8607_v58  ;;  %6984 = vmatpush3.bf16.msra.mxu1 %v7495_v47 }
 0x371   : > { %6985 = vmatprep.subr.bf16.mxu1 %v7496_v48 }
 0x374   : > { %6986 = vmatpush3.bf16.msra.mxu1 %v7496_v48 }
 0x375   : > { %6987 = vmatprep.subr.bf16.mxu1 %v7497_v50 }
 0x377   : > { %6972 = vmatmul.mubr.bf16.gmra.mrb[44].mxu1 %v8605_v44 }
 0x378   : > { %6988 = vmatpush3.bf16.msra.mxu1 %v7497_v50  ;;  %6991 = vmatprep.mubr.bf16.mxu1 %v8529_v20 }
 0x379   : > { %6989 = vmatprep.subr.bf16.mxu1 %v7498_v52 }
 0x37c   : > { %6990 = vmatpush3.bf16.msra.mxu1 %v7498_v52 }
 0x37d   : > { %7007 = vmatprep.subr.bf16.mxu1 %v7499_v54 }
 0x37f   : > { %6992 = vmatmul.mubr.bf16.vlgmr.msra.gmra.mrb[48].mxu1 %v8527_v19 }
 0x380   : > { %6995 = vmatprep.mubr.bf16.mxu1 %v8559_v62  ;;  %7008 = vmatpush3.bf16.msra.mxu1 %v7499_v54 }
 0x381   : > { %7009 = vmatprep.subr.bf16.mxu1 %v7500_v55 }
 0x384   : > { %7010 = vmatpush3.bf16.msra.mxu1 %v7500_v55 }
 0x385   : > { %7011 = vmatprep.subr.bf16.mxu1 %v7501_v57 }
 0x387   : > { %6996 = vmatmul.mubr.bf16.gmra.mrb[52].mxu1 %v8557_v61 }
 0x388   : > { %6999 = vmatprep.mubr.bf16.mxu1 %v8589_v28  ;;  %7012 = vmatpush3.bf16.msra.mxu1 %v7501_v57 }
 0x389   : > { %7013 = vmatprep.subr.bf16.mxu1 %v7502_v59 }
 0x38c   : > { %7014 = vmatpush3.bf16.msra.mxu1 %v7502_v59 }
 0x38d   : > { %7015 = vmatprep.subr.bf16.mxu1 %v7503_v1 }
 0x38f   : > { %7000 = vmatmul.mubr.bf16.gmra.mrb[56].mxu1 %v8587_v25 }
 0x390   : > { %7003 = vmatprep.mubr.bf16.mxu1 %v8607_v58  ;;  %7016 = vmatpush3.bf16.msra.mxu1 %v7503_v1 }
 0x391   : > { %7017 = vmatprep.subr.bf16.mxu1 %v7504_v3 }
 0x394   : > { %7018 = vmatpush3.bf16.msra.mxu1 %v7504_v3 }
 0x395   : > { %7019 = vmatprep.subr.bf16.mxu1 %v7505_v5 }
 0x397   : > { %7004 = vmatmul.mubr.bf16.gmra.mrb[60].mxu1 %v8605_v44 }
 0x398   : > { %7020 = vmatpush3.bf16.msra.mxu1 %v7505_v5  ;;  %7023 = vmatprep.mubr.bf16.mxu1 %v8529_v20 }
 0x399   : > { %7021 = vmatprep.subr.bf16.mxu1 %v7506_v6 }
 0x39c   : > { %7022 = vmatpush3.bf16.msra.mxu1 %v7506_v6 }
 0x39d   : > { %7039 = vmatprep.subr.bf16.mxu1 %v7507_v46 }
 0x39f   : > { %7024 = vmatmul.mubr.bf16.vlgmr.msra.gmra.mrb[64].mxu1 %v8527_v19 }
 0x3a0   : > { %7027 = vmatprep.mubr.bf16.mxu1 %v8559_v62  ;;  %7040 = vmatpush3.bf16.msra.mxu1 %v7507_v46 }
 0x3a1   : > { %7041 = vmatprep.subr.bf16.mxu1 %v7508_v49 }
 0x3a4   : > { %7042 = vmatpush3.bf16.msra.mxu1 %v7508_v49 }
 0x3a5   : > { %7043 = vmatprep.subr.bf16.mxu1 %v7509_v51 }
 0x3a7   : > { %7028 = vmatmul.mubr.bf16.gmra.mrb[68].mxu1 %v8557_v61 }
 0x3a8   : > { %7031 = vmatprep.mubr.bf16.mxu1 %v8589_v28  ;;  %7044 = vmatpush3.bf16.msra.mxu1 %v7509_v51 }
 0x3a9   : > { %7045 = vmatprep.subr.bf16.mxu1 %v7510_v8 }
 0x3ac   : > { %7046 = vmatpush3.bf16.msra.mxu1 %v7510_v8 }
 0x3ad   : > { %7047 = vmatprep.subr.bf16.mxu1 %v7511_v10 }
 0x3af   : > { %7032 = vmatmul.mubr.bf16.gmra.mrb[72].mxu1 %v8587_v25 }
 0x3b0   : > { %7035 = vmatprep.mubr.bf16.mxu1 %v8607_v58  ;;  %7048 = vmatpush3.bf16.msra.mxu1 %v7511_v10 }
 0x3b1   : > { %7049 = vmatprep.subr.bf16.mxu1 %v7512_v12 }
 0x3b4   : > { %7050 = vmatpush3.bf16.msra.mxu1 %v7512_v12 }
 0x3b5   : > { %7051 = vmatprep.subr.bf16.mxu1 %v7513_v53 }
 0x3b7   : > { %7036 = vmatmul.mubr.bf16.gmra.mrb[76].mxu1 %v8605_v44 }
 0x3b8   : > { %7052 = vmatpush3.bf16.msra.mxu1 %v7513_v53  ;;  %7055 = vmatprep.mubr.bf16.mxu1 %v8529_v20 }
 0x3b9   : > { %7053 = vmatprep.subr.bf16.mxu1 %v7514_v56 }
 0x3bc   : > { %7054 = vmatpush3.bf16.msra.mxu1 %v7514_v56 }
 0x3bf   : > { %7056 = vmatmul.mubr.bf16.vlgmr.msra.gmra.mrb[80].mxu1 %v8527_v19 }
 0x3c0   : > { %7059 = vmatprep.mubr.bf16.mxu1 %v8559_v62 }
 0x3c7   : > { %7060 = vmatmul.mubr.bf16.gmra.mrb[84].mxu1 %v8557_v61 }
 0x3c8   : > { %7063 = vmatprep.mubr.bf16.mxu1 %v8589_v28 }
 0x3cf   : > { %7064 = vmatmul.mubr.bf16.gmra.mrb[88].mxu1 %v8587_v25 }
 0x3d0   : > { %7067 = vmatprep.mubr.bf16.mxu1 %v8607_v58 }
 0x3d7   : > { %7068 = vmatmul.mubr.bf16.gmra.mrb[92].mxu1 %v8605_v44 }
 0x3d8   : > { %7087 = vmatprep.mubr.bf16.mxu1 %v7515_v22 }
 0x3fa   : > { %v6929_v60 = vpop.f32.mrb[16].mxu1 }
 0x3fb   : > { %v2501_v63 = vpop.f32.mrb[17].mxu1 }
 0x3fc   : > { %v6930_v2 = vpop.f32.mrb[18].mxu1 }
 0x3fd   : > { %v2504_v20 = vpop.f32.mrb[19].mxu1 }
 0x40a   : > { %v6933_v4 = vpop.f32.mrb[20].mxu1 }
 0x40b   : > { %v2517_v7 = vpop.f32.mrb[21].mxu1 }
 0x40c   : > { %v6934_v9 = vpop.f32.mrb[22].mxu1 }
 0x40d   : > { %v2520_v19 = vpop.f32.mrb[23].mxu1 }
 0x41a   : > { %v6937_v11 = vpop.f32.mrb[24].mxu1 }
 0x41b   : > { %v2533_v62 = vpop.f32.mrb[25].mxu1 }
 0x41c   : > { %v6938_v14 = vpop.f32.mrb[26].mxu1 }
 0x41d   : > { %v8712_v61 = vpop.f32.mrb[27].mxu1 }
 0x42a   : > { %v8714_v16 = vpop.f32.mrb[28].mxu1 }
 0x42b   : > { %v8716_v18 = vpop.f32.mrb[29].mxu1 }
 0x42c   : > { %v8718_v21 = vpop.f32.mrb[30].mxu1 }
 0x42d   : > { %v8720_v23 = vpop.f32.mrb[31].mxu1 }
 0x432   : > { %v6961_v25 = vpop.f32.mrb[32].mxu1 }
 0x433   : > { %v2728_v28 = vmax.f32 %v6929_v60, %v6961_v25  ;;  %v2663_v30 = vpop.f32.mrb[33].mxu1 }
 0x434   : > { %v2726_v32 = vmax.f32 %v2501_v63, %v2663_v30  ;;  %v6962_v35 = vpop.f32.mrb[34].mxu1 }
 0x435   : > { %v2729_v37 = vmax.f32 %v6930_v2, %v6962_v35  ;;  %v2666_v15 = vpop.f32.mrb[35].mxu1 }
 0x436   : > { %v2727_v17 = vmax.f32 %v2504_v20, %v2666_v15 }
 0x43a   : > { %v6965_v24 = vpop.f32.mrb[36].mxu1 }
 0x43b   : > { %v2732_v26 = vmax.f32 %v6933_v4, %v6965_v24  ;;  %v2679_v27 = vpop.f32.mrb[37].mxu1 }
 0x43c   : > { %v2730_v29 = vmax.f32 %v2517_v7, %v2679_v27  ;;  %v6966_v31 = vpop.f32.mrb[38].mxu1 }
 0x43d   : > { %v2733_v33 = vmax.f32 %v6934_v9, %v6966_v31  ;;  %v2682_v34 = vpop.f32.mrb[39].mxu1 }
 0x43e   : > { %v2731_v36 = vmax.f32 %v2520_v19, %v2682_v34 }
 0x442   : > { %v6969_v38 = vpop.f32.mrb[40].mxu1 }
 0x443   : > { %v2736_v39 = vmax.f32 %v6937_v11, %v6969_v38  ;;  %v2695_v40 = vpop.f32.mrb[41].mxu1 }
 0x444   : > { %v2734_v41 = vmax.f32 %v2533_v62, %v2695_v40  ;;  %v6970_v42 = vpop.f32.mrb[42].mxu1 }
 0x445   : > { %v2737_v44 = vmax.f32 %v6938_v14, %v6970_v42  ;;  %v2698_v58 = vpop.f32.mrb[43].mxu1 }
 0x446   : > { %v2735_v43 = vmax.f32 %v8712_v61, %v2698_v58 }
 0x44a   : > { %v6973_v13 = vpop.f32.mrb[44].mxu1 }
 0x44b   : > { %v2740_v45 = vmax.f32 %v8714_v16, %v6973_v13  ;;  %v2711_v47 = vpop.f32.mrb[45].mxu1 }
 0x44c   : > { %v2738_v48 = vmax.f32 %v8716_v18, %v2711_v47  ;;  %v6974_v50 = vpop.f32.mrb[46].mxu1 }
 0x44d   : > { %v2741_v52 = vmax.f32 %v8718_v21, %v6974_v50  ;;  %v2714_v54 = vpop.f32.mrb[47].mxu1 }
 0x44e   : > { %v2739_v55 = vmax.f32 %v8720_v23, %v2714_v54 }
 0x452   : > { %v6993_v57 = vpop.f32.mrb[48].mxu1 }
 0x453   : > { %v8730_v59 = vmax.f32 %v2728_v28, %v6993_v57  ;;  %v2841_v1 = vpop.f32.mrb[49].mxu1 }
 0x454   : > { %v8732_v3 = vmax.f32 %v2726_v32, %v2841_v1  ;;  %v6994_v5 = vpop.f32.mrb[50].mxu1 }
 0x455   : > { %v8734_v6 = vmax.f32 %v2729_v37, %v6994_v5  ;;  %v2844_v46 = vpop.f32.mrb[51].mxu1 }
 0x456   : > { %v8736_v49 = vmax.f32 %v2727_v17, %v2844_v46 }
 0x45a   : > { %v6997_v51 = vpop.f32.mrb[52].mxu1 }
 0x45b   : > { %v8738_v8 = vmax.f32 %v2732_v26, %v6997_v51  ;;  %v2857_v10 = vpop.f32.mrb[53].mxu1 }
 0x45c   : > { %v8740_v12 = vmax.f32 %v2730_v29, %v2857_v10  ;;  %v6998_v53 = vpop.f32.mrb[54].mxu1 }
 0x45d   : > { %v8742_v56 = vmax.f32 %v2733_v33, %v6998_v53  ;;  %v2860_v60 = vpop.f32.mrb[55].mxu1 }
 0x45e   : > { %v8744_v63 = vmax.f32 %v2731_v36, %v2860_v60 }
 0x462   : > { %v7001_v2 = vpop.f32.mrb[56].mxu1 }
 0x463   : > { %v8746_v20 = vmax.f32 %v2736_v39, %v7001_v2  ;;  %v2873_v4 = vpop.f32.mrb[57].mxu1 }
 0x464   : > { %v8748_v7 = vmax.f32 %v2734_v41, %v2873_v4  ;;  %v7002_v9 = vpop.f32.mrb[58].mxu1 }
 0x465   : > { %v8750_v19 = vmax.f32 %v2737_v44, %v7002_v9  ;;  %v2876_v11 = vpop.f32.mrb[59].mxu1 }
 0x466   : > { %v8752_v62 = vmax.f32 %v2735_v43, %v2876_v11 }
 0x46a   : > { %v7005_v14 = vpop.f32.mrb[60].mxu1 }
 0x46b   : > { %v8754_v61 = vmax.f32 %v2740_v45, %v7005_v14  ;;  %v2889_v16 = vpop.f32.mrb[61].mxu1 }
 0x46c   : > { %v8756_v18 = vmax.f32 %v2738_v48, %v2889_v16  ;;  %v7006_v21 = vpop.f32.mrb[62].mxu1 }
 0x46d   : > { %v8758_v23 = vmax.f32 %v2741_v52, %v7006_v21  ;;  %v2892_v25 = vpop.f32.mrb[63].mxu1 }
 0x46e   : > { %v8760_v28 = vmax.f32 %v2739_v55, %v2892_v25 }
 0x472   : > { %v7025_v30 = vpop.f32.mrb[64].mxu1 }
 0x473   : > { %v3084_v32 = vmax.f32 %v8730_v59, %v7025_v30  ;;  %v3019_v35 = vpop.f32.mrb[65].mxu1 }
 0x474   : > { %v3082_v37 = vmax.f32 %v8732_v3, %v3019_v35  ;;  %v7026_v15 = vpop.f32.mrb[66].mxu1 }
 0x475   : > { %v3085_v17 = vmax.f32 %v8734_v6, %v7026_v15  ;;  %v3022_v22 = vpop.f32.mrb[67].mxu1 }
 0x476   : > { %v3083_v24 = vmax.f32 %v8736_v49, %v3022_v22 }
 0x47a   : > { %v7029_v26 = vpop.f32.mrb[68].mxu1 }
 0x47b   : > { %v3088_v27 = vmax.f32 %v8738_v8, %v7029_v26  ;;  %v3035_v29 = vpop.f32.mrb[69].mxu1 }
 0x47c   : > { %v3086_v31 = vmax.f32 %v8740_v12, %v3035_v29  ;;  %v7030_v33 = vpop.f32.mrb[70].mxu1  ;;  %v7517_v29 = vld [vmem:[%s9560_s5 + $0x10] sm:$0xff]  }
 0x47d   : > { %v3089_v34 = vmax.f32 %v8742_v56, %v7030_v33  ;;  %v3038_v36 = vpop.f32.mrb[71].mxu1  ;;  %v7519_v33 = vld [vmem:[%s9560_s5 + $0x20] sm:$0xff]  }
 0x47e   : > { %v3087_v38 = vmax.f32 %v8744_v63, %v3038_v36  ;;  %v7521_v36 = vld [vmem:[%s9560_s5 + $0x30] sm:$0xff]  }
 0x482   : > { %v7033_v39 = vpop.f32.mrb[72].mxu1 }
 0x483   : > { %v3092_v40 = vmax.f32 %v8746_v20, %v7033_v39  ;;  %v3051_v41 = vpop.f32.mrb[73].mxu1  ;;  %v7523_v39 = vld [vmem:[%s9560_s5 + $0x40] sm:$0xff]  }
 0x484   : > { %v3090_v42 = vmax.f32 %v8748_v7, %v3051_v41  ;;  %v7034_v44 = vpop.f32.mrb[74].mxu1  ;;  %v7525_v41 = vld [vmem:[%s9560_s5 + $0x50] sm:$0xff]  }
 0x485   : > { %v3093_v58 = vmax.f32 %v8750_v19, %v7034_v44  ;;  %v3054_v43 = vpop.f32.mrb[75].mxu1  ;;  %v7527_v44 = vld [vmem:[%s9560_s5 + $0x60] sm:$0xff]  }
 0x486   : > { %v3091_v13 = vmax.f32 %v8752_v62, %v3054_v43  ;;  %v7529_v43 = vld [vmem:[%s9560_s5 + $0x70] sm:$0xff]  }
 0x48a   : > { %v7037_v45 = vpop.f32.mrb[76].mxu1 }
 0x48b   : > { %v3096_v47 = vmax.f32 %v8754_v61, %v7037_v45  ;;  %v3067_v48 = vpop.f32.mrb[77].mxu1  ;;  %v7531_v45 = vld [vmem:[%s9560_s5 + $0x80] sm:$0xff]  }
 0x48c   : > { %v3094_v50 = vmax.f32 %v8756_v18, %v3067_v48  ;;  %v7038_v52 = vpop.f32.mrb[78].mxu1  ;;  %v7533_v48 = vld [vmem:[%s9560_s5 + $0x90] sm:$0xff]  }
 0x48d   : > { %v3097_v54 = vmax.f32 %v8758_v23, %v7038_v52  ;;  %v3070_v55 = vpop.f32.mrb[79].mxu1  ;;  %v7535_v52 = vld [vmem:[%s9562_s7] sm:$0xff]  }
 0x48e   : > { %v3095_v57 = vmax.f32 %v8760_v28, %v3070_v55  ;;  %7159 = vmatprep.subr.bf16.mxu0 %v7535_v52  ;;  %v7542_v55 = vld [vmem:[%s9562_s7 + $0x8] sm:$0xff]  }
 0x48f   : > { %7160 = vmatpush3.bf16.msra.mxu0 %v7535_v52 }
 0x490   : > { %7161 = vmatprep.subr.bf16.mxu0 %v7542_v55 }
 0x492   : > { %v7057_v59 = vpop.f32.mrb[80].mxu1 }
 0x493   : > { %v3262_v1 = vmax.f32 %v3084_v32, %v7057_v59  ;;  %v3197_v3 = vpop.f32.mrb[81].mxu1  ;;  %7162 = vmatpush3.bf16.msra.mxu0 %v7542_v55  ;;  %v7544_v59 = vld [vmem:[%s9562_s7 + $0x18] sm:$0xff]  }
 0x494   : > { %v3260_v5 = vmax.f32 %v3082_v37, %v3197_v3  ;;  %v7058_v6 = vpop.f32.mrb[82].mxu1 }
 0x495   : > { %v3263_v46 = vmax.f32 %v3085_v17, %v7058_v6  ;;  %v3200_v49 = vpop.f32.mrb[83].mxu1 }
 0x496   : > { %v3261_v51 = vmax.f32 %v3083_v24, %v3200_v49 }
 0x497   : > { %v3317_v8 = vpack.c.bf16 %v3263_v46, %v3262_v1 }
 0x498   : > { %v3316_v10 = vpack.c.bf16 %v3261_v51, %v3260_v5 }
 0x49a   : > { %v7061_v12 = vpop.f32.mrb[84].mxu1  ;;  %7071 = vmatprep.subr.bf16.mxu1 %v3316_v10 }
 0x49b   : > { %v3266_v53 = vmax.f32 %v3088_v27, %v7061_v12  ;;  %v3213_v56 = vpop.f32.mrb[85].mxu1  ;;  %7072 = vmatpush3.bf16.msra.mxu1 %v3316_v10  ;;  %v7516_v27 = vld [vmem:[%s9560_s5 + $0x8] sm:$0xff]  }
 0x49c   : > { %v3264_v60 = vmax.f32 %v3086_v31, %v3213_v56  ;;  %v7062_v63 = vpop.f32.mrb[86].mxu1  ;;  %7073 = vmatprep.subr.bf16.mxu1 %v3317_v8  ;;  %v7518_v31 = vld [vmem:[%s9560_s5 + $0x18] sm:$0xff]  }
 0x49d   : > { %v3267_v2 = vmax.f32 %v3089_v34, %v7062_v63  ;;  %v3216_v20 = vpop.f32.mrb[87].mxu1  ;;  %v7520_v34 = vld [vmem:[%s9560_s5 + $0x28] sm:$0xff]  }
 0x49e   : > { %v3265_v4 = vmax.f32 %v3087_v38, %v3216_v20  ;;  %v7522_v38 = vld [vmem:[%s9560_s5 + $0x38] sm:$0xff]  }
 0x49f   : > { %v3319_v7 = vpack.c.bf16 %v3267_v2, %v3266_v53  ;;  %7074 = vmatpush3.bf16.msra.mxu1 %v3317_v8 }
 0x4a0   : > { %v3318_v9 = vpack.c.bf16 %v3265_v4, %v3264_v60 }
 0x4a2   : > { %v7065_v19 = vpop.f32.mrb[88].mxu1  ;;  %7075 = vmatprep.subr.bf16.mxu1 %v3318_v9 }
 0x4a3   : > { %v3270_v11 = vmax.f32 %v3092_v40, %v7065_v19  ;;  %v3229_v62 = vpop.f32.mrb[89].mxu1  ;;  %7076 = vmatpush3.bf16.msra.mxu1 %v3318_v9  ;;  %v7524_v40 = vld [vmem:[%s9560_s5 + $0x48] sm:$0xff]  }
 0x4a4   : > { %v3268_v14 = vmax.f32 %v3090_v42, %v3229_v62  ;;  %v7066_v61 = vpop.f32.mrb[90].mxu1  ;;  %7077 = vmatprep.subr.bf16.mxu1 %v3319_v7  ;;  %v7526_v42 = vld [vmem:[%s9560_s5 + $0x58] sm:$0xff]  }
 0x4a5   : > { %v3271_v16 = vmax.f32 %v3093_v58, %v7066_v61  ;;  %v3232_v18 = vpop.f32.mrb[91].mxu1  ;;  %v7528_v58 = vld [vmem:[%s9560_s5 + $0x68] sm:$0xff]  }
 0x4a6   : > { %v3269_v21 = vmax.f32 %v3091_v13, %v3232_v18  ;;  %v7530_v13 = vld [vmem:[%s9560_s5 + $0x78] sm:$0xff]  }
 0x4a7   : > { %v3321_v23 = vpack.c.bf16 %v3271_v16, %v3270_v11  ;;  %7078 = vmatpush3.bf16.msra.mxu1 %v3319_v7 }
 0x4a8   : > { %v3320_v25 = vpack.c.bf16 %v3269_v21, %v3268_v14 }
 0x4aa   : > { %v7069_v28 = vpop.f32.mrb[92].mxu1  ;;  %7079 = vmatprep.subr.bf16.mxu1 %v3320_v25 }
 0x4ab   : > { %v3274_v30 = vmax.f32 %v3096_v47, %v7069_v28  ;;  %v3245_v32 = vpop.f32.mrb[93].mxu1  ;;  %7080 = vmatpush3.bf16.msra.mxu1 %v3320_v25  ;;  %v7532_v47 = vld [vmem:[%s9560_s5 + $0x88] sm:$0xff]  }
 0x4ac   : > { %v3272_v35 = vmax.f32 %v3094_v50, %v3245_v32  ;;  %v7070_v37 = vpop.f32.mrb[94].mxu1  ;;  %7081 = vmatprep.subr.bf16.mxu1 %v3321_v23  ;;  %v7534_v50 = vld [vmem:[%s9560_s5 + $0x98] sm:$0xff]  }
 0x4ad   : > { %v3275_v15 = vmax.f32 %v3097_v54, %v7070_v37  ;;  %v3248_v17 = vpop.f32.mrb[95].mxu1  ;;  %v7536_v54 = vld [vmem:[%s9561_s6] sm:$0xff]  }
 0x4ae   : > { %v3273_v22 = vmax.f32 %v3095_v57, %v3248_v17  ;;  %v7543_v57 = vld [vmem:[%s9562_s7 + $0x10] sm:$0xff]  }
 0x4af   : > { %v3323_v24 = vpack.c.bf16 %v3275_v15, %v3274_v30  ;;  %7082 = vmatpush3.bf16.msra.mxu1 %v3321_v23  ;;  %7163 = vmatprep.subr.bf16.mxu0 %v7543_v57 }
 0x4b0   : > { %v3322_v26 = vpack.c.bf16 %v3273_v22, %v3272_v35  ;;  %7164 = vmatpush3.bf16.msra.mxu0 %v7543_v57 }
 0x4b1   : > { %7165 = vmatprep.subr.bf16.mxu0 %v7544_v59 }
 0x4b2   : > { %7083 = vmatprep.subr.bf16.mxu1 %v3322_v26 }
 0x4b3   : > { %7084 = vmatpush3.bf16.msra.mxu1 %v3322_v26 }
 0x4b4   : > { %7085 = vmatprep.subr.bf16.mxu1 %v3323_v24  ;;  %7166 = vmatpush3.bf16.msra.mxu0 %v7544_v59 }
 0x4b7   : > { %7086 = vmatpush3.bf16.msra.mxu1 %v3323_v24 }
 0x4ba   : > { %7088 = vmatmul.mubr.bf16.vlgmr.msra.gmra.mrb[96].mxu1 %v7516_v27 }
 0x4bb   : > { %7091 = vmatprep.mubr.bf16.mxu1 %v7517_v29 }
 0x4c2   : > { %7092 = vmatmul.mubr.bf16.gmra.mrb[100].mxu1 %v7518_v31 }
 0x4c3   : > { %7095 = vmatprep.mubr.bf16.mxu1 %v7519_v33 }
 0x4ca   : > { %7096 = vmatmul.mubr.bf16.gmra.mrb[104].mxu1 %v7520_v34 }
 0x4cb   : > { %7099 = vmatprep.mubr.bf16.mxu1 %v7521_v36 }
 0x4d2   : > { %7100 = vmatmul.mubr.bf16.gmra.mrb[108].mxu1 %v7522_v38 }
 0x4d3   : > { %7103 = vmatprep.mubr.bf16.mxu1 %v7523_v39 }
 0x4da   : > { %7104 = vmatmul.mubr.bf16.gmra.mrb[112].mxu1 %v7524_v40 }
 0x4db   : > { %7107 = vmatprep.mubr.bf16.mxu1 %v7525_v41 }
 0x4e2   : > { %7108 = vmatmul.mubr.bf16.gmra.mrb[116].mxu1 %v7526_v42 }
 0x4e3   : > { %7111 = vmatprep.mubr.bf16.mxu1 %v7527_v44 }
 0x4ea   : > { %7112 = vmatmul.mubr.bf16.gmra.mrb[120].mxu1 %v7528_v58 }
 0x4eb   : > { %7115 = vmatprep.mubr.bf16.mxu1 %v7529_v43 }
 0x4f2   : > { %7116 = vmatmul.mubr.bf16.gmra.mrb[124].mxu1 %v7530_v13 }
 0x4f3   : > { %7119 = vmatprep.mubr.bf16.mxu1 %v7531_v45 }
 0x4fa   : > { %7120 = vmatmul.mubr.bf16.gmra.mrb[128].mxu1 %v7532_v47 }
 0x4fb   : > { %7123 = vmatprep.mubr.bf16.mxu1 %v7533_v48 }
 0x502   : > { %7124 = vmatmul.mubr.bf16.gmra.mrb[132].mxu1 %v7534_v50 }
 0x503   : > { %7135 = vmatprep.mubr.msk.bf16.mxu1 %vm1539_vm0, %v7536_v54 }
 0x58d   : > { %v7089_v1 = vpop.f32.mrb[96].mxu1 }
 0x58e   : > { %v3478_v3 = vpop.f32.mrb[97].mxu1 }
 0x58f   : > { %v7090_v5 = vpop.f32.mrb[98].mxu1 }
 0x590   : > { %v3481_v6 = vpop.f32.mrb[99].mxu1 }
 0x595   : > { %v7093_v46 = vpop.f32.mrb[100].mxu1 }
 0x596   : > { %v3494_v49 = vpop.f32.mrb[101].mxu1 }
 0x597   : > { %v7094_v51 = vpop.f32.mrb[102].mxu1 }
 0x598   : > { %v3497_v8 = vpop.f32.mrb[103].mxu1 }
 0x59d   : > { %v7097_v10 = vpop.f32.mrb[104].mxu1 }
 0x59e   : > { %v3639_v12 = vmax.f32 %v7089_v1, %v7097_v10  ;;  %v3510_v53 = vpop.f32.mrb[105].mxu1 }
 0x59f   : > { %v3637_v56 = vmax.f32 %v3478_v3, %v3510_v53  ;;  %v7098_v60 = vpop.f32.mrb[106].mxu1 }
 0x5a0   : > { %v3640_v63 = vmax.f32 %v7090_v5, %v7098_v60  ;;  %v3513_v2 = vpop.f32.mrb[107].mxu1 }
 0x5a1   : > { %v3638_v20 = vmax.f32 %v3481_v6, %v3513_v2  ;;  %v7538_v2 = vld [vmem:[%s9561_s6 + $0x10] sm:$0xff]  }
 0x5a5   : > { %v7101_v4 = vpop.f32.mrb[108].mxu1 }
 0x5a6   : > { %v3643_v7 = vmax.f32 %v7093_v46, %v7101_v4  ;;  %v3526_v9 = vpop.f32.mrb[109].mxu1  ;;  %v7540_v4 = vld [vmem:[%s9561_s6 + $0x20] sm:$0xff]  }
 0x5a7   : > { %v3641_v19 = vmax.f32 %v3494_v49, %v3526_v9  ;;  %v7102_v11 = vpop.f32.mrb[110].mxu1  ;;  %v7545_v9 = vld [vmem:[%s9562_s7 + $0x20] sm:$0xff]  }
 0x5a8   : > { %v3644_v62 = vmax.f32 %v7094_v51, %v7102_v11  ;;  %v3529_v14 = vpop.f32.mrb[111].mxu1  ;;  %v7546_v11 = vld [vmem:[%s9562_s7 + $0x40] sm:$0xff]  }
 0x5a9   : > { %v3642_v61 = vmax.f32 %v3497_v8, %v3529_v14  ;;  %7171 = vmatprep.subr.bf16.mxu0 %v7546_v11  ;;  %v7551_v14 = vld [vmem:[%s9562_s7 + $0x38] sm:$0xff]  }
 0x5ad   : > { %v7105_v16 = vpop.f32.mrb[112].mxu1 }
 0x5ae   : > { %v3647_v18 = vmax.f32 %v3639_v12, %v7105_v16  ;;  %v3542_v21 = vpop.f32.mrb[113].mxu1 }
 0x5af   : > { %v3645_v23 = vmax.f32 %v3637_v56, %v3542_v21  ;;  %v7106_v25 = vpop.f32.mrb[114].mxu1 }
 0x5b0   : > { %v3648_v28 = vmax.f32 %v3640_v63, %v7106_v25  ;;  %v3545_v30 = vpop.f32.mrb[115].mxu1  ;;  %v7537_v63 = vld [vmem:[%s9561_s6 + $0x8] sm:$0xff]  }
 0x5b1   : > { %v3646_v32 = vmax.f32 %v3638_v20, %v3545_v30  ;;  %v7539_v20 = vld [vmem:[%s9561_s6 + $0x18] sm:$0xff]  }
 0x5b5   : > { %v7109_v35 = vpop.f32.mrb[116].mxu1 }
 0x5b6   : > { %v3651_v37 = vmax.f32 %v3643_v7, %v7109_v35  ;;  %v3558_v15 = vpop.f32.mrb[117].mxu1  ;;  %v7541_v7 = vld [vmem:[%s9561_s6 + $0x28] sm:$0xff]   ;;  %v7550_v35 = vld [vmem:[%s9562_s7 + $0x50] sm:$0xff]  }
 0x5b7   : > { %v3649_v17 = vmax.f32 %v3641_v19, %v3558_v15  ;;  %v7110_v22 = vpop.f32.mrb[118].mxu1  ;;  %v7547_v19 = vld [vmem:[%s9562_s7 + $0x28] sm:$0xff]  }
 0x5b8   : > { %v3652_v24 = vmax.f32 %v3644_v62, %v7110_v22  ;;  %v3561_v26 = vpop.f32.mrb[119].mxu1  ;;  %v7549_v62 = vld [vmem:[%s9562_s7 + $0x30] sm:$0xff]  }
 0x5b9   : > { %v3650_v27 = vmax.f32 %v3642_v61, %v3561_v26 }
 0x5bd   : > { %v7113_v29 = vpop.f32.mrb[120].mxu1 }
 0x5be   : > { %v3655_v31 = vmax.f32 %v3647_v18, %v7113_v29  ;;  %v3574_v33 = vpop.f32.mrb[121].mxu1 }
 0x5bf   : > { %v3653_v34 = vmax.f32 %v3645_v23, %v3574_v33  ;;  %v7114_v36 = vpop.f32.mrb[122].mxu1 }
 0x5c0   : > { %v3656_v38 = vmax.f32 %v3648_v28, %v7114_v36  ;;  %v3577_v39 = vpop.f32.mrb[123].mxu1  ;;  %v7548_v28 = vld [vmem:[%s9562_s7 + $0x48] sm:$0xff]   ;;  %v7553_v36 = vld [vmem:[%s9564_s9] sm:$0xff]  }
 0x5c1   : > { %v3654_v40 = vmax.f32 %v3646_v32, %v3577_v39 }
 0x5c5   : > { %v7117_v41 = vpop.f32.mrb[124].mxu1 }
 0x5c6   : > { %v3659_v42 = vmax.f32 %v3651_v37, %v7117_v41  ;;  %v3590_v44 = vpop.f32.mrb[125].mxu1 }
 0x5c7   : > { %v3657_v58 = vmax.f32 %v3649_v17, %v3590_v44  ;;  %v7118_v43 = vpop.f32.mrb[126].mxu1  ;;  %v6280_v44 = vld [vmem:[%s9563_s8] ss:$0 sm:$0xff] }
 0x5c8   : > { %v3660_v13 = vmax.f32 %v3652_v24, %v7118_v43  ;;  %v3593_v45 = vpop.f32.mrb[127].mxu1  ;;  %v7552_v24 = vld [vmem:[%s9562_s7 + $0x58] sm:$0xff]  }
 0x5c9   : > { %v3658_v47 = vmax.f32 %v3650_v27, %v3593_v45 }
 0x5cd   : > { %v7121_v48 = vpop.f32.mrb[128].mxu1 }
 0x5ce   : > { %v3663_v50 = vmax.f32 %v3655_v31, %v7121_v48  ;;  %v3606_v52 = vpop.f32.mrb[129].mxu1 }
 0x5cf   : > { %v3661_v54 = vmax.f32 %v3653_v34, %v3606_v52  ;;  %v7122_v55 = vpop.f32.mrb[130].mxu1  ;;  %v6281_v52 = vld [vmem:[%s9563_s8 + $0x1] ss:$0 sm:$0xff] }
 0x5d0   : > { %v3664_v57 = vmax.f32 %v3656_v38, %v7122_v55  ;;  %v3609_v59 = vpop.f32.mrb[131].mxu1 }
 0x5d1   : > { %v3662_v1 = vmax.f32 %v3654_v40, %v3609_v59 }
 0x5d2   : > { %v3670_v3 = vpack.c.bf16 %v3664_v57, %v3663_v50 }
 0x5d3   : > { %v3669_v5 = vpack.c.bf16 %v3662_v1, %v3661_v54 }
 0x5d5   : > { %v7125_v6 = vpop.f32.mrb[132].mxu1  ;;  %7127 = vmatprep.subr.bf16.mxu1 %v3669_v5 }
 0x5d6   : > { %v3667_v46 = vmax.f32 %v3659_v42, %v7125_v6  ;;  %v3622_v49 = vpop.f32.mrb[133].mxu1  ;;  %7128 = vmatpush3.bf16.msra.mxu1 %v3669_v5 }
 0x5d7   : > { %v3665_v51 = vmax.f32 %v3657_v58, %v3622_v49  ;;  %v7126_v8 = vpop.f32.mrb[134].mxu1  ;;  %7129 = vmatprep.subr.bf16.mxu1 %v3670_v3 }
 0x5d8   : > { %v3668_v10 = vmax.f32 %v3660_v13, %v7126_v8  ;;  %v3625_v12 = vpop.f32.mrb[135].mxu1 }
 0x5d9   : > { %v3666_v53 = vmax.f32 %v3658_v47, %v3625_v12 }
 0x5da   : > { %v3672_v56 = vpack.c.bf16 %v3668_v10, %v3667_v46  ;;  %7130 = vmatpush3.bf16.msra.mxu1 %v3670_v3 }
 0x5db   : > { %v3671_v60 = vpack.c.bf16 %v3666_v53, %v3665_v51  ;;  %v6282_v51 = vld [vmem:[%s9563_s8 + $0x2] ss:$0 sm:$0xff] }
 0x5dd   : > { %7131 = vmatprep.subr.bf16.mxu1 %v3671_v60 }
 0x5de   : > { %7132 = vmatpush3.bf16.msra.mxu1 %v3671_v60 }
 0x5df   : > { %7133 = vmatprep.subr.bf16.mxu1 %v3672_v56 }
 0x5e2   : > { %7134 = vmatpush3.bf16.msra.mxu1 %v3672_v56 }
 0x5e3   : > { %7147 = vmatprep.subr.bf16.mxu1 %v7545_v9 }
 0x5e5   : > { %7136 = vmatmul.mubr.msk.bf16.vlgmr.msra.gmra.mrb[136].mxu1 %vm1539_vm0, %v7537_v63 }
 0x5e6   : > { %7139 = vmatprep.mubr.msk.bf16.mxu1 %vm1539_vm0, %v7538_v2  ;;  %7148 = vmatpush3.bf16.msra.mxu1 %v7545_v9  ;;  %v7559_v9 = vld [vmem:[%s9565_s10 + $0x80] ss:$8 sps:$4 sm:$0xff]  }
 0x5e7   : > { %7149 = vmatprep.subr.bf16.mxu1 %v7547_v19 }
 0x5ea   : > { %7150 = vmatpush3.bf16.msra.mxu1 %v7547_v19  ;;  %v7564_v19 = vld [vmem:[%s9565_s10 + $0x94] ss:$8 sps:$4 sm:$0xff]  }
 0x5eb   : > { %7151 = vmatprep.subr.bf16.mxu1 %v7549_v62 }
 0x5ed   : > { %7140 = vmatmul.mubr.msk.bf16.gmra.mrb[140].mxu1 %vm1539_vm0, %v7539_v20  ;;  %v7561_v20 = vld [vmem:[%s9565_s10 + $0x84] ss:$8 sps:$4 sm:$0xff]  }
 0x5ee   : > { %7143 = vmatprep.mubr.msk.bf16.mxu1 %vm1539_vm0, %v7540_v4  ;;  %7152 = vmatpush3.bf16.msra.mxu1 %v7549_v62  ;;  %v7554_v4 = vld [vmem:[%s9564_s9 + $0x8] sm:$0xff]  }
 0x5ef   : > { %7153 = vmatprep.subr.bf16.mxu1 %v7551_v14  ;;  %v7567_v62 = vld [vmem:[%s9565_s10 + $0xa4] ss:$8 sps:$4 sm:$0xff]  }
 0x5f2   : > { %7154 = vmatpush3.bf16.msra.mxu1 %v7551_v14  ;;  %v7556_v14 = vld [vmem:[%s9564_s9 + $0x18] sm:$0xff]  }
 0x5f5   : > { %7144 = vmatmul.mubr.msk.bf16.gmra.mrb[144].mxu1 %vm1539_vm0, %v7541_v7  ;;  %v7555_v7 = vld [vmem:[%s9564_s9 + $0x10] sm:$0xff]  }
 0x6b8   : > { %v7137_v61 = vpop.f32.mrb[136].mxu1 }
 0x6b9   : > { %v3767_v16 = vpop.f32.mrb[137].mxu1 }
 0x6ba   : > { %v7138_v18 = vpop.f32.mrb[138].mxu1 }
 0x6bb   : > { %v3815_v21 = vpack.c.bf16 %v7138_v18, %v7137_v61  ;;  %v3770_v23 = vpop.f32.mrb[139].mxu1  ;;  %v7557_v61 = vld [vmem:[%s9564_s9 + $0x20] sm:$0xff]   ;;  %v7570_v18 = vld [vmem:[%s9565_s10 + $0xb4] ss:$8 sps:$4 sm:$0xff]  }
 0x6bc   : > { %v3814_v25 = vpack.c.bf16 %v3770_v23, %v3767_v16  ;;  %v7565_v16 = vld [vmem:[%s9565_s10 + $0xa0] ss:$8 sps:$4 sm:$0xff]   ;;  %v7573_v23 = vld [vmem:[%s9565_s10 + $0xc4] ss:$8 sps:$4 sm:$0xff]  }
 0x6be   : > { %7167 = vmatprep.mubr.msk.bf16.mxu0 %vm1539_vm0, %v3814_v25  ;;  %v7558_v25 = vld [vmem:[%s9564_s9 + $0x28] sm:$0xff]  }
 0x6bf   : > { %7168 = vmatmul.mubr.msk.bf16.vlgmr.msra.gmra.mrb[160].mxu0 %vm1539_vm0, %v3815_v21  ;;  %v7568_v21 = vld [vmem:[%s9565_s10 + $0xb0] ss:$8 sps:$4 sm:$0xff]  }
 0x6c0   : > { %7172 = vmatpush3.bf16.msra.mxu0 %v7546_v11  ;;  %v7141_v30 = vpop.f32.mrb[140].mxu1  ;;  %v7562_v11 = vld [vmem:[%s9565_s10 + $0x90] ss:$8 sps:$4 sm:$0xff]  }
 0x6c1   : > { %7173 = vmatprep.subr.bf16.mxu0 %v7548_v28  ;;  %v3783_v32 = vpop.f32.mrb[141].mxu1 }
 0x6c2   : > { %v7142_v37 = vpop.f32.mrb[142].mxu1 }
 0x6c3   : > { %v3817_v15 = vpack.c.bf16 %v7142_v37, %v7141_v30  ;;  %v3786_v17 = vpop.f32.mrb[143].mxu1  ;;  %v7576_v30 = vld [vmem:[%s9565_s10 + $0xd4] ss:$8 sps:$4 sm:$0xff]   ;;  %v7579_v37 = vld [vmem:[%s9565_s10 + $0xe4] ss:$8 sps:$4 sm:$0xff]  }
 0x6c4   : > { %7174 = vmatpush3.bf16.msra.mxu0 %v7548_v28  ;;  %v3816_v22 = vpack.c.bf16 %v3786_v17, %v3783_v32  ;;  %v7571_v28 = vld [vmem:[%s9565_s10 + $0xc0] ss:$8 sps:$4 sm:$0xff]   ;;  %v7574_v32 = vld [vmem:[%s9565_s10 + $0xd0] ss:$8 sps:$4 sm:$0xff]  }
 0x6c5   : > { %7175 = vmatprep.subr.bf16.mxu0 %v7550_v35  ;;  %v7580_v17 = vld [vmem:[%s9565_s10 + $0xf0] ss:$8 sps:$4 sm:$0xff]  }
 0x6c6   : > { %7155 = vmatprep.mubr.msk.bf16.mxu1 %vm1539_vm0, %v3816_v22  ;;  %v7585_v22 = vld [vmem:[%s9565_s10 + $0x4] ss:$8 sps:$4 sm:$0xff]  }
 0x6c7   : > { %7156 = vmatmul.mubr.msk.bf16.vlgmr.msra.gmra.mrb[148].mxu1 %vm1539_vm0, %v3817_v15  ;;  %v7582_v15 = vld [vmem:[%s9565_s10 + $0xf4] ss:$8 sps:$4 sm:$0xff]  }
 0x6c8   : > { %v7145_v26 = vpop.f32.mrb[144].mxu1  ;;  %7176 = vmatpush3.bf16.msra.mxu0 %v7550_v35  ;;  %7187 = vmatprep.mubr.msk.bf16.mxu1 %vm4162_vm1, %v7553_v36  ;;  %v7577_v35 = vld [vmem:[%s9565_s10 + $0xe0] ss:$8 sps:$4 sm:$0xff]  }
 0x6c9   : > { %v3799_v27 = vpop.f32.mrb[145].mxu1  ;;  %7177 = vmatprep.subr.bf16.mxu0 %v7552_v24 }
 0x6ca   : > { %v7146_v29 = vpop.f32.mrb[146].mxu1 }
 0x6cb   : > { %v3819_v31 = vpack.c.bf16 %v7146_v29, %v7145_v26  ;;  %v3802_v33 = vpop.f32.mrb[147].mxu1 }
 0x6cc   : > { %v3818_v34 = vpack.c.bf16 %v3802_v33, %v3799_v27  ;;  %7178 = vmatpush3.bf16.msra.mxu0 %v7552_v24 }
 0x6ce   : > { %7179 = vmatprep.mubr.msk.bf16.mxu0 %vm1539_vm0, %v3818_v34 }
 0x6cf   : > { %7180 = vmatmul.mubr.msk.bf16.vlgmr.msra.gmra.mrb[160].mxu0 %vm1539_vm0, %v3819_v31 }
 0x6d0   : > { %4861 = vmatprep.mubr.bf16.mxu0 %v7858_v0 }
 0x79a   : > { %v7157_v38 = vpop.f32.mrb[148].mxu1 }
 0x79b   : > { %v3901_v39 = vpop.f32.mrb[149].mxu1 }
 0x79c   : > { %v7158_v40 = vpop.f32.mrb[150].mxu1 }
 0x79d   : > { %v3904_v41 = vpop.f32.mrb[151].mxu1 }
 0x7a2   : > { %v7181_v42 = vpop.f32.mrb[160].mxu0 }
 0x7a3   : > { %v7199_v58 = vadd.f32 %v7181_v42, %v7157_v38  ;;  %v4068_v43 = vpop.f32.mrb[161].mxu0 }
 0x7a4   : > { %v7200_v13 = vadd.f32 %v4068_v43, %v3901_v39  ;;  %v7182_v45 = vpop.f32.mrb[162].mxu0  ;;  %v7591_v43 = vld [vmem:[%s9565_s10 + $0x24] ss:$8 sps:$4 sm:$0xff]  }
 0x7a5   : > { %v4094_v47 = vadd.f32 %v7199_v58, %v6280_v44  ;;  %v7201_v48 = vadd.f32 %v7182_v45, %v7158_v40  ;;  %v4071_v50 = vpop.f32.mrb[163].mxu0  ;;  %v7586_v58 = vld [vmem:[%s9565_s10 + $0x10] ss:$8 sps:$4 sm:$0xff]  }
 0x7a6   : > { %v4092_v54 = vadd.f32 %v7200_v13, %v6280_v44  ;;  %v7202_v55 = vadd.f32 %v4071_v50, %v3904_v41  ;;  %v7583_v41 = vld [vmem:[%s9565_s10] ss:$8 sps:$4 sm:$0xff]  }
 0x7a7   : > { %v4098_v57 = vmax.f32 %v4094_v47, 0.0  ;;  %v4095_v59 = vadd.f32 %v7201_v48, %v6280_v44  ;;  %v7589_v48 = vld [vmem:[%s9565_s10 + $0x20] ss:$8 sps:$4 sm:$0xff]  }
 0x7a8   : > { %v4096_v1 = vmax.f32 %v4092_v54, 0.0  ;;  %v4093_v3 = vadd.f32 %v7202_v55, %v6280_v44  ;;  %v7588_v44 = vld [vmem:[%s9565_s10 + $0x14] ss:$8 sps:$4 sm:$0xff]  }
 0x7a9   : > { %v4108_v5 = vmul.f32 %v6281_v52, %v4098_v57  ;;  %v4099_v6 = vmax.f32 %v4095_v59, 0.0  ;;  %v7594_v54 = vld [vmem:[%s9565_s10 + $0x34] ss:$8 sps:$4 sm:$0xff]   ;;  %v7592_v57 = vld [vmem:[%s9565_s10 + $0x30] ss:$8 sps:$4 sm:$0xff]  }
 0x7aa   : > { %v4106_v46 = vmul.f32 %v6281_v52, %v4096_v1  ;;  %v4097_v49 = vmax.f32 %v4093_v3, 0.0  ;;  %v7597_v59 = vld [vmem:[%s9565_s10 + $0x44] ss:$8 sps:$4 sm:$0xff]   ;;  %v7595_v1 = vld [vmem:[%s9565_s10 + $0x40] ss:$8 sps:$4 sm:$0xff]  }
 0x7ab   : > { %v4109_v8 = vmul.f32 %v6281_v52, %v4099_v6  ;;  %v4116_v12 = vadd.f32 %v6282_v51, %v4108_v5  ;;  %v7600_v3 = vld [vmem:[%s9565_s10 + $0x54] ss:$8 sps:$4 sm:$0xff]   ;;  %v7598_v5 = vld [vmem:[%s9565_s10 + $0x50] ss:$8 sps:$4 sm:$0xff]   ;;  %v7603_v6 = vld [vmem:[%s9565_s10 + $0x64] ss:$8 sps:$4 sm:$0xff]  }
 0x7ac   : > { %v4107_v10 = vmul.f32 %v6281_v52, %v4097_v49  ;;  %v4114_v56 = vadd.f32 %v6282_v51, %v4106_v46  ;;  %v7601_v46 = vld [vmem:[%s9565_s10 + $0x60] ss:$8 sps:$4 sm:$0xff]   ;;  %v7606_v49 = vld [vmem:[%s9565_s10 + $0x74] ss:$8 sps:$4 sm:$0xff]  }
 0x7ad   : > { %v4117_v53 = vadd.f32 %v6282_v51, %v4109_v8  ;;  %v7609_v8 = vld [vmem:[%s9565_s10 + $0x104] ss:$8 sps:$4 sm:$0xff]  }
 0x7ae   : > { %v4115_v60 = vadd.f32 %v6282_v51, %v4107_v10  ;;  %v7604_v51 = vld [vmem:[%s9565_s10 + $0x70] ss:$8 sps:$4 sm:$0xff]   ;;  %v7607_v10 = vld [vmem:[%s9565_s10 + $0x100] ss:$8 sps:$4 sm:$0xff]  }
 0x7af   : > { %v4119_v63 = vpack.c.bf16 %v4117_v53, %v4116_v12  ;;  %v7612_v12 = vld [vmem:[%s9565_s10 + $0x114] ss:$8 sps:$4 sm:$0xff]   ;;  %v7610_v53 = vld [vmem:[%s9565_s10 + $0x110] ss:$8 sps:$4 sm:$0xff]  }
 0x7b0   : > { %v4118_v2 = vpack.c.bf16 %v4115_v60, %v4114_v56  ;;  %v7615_v56 = vld [vmem:[%s9565_s10 + $0x124] ss:$8 sps:$4 sm:$0xff]   ;;  %v7613_v60 = vld [vmem:[%s9565_s10 + $0x120] ss:$8 sps:$4 sm:$0xff]  }
 0x7b2   : > { %7183 = vmatprep.subr.bf16.mxu1 %v4118_v2 }
 0x7b3   : > { %7184 = vmatpush3.bf16.msra.mxu1 %v4118_v2  ;;  %v7616_v2 = vld [vmem:[%s9565_s10 + $0x130] ss:$8 sps:$4 sm:$0xff]  }
 0x7b4   : > { %7185 = vmatprep.subr.bf16.mxu1 %v4119_v63 }
 0x7b7   : > { %7186 = vmatpush3.bf16.msra.mxu1 %v4119_v63  ;;  %v7618_v63 = vld [vmem:[%s9565_s10 + $0x134] ss:$8 sps:$4 sm:$0xff]  }
 0x7b8   : > { %4381 = vmatprep.subr.bf16.mxu1 %v7561_v20  ;;  %v7621_v20 = vld [vmem:[%s9565_s10 + $0x144] ss:$8 sps:$4 sm:$0xff]  }
 0x7ba   : > { %7188 = vmatmul.mubr.msk.bf16.vlgmr.msra.gmra.mrb[152].mxu1 %vm4162_vm1, %v7554_v4  ;;  %v7619_v4 = vld [vmem:[%s9565_s10 + $0x140] ss:$8 sps:$4 sm:$0xff]  }
 0x7bb   : > { %7191 = vmatprep.mubr.msk.bf16.mxu1 %vm4162_vm1, %v7555_v7  ;;  %4382 = vmatpush1.bf16.msra.mxu1 %v7559_v9  ;;  %v7624_v7 = vld [vmem:[%s9565_s10 + $0x154] ss:$8 sps:$4 sm:$0xff]   ;;  %v7622_v9 = vld [vmem:[%s9565_s10 + $0x150] ss:$8 sps:$4 sm:$0xff]  }
 0x7bc   : > { %4383 = vmatprep.subr.bf16.mxu1 %v7564_v19  ;;  %v7627_v19 = vld [vmem:[%s9565_s10 + $0x164] ss:$8 sps:$4 sm:$0xff]  }
 0x7bf   : > { %4384 = vmatpush1.bf16.msra.mxu1 %v7562_v11  ;;  %v7625_v11 = vld [vmem:[%s9565_s10 + $0x160] ss:$8 sps:$4 sm:$0xff]  }
 0x7c0   : > { %4385 = vmatprep.subr.bf16.mxu1 %v7567_v62  ;;  %v7630_v62 = vld [vmem:[%s9565_s10 + $0x174] ss:$8 sps:$4 sm:$0xff]  }
 0x7c2   : > { %7192 = vmatmul.mubr.msk.bf16.gmra.mrb[156].mxu1 %vm4162_vm1, %v7556_v14  ;;  %v7628_v14 = vld [vmem:[%s9565_s10 + $0x170] ss:$8 sps:$4 sm:$0xff]  }
 0x7c3   : > { %7195 = vmatprep.mubr.msk.bf16.mxu1 %vm4162_vm1, %v7557_v61  ;;  %4386 = vmatpush1.bf16.msra.mxu1 %v7565_v16  ;;  %v4727_v61 = vlaneseq }
 0x7c4   : > { %4387 = vmatprep.subr.bf16.mxu1 %v7570_v18 }
 0x7c5   : > { %v4728_v16 = vshrl.u32 %v4727_v61, 7  ;;  %v7632_v61 = vld [vmem:[%s9567_s12 + $0x8] sm:$0xff]  }
 0x7c7   : > { %4388 = vmatpush1.bf16.msra.mxu1 %v7568_v21  ;;  %v9104_v18 = vsub.s32 0, %v4728_v16  ;;  %v4725_v21 = vld [vmem:[%s9566_s11] ss:$4 sm:$0x3] }
 0x7c8   : > { %4389 = vmatprep.subr.bf16.mxu1 %v7573_v23  ;;  %v9109_v23 = vsub.s32 1, %v4728_v16  ;;  %v7640_v16 = vld [vmem:[%s9568_s13 + $0x120] ss:$8 sps:$4 sm:$0xff]  }
 0x7ca   : > { %7196 = vmatmul.mubr.msk.bf16.gmra.mrb[160].mxu1 %vm4162_vm1, %v7558_v25  ;;  %v4730_v25 = vrot.slane %v4725_v21, %v9104_v18 }
 0x7cb   : > { %4390 = vmatpush1.bf16.msra.mxu1 %v7571_v28  ;;  %4413 = vmatprep.mubr.bf16.mxu1 %v7858_v0  ;;  %v6375_v28 = vld [vmem:[%s9566_s11 + $0x1] ss:$4 sm:$0x3] }
 0x7cc   : > { %4391 = vmatprep.subr.bf16.mxu1 %v7576_v30  ;;  %v4734_v30 = vrot.slane %v4725_v21, %v9109_v23  ;;  %v7645_v21 = vld [vmem:[%s9568_s13 + $0x134] ss:$8 sps:$4 sm:$0xff]  }
 0x7cf   : > { %4392 = vmatpush1.bf16.msra.mxu1 %v7574_v32 }
 0x7d0   : > { %4393 = vmatprep.subr.bf16.mxu1 %v7579_v37  ;;  %v4761_v37 = vrot.slane %v6375_v28, %v9104_v18 }
 0x7d3   : > { %4394 = vmatpush1.bf16.msra.mxu1 %v7577_v35 }
 0x7d4   : > { %4395 = vmatprep.subr.bf16.mxu1 %v7582_v15 }
 0x7d7   : > { %4396 = vmatpush1.bf16.msra.mxu1 %v7580_v17  ;;  %v6376_v17 = vld [vmem:[%s9566_s11 + $0x2] ss:$4 sm:$0x3] }
 0x7d8   : > { %4514 = vmatprep.subr.bf16.mxu1 %v7585_v22 }
 0x88d   : > { %v8987_v24 = vpop.f32.mrb[152].mxu1 }
 0x88e   : > { %v4215_v26 = vpop.f32.mrb[153].mxu1 }
 0x88f   : > { %v8989_v27 = vpop.f32.mrb[154].mxu1 }
 0x890   : > { %v4263_v29 = vpack.c.bf16 %v8989_v27, %v8987_v24  ;;  %v4218_v31 = vpop.f32.mrb[155].mxu1  ;;  %v4765_v24 = vrot.slane %v6375_v28, %v9109_v23  ;;  %v7648_v28 = vld [vmem:[%s9568_s13 + $0x144] ss:$8 sps:$4 sm:$0xff]  }
 0x891   : > { %v4262_v33 = vpack.c.bf16 %v4218_v31, %v4215_v26 }
 0x895   : > { %v7193_v34 = vpop.f32.mrb[156].mxu1 }
 0x896   : > { %v4231_v36 = vpop.f32.mrb[157].mxu1 }
 0x897   : > { %v7194_v38 = vpop.f32.mrb[158].mxu1 }
 0x898   : > { %v4265_v39 = vpack.c.bf16 %v7194_v38, %v7193_v34  ;;  %v4234_v40 = vpop.f32.mrb[159].mxu1  ;;  %v4780_v38 = vrot.slane %v6376_v17, %v9104_v18 }
 0x899   : > { %v4264_v42 = vpack.c.bf16 %v4234_v40, %v4231_v36 }
 0x89b   : > { %4414 = vmatmul.mubr.bf16.vlgmr.msra.gmra.mrb[164].mxu1 %v4264_v42 }
 0x89c   : > { %4515 = vmatpush1.bf16.msra.mxu1 %v7583_v41  ;;  %4423 = vmatprep.mubr.bf16.mxu1 %v7858_v0  ;;  %v4784_v41 = vrot.slane %v6376_v17, %v9109_v23  ;;  %v7657_v17 = vld [vmem:[%s9568_s13 + $0x174] ss:$8 sps:$4 sm:$0xff]  }
 0x89d   : > { %4516 = vmatprep.subr.bf16.mxu1 %v7588_v44  ;;  %v9006_v13 = vpop.f32.mrb[160].mxu1 }
 0x89e   : > { %v9008_v45 = vpop.f32.mrb[161].mxu1 }
 0x89f   : > { %v9010_v47 = vpop.f32.mrb[162].mxu1 }
 0x8a0   : > { %4517 = vmatpush1.bf16.msra.mxu1 %v7586_v58  ;;  %v4267_v50 = vpack.c.bf16 %v9010_v47, %v9006_v13  ;;  %v4250_v52 = vpop.f32.mrb[163].mxu1 }
 0x8a1   : > { %4518 = vmatprep.subr.bf16.mxu1 %v7591_v43  ;;  %v4266_v55 = vpack.c.bf16 %v4250_v52, %v9008_v45 }
 0x8a3   : > { %4424 = vmatmul.mubr.bf16.gmra.mrb[168].mxu1 %v4265_v39 }
 0x8a4   : > { %4519 = vmatpush1.bf16.msra.mxu1 %v7589_v48  ;;  %4546 = vmatprep.mubr.bf16.mxu1 %v7858_v0 }
 0x8a5   : > { %4520 = vmatprep.subr.bf16.mxu1 %v7594_v54 }
 0x8a8   : > { %4521 = vmatpush1.bf16.msra.mxu1 %v7592_v57 }
 0x8a9   : > { %4522 = vmatprep.subr.bf16.mxu1 %v7597_v59 }
 0x8ac   : > { %4523 = vmatpush1.bf16.msra.mxu1 %v7595_v1 }
 0x8ad   : > { %4524 = vmatprep.subr.bf16.mxu1 %v7600_v3 }
 0x8b0   : > { %4525 = vmatpush1.bf16.msra.mxu1 %v7598_v5 }
 0x8b1   : > { %4526 = vmatprep.subr.bf16.mxu1 %v7603_v6 }
 0x8b4   : > { %4527 = vmatpush1.bf16.msra.mxu1 %v7601_v46 }
 0x8b5   : > { %4528 = vmatprep.subr.bf16.mxu1 %v7606_v49 }
 0x8b8   : > { %4529 = vmatpush1.bf16.msra.mxu1 %v7604_v51 }
 0x8b9   : > { %4664 = vmatprep.subr.bf16.mxu1 %v7609_v8 }
 0x8bb   : > { %4547 = vmatmul.mubr.bf16.vlgmr.msra.gmra.mrb[164].mxu1 %v4262_v33 }
 0x8bc   : > { %4665 = vmatpush1.bf16.msra.mxu1 %v7607_v10  ;;  %4556 = vmatprep.mubr.bf16.mxu1 %v7858_v0 }
 0x8bd   : > { %4666 = vmatprep.subr.bf16.mxu1 %v7612_v12 }
 0x8c0   : > { %4667 = vmatpush1.bf16.msra.mxu1 %v7610_v53 }
 0x8c1   : > { %4668 = vmatprep.subr.bf16.mxu1 %v7615_v56 }
 0x8c3   : > { %4557 = vmatmul.mubr.bf16.gmra.mrb[168].mxu1 %v4263_v29 }
 0x8c4   : > { %4669 = vmatpush1.bf16.msra.mxu1 %v7613_v60  ;;  %4696 = vmatprep.mubr.bf16.mxu1 %v7858_v0 }
 0x8c5   : > { %4670 = vmatprep.subr.bf16.mxu1 %v7618_v63 }
 0x8c8   : > { %4671 = vmatpush1.bf16.msra.mxu1 %v7616_v2 }
 0x8c9   : > { %4672 = vmatprep.subr.bf16.mxu1 %v7621_v20 }
 0x8cc   : > { %4673 = vmatpush1.bf16.msra.mxu1 %v7619_v4 }
 0x8cd   : > { %4674 = vmatprep.subr.bf16.mxu1 %v7624_v7  ;;  %v7636_v7 = vld [vmem:[%s9568_s13 + $0x104] ss:$8 sps:$4 sm:$0xff]  }
 0x8d0   : > { %4675 = vmatpush1.bf16.msra.mxu1 %v7622_v9  ;;  %v7631_v9 = vld [vmem:[%s9567_s12] sm:$0xff]  }
 0x8d1   : > { %4676 = vmatprep.subr.bf16.mxu1 %v7627_v19  ;;  %v7634_v19 = vld [vmem:[%s9568_s13 + $0x100] ss:$8 sps:$4 sm:$0xff]  }
 0x8d4   : > { %4677 = vmatpush1.bf16.msra.mxu1 %v7625_v11  ;;  %v7639_v11 = vld [vmem:[%s9568_s13 + $0x114] ss:$8 sps:$4 sm:$0xff]  }
 0x8d5   : > { %4678 = vmatprep.subr.bf16.mxu1 %v7630_v62  ;;  %v7637_v62 = vld [vmem:[%s9568_s13 + $0x110] ss:$8 sps:$4 sm:$0xff]  }
 0x8d8   : > { %4679 = vmatpush1.bf16.msra.mxu1 %v7628_v14  ;;  %v7642_v14 = vld [vmem:[%s9568_s13 + $0x124] ss:$8 sps:$4 sm:$0xff]  }
 0x8db   : > { %4697 = vmatmul.mubr.bf16.vlgmr.msra.gmra.mrb[164].mxu1 %v4266_v55 }
 0x8dc   : > { %4706 = vmatprep.mubr.bf16.mxu1 %v7858_v0 }
 0x8e3   : > { %4707 = vmatmul.mubr.bf16.gmra.mrb[168].mxu1 %v4267_v50 }
 0x8e4   : > { %5668 = vmatprep.mubr.bf16.mxu1 %v7858_v0 }
 0x9ae   : > { %v4698_v32 = vpop.f32.mrb[164].mxu1 }
 0x9af   : > { %v4737_v35 = vadd.f32 %v4730_v25, %v4698_v32  ;;  %v4700_v15 = vpop.f32.mrb[165].mxu1  ;;  %v7646_v32 = vld [vmem:[%s9568_s13 + $0x140] ss:$8 sps:$4 sm:$0xff]  }
 0x9b0   : > { %v4738_v22 = vadd.f32 %v4734_v30, %v4700_v15  ;;  %v4702_v26 = vpop.f32.mrb[166].mxu1  ;;  %v7652_v15 = vld [vmem:[%s9568_s13 + $0x160] ss:$8 sps:$4 sm:$0xff]  }
 0x9b1   : > { %v4745_v27 = vmax.f32 %v4737_v35, 0.0  ;;  %v4739_v29 = vadd.f32 %v4730_v25, %v4702_v26  ;;  %v4704_v31 = vpop.f32.mrb[167].mxu1  ;;  %v7649_v35 = vld [vmem:[%s9568_s13 + $0x150] ss:$8 sps:$4 sm:$0xff]   ;;  %v7658_v26 = vld [vmem:[%s9568_s13 + $0x180] ss:$8 sps:$4 sm:$0xff]  }
 0x9b2   : > { %v4746_v33 = vmax.f32 %v4738_v22, 0.0  ;;  %v4740_v34 = vadd.f32 %v4734_v30, %v4704_v31  ;;  %v7655_v22 = vld [vmem:[%s9568_s13 + $0x170] ss:$8 sps:$4 sm:$0xff]   ;;  %v7666_v31 = vld [vmem:[%s9568_s13 + $0x1a4] ss:$8 sps:$4 sm:$0xff]  }
 0x9b3   : > { %v4768_v36 = vmul.f32 %v4761_v37, %v4745_v27  ;;  %v4747_v39 = vmax.f32 %v4739_v29, 0.0  ;;  %v7663_v27 = vld [vmem:[%s9568_s13 + $0x194] ss:$8 sps:$4 sm:$0xff]   ;;  %v7661_v29 = vld [vmem:[%s9568_s13 + $0x190] ss:$8 sps:$4 sm:$0xff]  }
 0x9b4   : > { %v4769_v40 = vmul.f32 %v4765_v24, %v4746_v33  ;;  %v4748_v42 = vmax.f32 %v4740_v34, 0.0  ;;  %v7664_v33 = vld [vmem:[%s9568_s13 + $0x1a0] ss:$8 sps:$4 sm:$0xff]   ;;  %v7669_v34 = vld [vmem:[%s9568_s13 + $0x1b4] ss:$8 sps:$4 sm:$0xff]  }
 0x9b5   : > { %v4770_v44 = vmul.f32 %v4761_v37, %v4747_v39  ;;  %v4787_v13 = vadd.f32 %v4780_v38, %v4768_v36  ;;  %v7667_v36 = vld [vmem:[%s9568_s13 + $0x1b0] ss:$8 sps:$4 sm:$0xff]   ;;  %v7670_v39 = vld [vmem:[%s9568_s13 + $0x1c0] ss:$8 sps:$4 sm:$0xff]  }
 0x9b6   : > { %v4771_v58 = vmul.f32 %v4765_v24, %v4748_v42  ;;  %v4708_v43 = vpop.f32.mrb[168].mxu1  ;;  %v4788_v50 = vadd.f32 %v4784_v41, %v4769_v40  ;;  %v7675_v40 = vld [vmem:[%s9568_s13 + $0x1d4] ss:$8 sps:$4 sm:$0xff]   ;;  %v7676_v42 = vld [vmem:[%s9568_s13 + $0x1e0] ss:$8 sps:$4 sm:$0xff]  }
 0x9b7   : > { %v4789_v45 = vadd.f32 %v4780_v38, %v4770_v44  ;;  %v4741_v47 = vadd.f32 %v4730_v25, %v4708_v43  ;;  %v4710_v48 = vpop.f32.mrb[169].mxu1  ;;  %v7678_v44 = vld [vmem:[%s9568_s13 + $0x1e4] ss:$8 sps:$4 sm:$0xff]   ;;  %v7679_v43 = vld [vmem:[%s9568_s13 + $0x1f0] ss:$8 sps:$4 sm:$0xff]  }
 0x9b8   : > { %v4790_v52 = vadd.f32 %v4784_v41, %v4771_v58  ;;  %v4742_v54 = vadd.f32 %v4734_v30, %v4710_v48  ;;  %v4712_v55 = vpop.f32.mrb[170].mxu1  ;;  %v7681_v58 = vld [vmem:[%s9568_s13 + $0x1f4] ss:$8 sps:$4 sm:$0xff]  }
 0x9b9   : > { %v4795_v57 = vpack.c.bf16 %v4789_v45, %v4787_v13  ;;  %v4749_v59 = vmax.f32 %v4741_v47, 0.0  ;;  %v4743_v1 = vadd.f32 %v4730_v25, %v4712_v55  ;;  %v4714_v3 = vpop.f32.mrb[171].mxu1  ;;  %v7643_v25 = vld [vmem:[%s9568_s13 + $0x130] ss:$8 sps:$4 sm:$0xff]   ;;  %v7684_v13 = vld [vmem:[%s9568_s13 + $0x4] ss:$8 sps:$4 sm:$0xff]  }
 0x9ba   : > { %v4750_v5 = vmax.f32 %v4742_v54, 0.0  ;;  %v4744_v6 = vadd.f32 %v4734_v30, %v4714_v3  ;;  %v4796_v46 = vpack.c.bf16 %v4790_v52, %v4788_v50  ;;  %v7633_v30 = vld [vmem:[%s9567_s12 + $0x10] sm:$0xff]  }
 0x9bb   : > { %v4772_v49 = vmul.f32 %v4761_v37, %v4749_v59  ;;  %v4751_v51 = vmax.f32 %v4743_v1, 0.0 }
 0x9bc   : > { %v4773_v8 = vmul.f32 %v4765_v24, %v4750_v5  ;;  %v4752_v10 = vmax.f32 %v4744_v6, 0.0  ;;  %4829 = vmatprep.subr.bf16.mxu0 %v4796_v46  ;;  %v7682_v6 = vld [vmem:[%s9568_s13] ss:$8 sps:$4 sm:$0xff]   ;;  %v7687_v46 = vld [vmem:[%s9568_s13 + $0x14] ss:$8 sps:$4 sm:$0xff]  }
 0x9bd   : > { %v4774_v12 = vmul.f32 %v4761_v37, %v4751_v51  ;;  %4830 = vmatpush1.bf16.msra.mxu0 %v4795_v57  ;;  %v4791_v56 = vadd.f32 %v4780_v38, %v4772_v49  ;;  %v7654_v37 = vld [vmem:[%s9568_s13 + $0x164] ss:$8 sps:$4 sm:$0xff]   ;;  %v7685_v49 = vld [vmem:[%s9568_s13 + $0x10] ss:$8 sps:$4 sm:$0xff]  }
 0x9be   : > { %v4775_v53 = vmul.f32 %v4765_v24, %v4752_v10  ;;  %v4792_v63 = vadd.f32 %v4784_v41, %v4773_v8  ;;  %v7660_v24 = vld [vmem:[%s9568_s13 + $0x184] ss:$8 sps:$4 sm:$0xff]  }
 0x9bf   : > { %v4793_v60 = vadd.f32 %v4780_v38, %v4774_v12  ;;  %v7672_v38 = vld [vmem:[%s9568_s13 + $0x1c4] ss:$8 sps:$4 sm:$0xff]  }
 0x9c0   : > { %v4794_v2 = vadd.f32 %v4784_v41, %v4775_v53  ;;  %v7673_v41 = vld [vmem:[%s9568_s13 + $0x1d0] ss:$8 sps:$4 sm:$0xff]   ;;  %v7690_v8 = vld [vmem:[%s9568_s13 + $0x24] ss:$8 sps:$4 sm:$0xff]  }
 0x9c1   : > { %v4797_v20 = vpack.c.bf16 %v4793_v60, %v4791_v56  ;;  %v7688_v60 = vld [vmem:[%s9568_s13 + $0x20] ss:$8 sps:$4 sm:$0xff]  }
 0x9c2   : > { %v4798_v4 = vpack.c.bf16 %v4794_v2, %v4792_v63  ;;  %v7693_v2 = vld [vmem:[%s9568_s13 + $0x34] ss:$8 sps:$4 sm:$0xff]  }
 0x9c4   : > { %4831 = vmatprep.subr.bf16.mxu0 %v4798_v4  ;;  %v7696_v4 = vld [vmem:[%s9568_s13 + $0x44] ss:$8 sps:$4 sm:$0xff]  }
 0x9c5   : > { %4832 = vmatpush1.bf16.msra.mxu0 %v4797_v20  ;;  %v7691_v20 = vld [vmem:[%s9568_s13 + $0x30] ss:$8 sps:$4 sm:$0xff]  }
 0x9c6   : > { %5123 = vmatprep.subr.bf16.mxu0 %v7636_v7  ;;  %v7694_v7 = vld [vmem:[%s9568_s13 + $0x40] ss:$8 sps:$4 sm:$0xff]  }
 0x9c8   : > { %6380 = vmatmul.mubr.msk.bf16.vlgmr.msra.gmra.mrb[164].mxu0 %vm4162_vm1, %v7631_v9  ;;  %v7699_v9 = vld [vmem:[%s9568_s13 + $0x54] ss:$8 sps:$4 sm:$0xff]  }
 0x9c9   : > { %4871 = vmatprep.mubr.bf16.mxu0 %v7858_v0  ;;  %5124 = vmatpush1.bf16.msra.mxu0 %v7634_v19  ;;  %v7697_v19 = vld [vmem:[%s9568_s13 + $0x50] ss:$8 sps:$4 sm:$0xff]  }
 0x9ca   : > { %5125 = vmatprep.subr.bf16.mxu0 %v7639_v11  ;;  %v7702_v11 = vld [vmem:[%s9568_s13 + $0x64] ss:$8 sps:$4 sm:$0xff]  }
 0x9cd   : > { %5126 = vmatpush1.bf16.msra.mxu0 %v7637_v62  ;;  %v7700_v62 = vld [vmem:[%s9568_s13 + $0x60] ss:$8 sps:$4 sm:$0xff]  }
 0x9ce   : > { %5127 = vmatprep.subr.bf16.mxu0 %v7642_v14  ;;  %v7705_v14 = vld [vmem:[%s9568_s13 + $0x74] ss:$8 sps:$4 sm:$0xff]  }
 0x9d0   : > { %6381 = vmatmul.mubr.msk.bf16.gmra.mrb[168].mxu0 %vm4162_vm1, %v7632_v61  ;;  %v7703_v61 = vld [vmem:[%s9568_s13 + $0x70] ss:$8 sps:$4 sm:$0xff]  }
 0x9d1   : > { %4881 = vmatprep.mubr.bf16.mxu0 %v7858_v0  ;;  %5128 = vmatpush1.bf16.msra.mxu0 %v7640_v16  ;;  %v7651_v0 = vld [vmem:[%s9568_s13 + $0x154] ss:$8 sps:$4 sm:$0xff]   ;;  %v7708_v16 = vld [vmem:[%s9568_s13 + $0x84] ss:$8 sps:$4 sm:$0xff]  }
 0x9d2   : > { %5129 = vmatprep.subr.bf16.mxu0 %v7645_v21  ;;  %v7706_v21 = vld [vmem:[%s9568_s13 + $0x80] ss:$8 sps:$4 sm:$0xff]  }
 0x9d5   : > { %5130 = vmatpush1.bf16.msra.mxu0 %v7643_v25  ;;  %v7711_v25 = vld [vmem:[%s9568_s13 + $0x94] ss:$8 sps:$4 sm:$0xff]  }
 0x9d6   : > { %5131 = vmatprep.subr.bf16.mxu0 %v7648_v28  ;;  %v7709_v28 = vld [vmem:[%s9568_s13 + $0x90] ss:$8 sps:$4 sm:$0xff]  }
 0x9d8   : > { %6382 = vmatmul.mubr.msk.bf16.gmra.mrb[172].mxu0 %vm4162_vm1, %v7633_v30  ;;  %v7714_v30 = vld [vmem:[%s9568_s13 + $0xa4] ss:$8 sps:$4 sm:$0xff]  }
 0x9d9   : > { %5132 = vmatpush1.bf16.msra.mxu0 %v7646_v32  ;;  %v7712_v32 = vld [vmem:[%s9568_s13 + $0xa0] ss:$8 sps:$4 sm:$0xff]  }
 0x9da   : > { %5133 = vmatprep.subr.bf16.mxu0 %v7651_v0  ;;  %v7717_v0 = vld [vmem:[%s9568_s13 + $0xb4] ss:$8 sps:$4 sm:$0xff]  }
 0x9dd   : > { %5134 = vmatpush1.bf16.msra.mxu0 %v7649_v35  ;;  %v7715_v35 = vld [vmem:[%s9568_s13 + $0xb0] ss:$8 sps:$4 sm:$0xff]  }
 0x9de   : > { %5135 = vmatprep.subr.bf16.mxu0 %v7654_v37  ;;  %v7720_v37 = vld [vmem:[%s9568_s13 + $0xc4] ss:$8 sps:$4 sm:$0xff]  }
 0x9e1   : > { %5136 = vmatpush1.bf16.msra.mxu0 %v7652_v15  ;;  %v7718_v15 = vld [vmem:[%s9568_s13 + $0xc0] ss:$8 sps:$4 sm:$0xff]  }
 0x9e2   : > { %5137 = vmatprep.subr.bf16.mxu0 %v7657_v17  ;;  %v7723_v17 = vld [vmem:[%s9568_s13 + $0xd4] ss:$8 sps:$4 sm:$0xff]  }
 0x9e5   : > { %5138 = vmatpush1.bf16.msra.mxu0 %v7655_v22  ;;  %v7721_v22 = vld [vmem:[%s9568_s13 + $0xd0] ss:$8 sps:$4 sm:$0xff]  }
 0x9e6   : > { %5139 = vmatprep.subr.bf16.mxu0 %v7660_v24  ;;  %v7726_v24 = vld [vmem:[%s9568_s13 + $0xe4] ss:$8 sps:$4 sm:$0xff]  }
 0x9e9   : > { %5140 = vmatpush1.bf16.msra.mxu0 %v7658_v26  ;;  %v7724_v26 = vld [vmem:[%s9568_s13 + $0xe0] ss:$8 sps:$4 sm:$0xff]  }
 0x9ea   : > { %5141 = vmatprep.subr.bf16.mxu0 %v7663_v27  ;;  %v7729_v27 = vld [vmem:[%s9568_s13 + $0xf4] ss:$8 sps:$4 sm:$0xff]  }
 0x9ed   : > { %5142 = vmatpush1.bf16.msra.mxu0 %v7661_v29  ;;  %v7727_v29 = vld [vmem:[%s9568_s13 + $0xf0] ss:$8 sps:$4 sm:$0xff]  }
 0x9ee   : > { %5143 = vmatprep.subr.bf16.mxu0 %v7666_v31  ;;  %v7732_v31 = vld [vmem:[%s9568_s13 + $0x204] ss:$8 sps:$4 sm:$0xff]  }
 0x9f1   : > { %5144 = vmatpush1.bf16.msra.mxu0 %v7664_v33  ;;  %v7730_v33 = vld [vmem:[%s9568_s13 + $0x200] ss:$8 sps:$4 sm:$0xff]  }
 0x9f2   : > { %5145 = vmatprep.subr.bf16.mxu0 %v7669_v34  ;;  %v7735_v34 = vld [vmem:[%s9568_s13 + $0x214] ss:$8 sps:$4 sm:$0xff]  }
 0x9f5   : > { %5146 = vmatpush1.bf16.msra.mxu0 %v7667_v36  ;;  %v7733_v36 = vld [vmem:[%s9568_s13 + $0x210] ss:$8 sps:$4 sm:$0xff]  }
 0x9f6   : > { %5147 = vmatprep.subr.bf16.mxu0 %v7672_v38  ;;  %v7738_v38 = vld [vmem:[%s9568_s13 + $0x224] ss:$8 sps:$4 sm:$0xff]  }
 0x9f9   : > { %5148 = vmatpush1.bf16.msra.mxu0 %v7670_v39  ;;  %v7736_v39 = vld [vmem:[%s9568_s13 + $0x220] ss:$8 sps:$4 sm:$0xff]  }
 0x9fa   : > { %5149 = vmatprep.subr.bf16.mxu0 %v7675_v40  ;;  %v7741_v40 = vld [vmem:[%s9568_s13 + $0x234] ss:$8 sps:$4 sm:$0xff]  }
 0x9fd   : > { %5150 = vmatpush1.bf16.msra.mxu0 %v7673_v41  ;;  %v7739_v41 = vld [vmem:[%s9568_s13 + $0x230] ss:$8 sps:$4 sm:$0xff]  }
 0x9fe   : > { %5151 = vmatprep.subr.bf16.mxu0 %v7678_v44  ;;  %v7742_v44 = vld [vmem:[%s9568_s13 + $0x240] ss:$8 sps:$4 sm:$0xff]  }
 0xa01   : > { %5152 = vmatpush1.bf16.msra.mxu0 %v7676_v42  ;;  %v7744_v42 = vld [vmem:[%s9568_s13 + $0x244] ss:$8 sps:$4 sm:$0xff]  }
 0xa02   : > { %5153 = vmatprep.subr.bf16.mxu0 %v7681_v58  ;;  %v7747_v58 = vld [vmem:[%s9568_s13 + $0x254] ss:$8 sps:$4 sm:$0xff]  }
 0xa05   : > { %5154 = vmatpush1.bf16.msra.mxu0 %v7679_v43  ;;  %v7745_v43 = vld [vmem:[%s9568_s13 + $0x250] ss:$8 sps:$4 sm:$0xff]  }
 0xa06   : > { %5326 = vmatprep.subr.bf16.mxu0 %v7684_v13  ;;  %v7750_v13 = vld [vmem:[%s9568_s13 + $0x264] ss:$8 sps:$4 sm:$0xff]  }
 0xa9b   : > { %v9236_v45 = vpop.f32.mrb[164].mxu0 }
 0xa9c   : > { %v4865_v47 = vpop.f32.mrb[165].mxu0 }
 0xa9d   : > { %v9238_v48 = vpop.f32.mrb[166].mxu0 }
 0xa9e   : > { %v4892_v50 = vpack.c.bf16 %v9238_v48, %v9236_v45  ;;  %v4869_v52 = vpop.f32.mrb[167].mxu0  ;;  %v7748_v45 = vld [vmem:[%s9568_s13 + $0x260] ss:$8 sps:$4 sm:$0xff]   ;;  %v7751_v48 = vld [vmem:[%s9568_s13 + $0x270] ss:$8 sps:$4 sm:$0xff]  }
 0xa9f   : > { %v4893_v54 = vpack.c.bf16 %v4869_v52, %v4865_v47  ;;  %v7753_v47 = vld [vmem:[%s9568_s13 + $0x274] ss:$8 sps:$4 sm:$0xff]   ;;  %v7754_v52 = vld [vmem:[%s9568_s13 + $0x280] ss:$8 sps:$4 sm:$0xff]  }
 0xaa3   : > { %v4873_v55 = vpop.f32.mrb[168].mxu0 }
 0xaa4   : > { %v4875_v57 = vpop.f32.mrb[169].mxu0 }
 0xaa5   : > { %v4877_v59 = vpop.f32.mrb[170].mxu0 }
 0xaa6   : > { %v4894_v1 = vpack.c.bf16 %v4877_v59, %v4873_v55  ;;  %v4879_v3 = vpop.f32.mrb[171].mxu0  ;;  %v7757_v55 = vld [vmem:[%s9568_s13 + $0x290] ss:$8 sps:$4 sm:$0xff]   ;;  %v7760_v59 = vld [vmem:[%s9568_s13 + $0x2a0] ss:$8 sps:$4 sm:$0xff]  }
 0xaa7   : > { %v4895_v5 = vpack.c.bf16 %v4879_v3, %v4875_v57  ;;  %v7762_v57 = vld [vmem:[%s9568_s13 + $0x2a4] ss:$8 sps:$4 sm:$0xff]   ;;  %v7763_v3 = vld [vmem:[%s9568_s13 + $0x2b0] ss:$8 sps:$4 sm:$0xff]  }
 0xaa9   : > { %5155 = vmatprep.mubr.bf16.mxu0 %v4895_v5  ;;  %v7768_v5 = vld [vmem:[%s9568_s13 + $0x2c4] ss:$8 sps:$4 sm:$0xff]  }
 0xaaa   : > { %5156 = vmatmul.mubr.bf16.vlgmr.msra.gmra.mrb[176].mxu0 %v4894_v1  ;;  %v7765_v1 = vld [vmem:[%s9568_s13 + $0x2b4] ss:$8 sps:$4 sm:$0xff]  }
 0xaab   : > { %5327 = vmatpush1.bf16.msra.mxu0 %v7682_v6  ;;  %5358 = vmatprep.mubr.bf16.mxu0 %v4893_v54  ;;  %v9251_v51 = vpop.f32.mrb[172].mxu0  ;;  %v7759_v54 = vld [vmem:[%s9568_s13 + $0x294] ss:$8 sps:$4 sm:$0xff]   ;;  %v7766_v6 = vld [vmem:[%s9568_s13 + $0x2c0] ss:$8 sps:$4 sm:$0xff]  }
 0xaac   : > { %5328 = vmatprep.subr.bf16.mxu0 %v7687_v46  ;;  %v9256_v10 = vpop.f32.mrb[173].mxu0  ;;  %v7771_v46 = vld [vmem:[%s9568_s13 + $0x2d4] ss:$8 sps:$4 sm:$0xff]  }
 0xaad   : > { %v9258_v12 = vpop.f32.mrb[174].mxu0 }
 0xaae   : > { %v4896_v53 = vpack.c.bf16 %v9258_v12, %v9251_v51  ;;  %v9262_v56 = vpop.f32.mrb[175].mxu0 }
 0xaaf   : > { %5329 = vmatpush1.bf16.msra.mxu0 %v7685_v49  ;;  %v4897_v63 = vpack.c.bf16 %v9262_v56, %v9256_v10  ;;  %v7769_v49 = vld [vmem:[%s9568_s13 + $0x2d0] ss:$8 sps:$4 sm:$0xff]   ;;  %v7772_v10 = vld [vmem:[%s9568_s13 + $0x2e0] ss:$8 sps:$4 sm:$0xff]   ;;  %v7777_v56 = vld [vmem:[%s9568_s13 + $0x2f4] ss:$8 sps:$4 sm:$0xff]  }
 0xab0   : > { %5330 = vmatprep.subr.bf16.mxu0 %v7690_v8  ;;  %v7774_v8 = vld [vmem:[%s9568_s13 + $0x2e4] ss:$8 sps:$4 sm:$0xff]  }
 0xab3   : > { %5331 = vmatpush1.bf16.msra.mxu0 %v7688_v60  ;;  %v7775_v60 = vld [vmem:[%s9568_s13 + $0x2f0] ss:$8 sps:$4 sm:$0xff]  }
 0xab4   : > { %5332 = vmatprep.subr.bf16.mxu0 %v7693_v2 }
 0xab7   : > { %5333 = vmatpush1.bf16.msra.mxu0 %v7691_v20 }
 0xab8   : > { %5334 = vmatprep.subr.bf16.mxu0 %v7696_v4 }
 0xabb   : > { %5335 = vmatpush1.bf16.msra.mxu0 %v7694_v7 }
 0xabc   : > { %5336 = vmatprep.subr.bf16.mxu0 %v7699_v9 }
 0xabf   : > { %5337 = vmatpush1.bf16.msra.mxu0 %v7697_v19 }
 0xac0   : > { %5338 = vmatprep.subr.bf16.mxu0 %v7702_v11 }
 0xac3   : > { %5339 = vmatpush1.bf16.msra.mxu0 %v7700_v62 }
 0xac4   : > { %5340 = vmatprep.subr.bf16.mxu0 %v7705_v14 }
 0xac7   : > { %5341 = vmatpush1.bf16.msra.mxu0 %v7703_v61 }
 0xac8   : > { %5342 = vmatprep.subr.bf16.mxu0 %v7708_v16 }
 0xacb   : > { %5343 = vmatpush1.bf16.msra.mxu0 %v7706_v21 }
 0xacc   : > { %5344 = vmatprep.subr.bf16.mxu0 %v7711_v25 }
 0xacf   : > { %5345 = vmatpush1.bf16.msra.mxu0 %v7709_v28  ;;  %v7779_v28 = vld [vmem:[%s9571_s16] sm:$0xff]  }
 0xad0   : > { %5346 = vmatprep.subr.bf16.mxu0 %v7714_v30  ;;  %v7780_v30 = vld [vmem:[%s9571_s16 + $0x48] sm:$0xff]  }
 0xad3   : > { %5347 = vmatpush1.bf16.msra.mxu0 %v7712_v32  ;;  %v7781_v32 = vld [vmem:[%s9571_s16 + $0x8] sm:$0xff]  }
 0xad4   : > { %5348 = vmatprep.subr.bf16.mxu0 %v7717_v0  ;;  %v7782_v0 = vld [vmem:[%s9571_s16 + $0x50] sm:$0xff]  }
 0xad7   : > { %5349 = vmatpush1.bf16.msra.mxu0 %v7715_v35  ;;  %v7783_v35 = vld [vmem:[%s9571_s16 + $0x10] sm:$0xff]  }
 0xad8   : > { %5350 = vmatprep.subr.bf16.mxu0 %v7720_v37  ;;  %v7784_v37 = vld [vmem:[%s9571_s16 + $0x58] sm:$0xff]  }
 0xadb   : > { %5351 = vmatpush1.bf16.msra.mxu0 %v7718_v15  ;;  %v7785_v15 = vld [vmem:[%s9571_s16 + $0x18] sm:$0xff]  }
 0xadc   : > { %5352 = vmatprep.subr.bf16.mxu0 %v7723_v17  ;;  %v7786_v17 = vld [vmem:[%s9571_s16 + $0x60] sm:$0xff]  }
 0xadf   : > { %5353 = vmatpush1.bf16.msra.mxu0 %v7721_v22  ;;  %v7787_v22 = vld [vmem:[%s9571_s16 + $0x20] sm:$0xff]  }
 0xae0   : > { %5354 = vmatprep.subr.bf16.mxu0 %v7726_v24  ;;  %v7788_v24 = vld [vmem:[%s9571_s16 + $0x68] sm:$0xff]  }
 0xae3   : > { %5355 = vmatpush1.bf16.msra.mxu0 %v7724_v26  ;;  %v7789_v26 = vld [vmem:[%s9571_s16 + $0x28] sm:$0xff]  }
 0xae4   : > { %5356 = vmatprep.subr.bf16.mxu0 %v7729_v27  ;;  %v7790_v27 = vld [vmem:[%s9571_s16 + $0x70] sm:$0xff]  }
 0xae7   : > { %5357 = vmatpush1.bf16.msra.mxu0 %v7727_v29  ;;  %v7791_v29 = vld [vmem:[%s9571_s16 + $0x30] sm:$0xff]  }
 0xae8   : > { %5562 = vmatprep.subr.bf16.mxu0 %v7732_v31  ;;  %v7792_v31 = vld [vmem:[%s9571_s16 + $0x78] sm:$0xff]  }
 0xaea   : > { %5359 = vmatmul.mubr.bf16.vlgmr.msra.gmra.mrb[176].mxu0 %v4892_v50  ;;  %v7756_v50 = vld [vmem:[%s9568_s13 + $0x284] ss:$8 sps:$4 sm:$0xff]  }
 0xaeb   : > { %5563 = vmatpush1.bf16.msra.mxu0 %v7730_v33  ;;  %5594 = vmatprep.mubr.bf16.mxu0 %v4897_v63  ;;  %v5609_v63 = vld [vmem:[%s9569_s14] sm:$0x3]  ;;  %v7793_v33 = vld [vmem:[%s9571_s16 + $0x38] sm:$0xff]  }
 0xaec   : > { %5564 = vmatprep.subr.bf16.mxu0 %v7735_v34  ;;  %v5614_v2 = vrot.slane %v5609_v63, %v9104_v18  ;;  %v5618_v20 = vrot.slane %v5609_v63, %v9109_v23  ;;  %v7778_v18 = vld [vmem:[%s9571_s16 + $0x40] sm:$0xff]  }
 0xaed   : > { %v5631_v23 = vld [vmem:[%s9570_s15] sm:$0xf] }
 0xaef   : > { %5565 = vmatpush1.bf16.msra.mxu0 %v7733_v36 }
 0xaf0   : > { %5566 = vmatprep.subr.bf16.mxu0 %v7738_v38 }
 0xaf3   : > { %5567 = vmatpush1.bf16.msra.mxu0 %v7736_v39 }
 0xaf4   : > { %5568 = vmatprep.subr.bf16.mxu0 %v7741_v40 }
 0xaf7   : > { %5569 = vmatpush1.bf16.msra.mxu0 %v7739_v41 }
 0xaf8   : > { %5570 = vmatprep.subr.bf16.mxu0 %v7744_v42 }
 0xafb   : > { %5571 = vmatpush1.bf16.msra.mxu0 %v7742_v44  ;;  %v6544_v44 = vld [vmem:[%s9572_s17] ss:$0 sm:$0xff] }
 0xafc   : > { %5572 = vmatprep.subr.bf16.mxu0 %v7747_v58 }
 0xaff   : > { %5573 = vmatpush1.bf16.msra.mxu0 %v7745_v43 }
 0xb00   : > { %5574 = vmatprep.subr.bf16.mxu0 %v7750_v13 }
 0xb03   : > { %5575 = vmatpush1.bf16.msra.mxu0 %v7748_v45 }
 0xb04   : > { %5576 = vmatprep.subr.bf16.mxu0 %v7753_v47 }
 0xb07   : > { %5577 = vmatpush1.bf16.msra.mxu0 %v7751_v48 }
 0xb08   : > { %5578 = vmatprep.subr.bf16.mxu0 %v7756_v50 }
 0xb0b   : > { %5579 = vmatpush1.bf16.msra.mxu0 %v7754_v52 }
 0xb0c   : > { %5580 = vmatprep.subr.bf16.mxu0 %v7759_v54 }
 0xb0f   : > { %5581 = vmatpush1.bf16.msra.mxu0 %v7757_v55 }
 0xb10   : > { %5582 = vmatprep.subr.bf16.mxu0 %v7762_v57 }
 0xb13   : > { %5583 = vmatpush1.bf16.msra.mxu0 %v7760_v59 }
 0xb14   : > { %5584 = vmatprep.subr.bf16.mxu0 %v7765_v1 }
 0xb17   : > { %5585 = vmatpush1.bf16.msra.mxu0 %v7763_v3 }
 0xb18   : > { %5586 = vmatprep.subr.bf16.mxu0 %v7768_v5 }
 0xb1b   : > { %5587 = vmatpush1.bf16.msra.mxu0 %v7766_v6 }
 0xb1c   : > { %5588 = vmatprep.subr.bf16.mxu0 %v7771_v46 }
 0xb1f   : > { %5589 = vmatpush1.bf16.msra.mxu0 %v7769_v49 }
 0xb20   : > { %5590 = vmatprep.subr.bf16.mxu0 %v7774_v8 }
 0xb23   : > { %5591 = vmatpush1.bf16.msra.mxu0 %v7772_v10 }
 0xb24   : > { %5592 = vmatprep.subr.bf16.mxu0 %v7777_v56 }
 0xb27   : > { %5593 = vmatpush1.bf16.msra.mxu0 %v7775_v60 }
 0xb2a   : > { %5595 = vmatmul.mubr.bf16.vlgmr.msra.gmra.mrb[176].mxu0 %v4896_v53 }
 0xbfd   : > { %v5596_v4 = vpop.f32.mrb[176].mxu0 }
 0xbfe   : > { %v5621_v7 = vadd.f32 %v5614_v2, %v5596_v4  ;;  %v5598_v9 = vpop.f32.mrb[177].mxu0 }
 0xbff   : > { %v5622_v19 = vadd.f32 %v5618_v20, %v5598_v9  ;;  %v5600_v11 = vpop.f32.mrb[178].mxu0 }
 0xc00   : > { %v5623_v62 = vadd.f32 %v5614_v2, %v5600_v11  ;;  %v5602_v14 = vpop.f32.mrb[179].mxu0  ;;  %v5625_v16 = vmax.f32 %v5621_v7, 0.0 }
 0xc01   : > { %v5624_v61 = vadd.f32 %v5618_v20, %v5602_v14  ;;  %v5626_v51 = vmax.f32 %v5622_v19, 0.0 }
 0xc02   : > { %v5627_v21 = vmax.f32 %v5623_v62, 0.0 }
 0xc03   : > { %v5628_v12 = vmax.f32 %v5624_v61, 0.0 }
 0xc04   : > { %v5629_v53 = vpack.c.bf16 %v5627_v21, %v5625_v16 }
 0xc05   : > { %v5630_v25 = vpack.c.bf16 %v5628_v12, %v5626_v51 }
 0xc07   : > { %5636 = vmatprep.subr.bf16.mxu1 %v5630_v25 }
 0xc08   : > { %5637 = vmatpush1.bf16.msra.mxu1 %v5629_v53 }
 0xc09   : > { %6769 = vmatprep.subr.bf16.mxu1 %v7778_v18 }
 0xc0b   : > { %6543 = vmatmul.mubr.msk.bf16.vlgmr.msra.gmra.mrb[172].mxu1 %vm5632_vm2, %v5631_v23 }
 0xc0c   : > { %6770 = vmatpush3.bf16.msra.mxu1 %v7779_v28 }
 0xc0d   : > { %6771 = vmatprep.subr.bf16.mxu1 %v7780_v30 }
 0xc10   : > { %6772 = vmatpush3.bf16.msra.mxu1 %v7781_v32 }
 0xc11   : > { %6773 = vmatprep.subr.bf16.mxu1 %v7782_v0 }
 0xc14   : > { %6774 = vmatpush3.bf16.msra.mxu1 %v7783_v35 }
 0xc15   : > { %6775 = vmatprep.subr.bf16.mxu1 %v7784_v37 }
 0xc18   : > { %6776 = vmatpush3.bf16.msra.mxu1 %v7785_v15 }
 0xc19   : > { %6777 = vmatprep.subr.bf16.mxu1 %v7786_v17 }
 0xc1c   : > { %6778 = vmatpush3.bf16.msra.mxu1 %v7787_v22 }
 0xc1d   : > { %6779 = vmatprep.subr.bf16.mxu1 %v7788_v24 }
 0xc20   : > { %6780 = vmatpush3.bf16.msra.mxu1 %v7789_v26 }
 0xc21   : > { %6781 = vmatprep.subr.bf16.mxu1 %v7790_v27 }
 0xc24   : > { %6782 = vmatpush3.bf16.msra.mxu1 %v7791_v29 }
 0xc25   : > { %6783 = vmatprep.subr.bf16.mxu1 %v7792_v31 }
 0xc28   : > { %6784 = vmatpush3.bf16.msra.mxu1 %v7793_v33 }
 0xcde   : > { %v5670_v34 = vpop.f32.mrb[172].mxu1 }
 0xcdf   : > { %v5672_v36 = vpop.f32.mrb[173].mxu1  ;;  %v5677_v40 = vpack.c.bf16 %v5670_v34, %v5670_v34 }
 0xce0   : > { %v5678_v38 = vpack.c.bf16 %v5672_v36, %v5672_v36  ;;  %v5674_v39 = vpop.f32.mrb[174].mxu1 }
 0xce1   : > { %v5675_v41 = vpop.f32.mrb[175].mxu1 }
 0xce2   : > { %5846 = vmatprep.mubr.bf16.mxu1 %v5678_v38 }
 0xce3   : > { %5847 = vmatmul.mubr.bf16.vlgmr.msra.gmra.mrb[176].mxu1 %v5677_v40 }
 0xdb6   : > { %v6785_v42 = vpop.f32.mrb[176].mxu1 }
 0xdb7   : > { %v6786_v58 = vpop.f32.mrb[177].mxu1 }
 0xdb8   : > { %v6787_v43 = vadd.f32 %v6786_v58, %v6785_v42  ;;  %v6788_v13 = vpop.f32.mrb[178].mxu1 }
 0xdb9   : > { %v6789_v45 = vpop.f32.mrb[179].mxu1 }
 0xdba   : > { %v5849_v47 = vadd.f32 %v6787_v43, %v6544_v44 }
 0xdbc   : > { %5854 = vst [vmem:[%s569_s24] sm:$0xff] %v5849_v47 }
 0xdbd   : > { %7807 = shalt.err (!%p7804_p3)
}
 0xdbe   : > { %s7808_s20 = scalar_lea.hbm %s9513_s3, 128  ;;  %s7812_s25 = scalar_lea.hbm %s9604_s26, 256 }
 0xdbf   : > { %p7809_p4 = scmp.ne.s32.totalorder %s9513_s3, %s7808_s20  ;;  %p7813_p9 = scmp.lt.u32.totalorder %s9513_s3, %s9604_s26 }
 0xdc0   : > { %p7814_p10 = scmp.lt.u32.totalorder %s7812_s25, %s7808_s20  ;;  %p7816_p12 = scmp.lt.u32.totalorder %s7808_s20, %s9513_s3 }
 0xdc1   : > { %p7810_p7 = pnand %p7809_p4, %p7993_p5 }
 0xdc2   : > { %p7815_p11 = por %p7814_p10, %p7813_p9 }
 0xdc3   : > { %p7811_p8 = pneg %p7810_p7 }
 0xdc4   : > { %p7817_p13 = por %p7816_p12, %p7815_p11 }
 0xdc6   : > { %p7818_p0 = pnand %p7817_p13, %p7811_p8 }
 0xdc8   : > { %7821 = shalt.err (!%p7818_p0)
}
 0xdc9   : > { %7295 = dma.vmem_to_hbm [thread:$0]  (%p7993_p5), %s9515_s27, 128, %s9513_s3, %s5856_s23  }
 0xdca PF: > { %s9605_s4 = sld [smem:[#allocation7_spill]]  ;;  %s9606_s29 = sld [smem:[#allocation5_spill]] }
 0xdd0   : > { %p7301_p1 = scmp.ge.s32.totalorder %s9605_s4, 2  ;;  %s5881_s21 = sand.u32 1, %s9606_s29  }
 0xdd1   : > { %s5882_s22 = scalar_lea.sflag [#allocation3], %s5881_s21 }
 0xdd2   : > { %p7298_p2 = pnand %p7301_p1, %p7997_p6 }
 0xdd4   : > { %7839 = dma.done.wait (!%p7298_p2), %s5882_s22, 128  }
 0xdd5   : > { %7841 = vsyncadd (!%p7298_p2), %s5882_s22, 4294967168  ;;  %s9608_s30 = sld [smem:[#allocation8_spill]]  ;;  %s9609_s20 = sld [smem:[#allocation6_spill]] }
 0xdd6   : > { %s9610_s29 = sld [smem:[#allocation9_spill]]  ;;  %s9611_s27 = smov %s7848_s28 }
 0xddb   : > { %p28_p3 = scmp.ge.s32.totalorder %s9608_s30, 4   ;;  %s9612_s28 = smov %s9609_s20 }
 0xddd   :  { %30 = sbr.rel (!%p28_p3) target bundleno = 10 (0xa), region = 143 }
 0xde4   :  { %5887 = vsyncpa [#allocation3], 1 }
 0xde5   :  { %5889 = vsyncpa [#allocation3 + $0x1], 1 }

</bundles_post_ra>
